<compile_context>
chip_gen: v5e
topology: v5e:2x2
jax: 0.10.0
libtpu: 0.0.40
codegen_flags: <defaults>
</compile_context>

<pallas_src>
import functools
import math

import jax
import jax.numpy as jnp
from jax import lax
from jax.experimental import pallas as pl
from jax.experimental.pallas import tpu as pltpu

# ----------------------------- configuration --------------------------------
B, S, H, V = 2, 8, 32, 64          # batch, seq, hidden, vocab
NH, HD, INTER = 2, 16, 64          # heads, head dim, FFN intermediate
MAX_POS, TYPE_VOCAB = 16, 2
TEMP = 0.01
NEG_EPS = 1.0
LN_EPS = 1e-12
ACT_DTYPE = jnp.bfloat16           # HBM dtype for matmul weights / intra-encoder activations


def _gelu(x):
    # tanh-approx GELU (used consistently in-kernel and in the jnp grad path)
    return 0.5 * x * (1.0 + jnp.tanh(0.7978845608028654 * (x + 0.044715 * x * x * x)))


def _vmem_capacity_bytes():
    try:
        return int(pltpu.get_tpu_info().vmem_capacity_bytes)
    except Exception:
        return 64 << 20


_BIG_VMEM = _vmem_capacity_bytes() >= (96 << 20)     # v5e/v6e: 128 MiB; v7x: 64 MiB
_TM_PREFS = (512, 256, 128) if _BIG_VMEM else (256, 128)
_TN_PREFS = (512, 256, 128) if _BIG_VMEM else (256, 128)
_TK_PREFS = (512, 256)
_TQ_PREFS = (256, 128)
_TKV_PREFS = (512, 256, 128) if _BIG_VMEM else (256, 128)
_TV_PREFS = (1024, 512, 256)


def _pick_tile(dim, prefs):
    """Largest preferred tile that divides `dim`; otherwise the full dim."""
    for t in prefs:
        if dim >= t and dim % t == 0:
            return t
    return dim


# ----------------------------- linear (+bias, +act) --------------------------
def _matmul_bias_kernel(x_ref, w_ref, b_ref, o_ref, acc_ref, *, act):
    @pl.when(pl.program_id(2) == 0)
    def _init():
        acc_ref[...] = jnp.zeros_like(acc_ref)

    acc_ref[...] += jnp.dot(x_ref[...], w_ref[...],
                            preferred_element_type=jnp.float32)

    @pl.when(pl.program_id(2) == pl.num_programs(2) - 1)
    def _fin():
        y = acc_ref[...] + b_ref[...]
        if act == "relu":
            y = jnp.maximum(y, 0.0)
        elif act == "tanh":
            y = jnp.tanh(y)
        elif act == "gelu":
            y = _gelu(y)
        o_ref[...] = y.astype(o_ref.dtype)


def pallas_linear(x, w, b, act="none", out_dtype=jnp.float32):
    """Tiled y = act(x @ w + b), bf16 operands, f32 VMEM accumulator over K."""
    m, k = x.shape
    _, n = w.shape
    tm = _pick_tile(m, _TM_PREFS)
    tn = _pick_tile(n, _TN_PREFS)
    tk = _pick_tile(k, _TK_PREFS)
    return pl.pallas_call(
        functools.partial(_matmul_bias_kernel, act=act),
        out_shape=jax.ShapeDtypeStruct((m, n), out_dtype),
        grid=(m // tm, n // tn, k // tk),
        in_specs=[pl.BlockSpec((tm, tk), lambda i, j, kk: (i, kk)),
                  pl.BlockSpec((tk, tn), lambda i, j, kk: (kk, j)),
                  pl.BlockSpec((1, tn), lambda i, j, kk: (0, j))],
        out_specs=pl.BlockSpec((tm, tn), lambda i, j, kk: (i, j)),
        scratch_shapes=[pltpu.VMEM((tm, tn), jnp.float32)],
        compiler_params=pltpu.CompilerParams(
            dimension_semantics=("parallel", "parallel", "arbitrary")),
    )(x, w, b.reshape(1, n))


# ----------------------- linear + (residual) + LayerNorm ---------------------
def _linear_ln_kernel(*refs, act, has_res):
    if has_res:
        x_ref, w_ref, b_ref, g_ref, bb_ref, r_ref, o_ref, acc_ref = refs
    else:
        x_ref, w_ref, b_ref, g_ref, bb_ref, o_ref, acc_ref = refs
        r_ref = None

    @pl.when(pl.program_id(1) == 0)
    def _init():
        acc_ref[...] = jnp.zeros_like(acc_ref)

    acc_ref[...] += jnp.dot(x_ref[...], w_ref[...],
                            preferred_element_type=jnp.float32)

    @pl.when(pl.program_id(1) == pl.num_programs(1) - 1)
    def _fin():
        y = acc_ref[...] + b_ref[...]
        if act == "gelu":
            y = _gelu(y)
        elif act == "relu":
            y = jnp.maximum(y, 0.0)
        elif act == "tanh":
            y = jnp.tanh(y)
        if has_res:
            y = y + r_ref[...].astype(jnp.float32)
        mu = jnp.mean(y, axis=-1, keepdims=True)
        var = jnp.mean((y - mu) ** 2, axis=-1, keepdims=True)
        o_ref[...] = ((y - mu) * lax.rsqrt(var + LN_EPS) * g_ref[...]
                      + bb_ref[...]).astype(o_ref.dtype)


def pallas_linear_ln(x, w, b, gamma, beta, residual=None, act="none",
                     out_dtype=jnp.float32):
    """Fused y = LayerNorm(act(x @ w + b) [+ residual]) with a (M, K) grid:
    K is pipelined into an f32 VMEM accumulator, only N(=H) stays full for LN."""
    m, k = x.shape
    _, n = w.shape
    tm = _pick_tile(m, _TM_PREFS)
    tk = _pick_tile(k, _TK_PREFS)
    has_res = residual is not None
    # TODO(synk): bias/gamma/beta have constant index maps; single-buffering
    # them (pipeline_mode=pl.Buffered(1)) would trim a little more VMEM.
    in_specs = [pl.BlockSpec((tm, tk), lambda i, kk: (i, kk)),
                pl.BlockSpec((tk, n), lambda i, kk: (kk, 0)),
                pl.BlockSpec((1, n), lambda i, kk: (0, 0)),
                pl.BlockSpec((1, n), lambda i, kk: (0, 0)),
                pl.BlockSpec((1, n), lambda i, kk: (0, 0))]
    args = [x, w, b.reshape(1, n), gamma.reshape(1, n), beta.reshape(1, n)]
    if has_res:
        in_specs.append(pl.BlockSpec((tm, n), lambda i, kk: (i, 0)))
        args.append(residual)
    return pl.pallas_call(
        functools.partial(_linear_ln_kernel, act=act, has_res=has_res),
        out_shape=jax.ShapeDtypeStruct((m, n), out_dtype),
        grid=(m // tm, k // tk),
        in_specs=in_specs,
        out_specs=pl.BlockSpec((tm, n), lambda i, kk: (i, 0)),
        scratch_shapes=[pltpu.VMEM((tm, n), jnp.float32)],
        compiler_params=pltpu.CompilerParams(
            dimension_semantics=("parallel", "arbitrary")),
    )(*args)


# ------------------------- flash-style fused attention -----------------------
def _attention_kernel(qrow_ref, krow_ref, bias_ref, o_ref,
                      m_sc, l_sc, acc_sc, *, scale, nh, hd, h_dim):
    ki = pl.program_id(2)

    @pl.when(ki == 0)
    def _init():
        m_sc[...] = jnp.full_like(m_sc, -jnp.inf)
        l_sc[...] = jnp.zeros_like(l_sc)
        acc_sc[...] = jnp.zeros_like(acc_sc)

    qkv_q = qrow_ref[0]                         # (tq, 3H) bf16
    qkv_k = krow_ref[0]                         # (tkv, 3H) bf16
    bias = bias_ref[0]                          # (1, tkv) f32 additive mask

    # TODO(synk): with HD < 128 the per-head contraction under-fills the
    # v6e/v7x 256-wide MXU; packing 2 heads per lane-row would help there.
    for hh in range(nh):
        q = qkv_q[:, hh * hd:(hh + 1) * hd]
        k = qkv_k[:, h_dim + hh * hd: h_dim + (hh + 1) * hd]
        v = qkv_k[:, 2 * h_dim + hh * hd: 2 * h_dim + (hh + 1) * hd]
        s = jnp.dot(q, k.T, preferred_element_type=jnp.float32) * scale + bias
        m_prev = m_sc[hh]
        m_new = jnp.maximum(m_prev, jnp.max(s, axis=-1, keepdims=True))
        alpha = jnp.exp(m_prev - m_new)
        p = jnp.exp(s - m_new)
        l_sc[hh] = alpha * l_sc[hh] + jnp.sum(p, axis=-1, keepdims=True)
        acc_sc[hh] = alpha * acc_sc[hh] + jnp.dot(
            p.astype(v.dtype), v, preferred_element_type=jnp.float32)
        m_sc[hh] = m_new

    @pl.when(ki == pl.num_programs(2) - 1)
    def _fin():
        outs = []
        for hh in range(nh):
            inv_l = pl.reciprocal(l_sc[hh], approx=True)     # EUP slot
            outs.append(acc_sc[hh] * inv_l)
        o_ref[0] = jnp.concatenate(outs, axis=-1).astype(o_ref.dtype)


def pallas_attention_qkv(qkv, bias, *, nh, hd, scale):
    """Fused MHA on the packed (b, s, 3H) QKV tensor: per-head slicing, online
    softmax over KV tiles, context written back in (b, s, H) layout (no XLA
    head transposes)."""
    b, s, three_h = qkv.shape
    h_dim = nh * hd
    tq = _pick_tile(s, _TQ_PREFS)
    tkv = _pick_tile(s, _TKV_PREFS)
    return pl.pallas_call(
        functools.partial(_attention_kernel, scale=scale, nh=nh, hd=hd,
                          h_dim=h_dim),
        out_shape=jax.ShapeDtypeStruct((b, s, h_dim), qkv.dtype),
        grid=(b, s // tq, s // tkv),
        in_specs=[pl.BlockSpec((1, tq, three_h), lambda bi, qi, ki: (bi, qi, 0)),
                  pl.BlockSpec((1, tkv, three_h), lambda bi, qi, ki: (bi, ki, 0)),
                  pl.BlockSpec((1, 1, tkv), lambda bi, qi, ki: (bi, 0, ki))],
        out_specs=pl.BlockSpec((1, tq, h_dim), lambda bi, qi, ki: (bi, qi, 0)),
        scratch_shapes=[pltpu.VMEM((nh, tq, 1), jnp.float32),
                        pltpu.VMEM((nh, tq, 1), jnp.float32),
                        pltpu.VMEM((nh, tq, hd), jnp.float32)],
        compiler_params=pltpu.CompilerParams(
            dimension_semantics=("parallel", "parallel", "arbitrary")),
    )(qkv, qkv, bias)


# ------------------------- contrastive (cosine) kernel -----------------------
def _contrastive_kernel(m_ref, t_ref, cl_ref, mn_ref, tn_ref, st_ref, *, inv_temp):
    bi = pl.program_id(0)

    @pl.when(bi == 0)
    def _init():
        st_ref[...] = jnp.zeros_like(st_ref)

    m = m_ref[0].astype(jnp.float32)            # (S, H)
    t = t_ref[0].astype(jnp.float32)
    w = cl_ref[0]                               # (S, 1) contrastive_labels
    mn = m * lax.rsqrt(jnp.sum(m * m, axis=-1, keepdims=True) + 1e-24)
    tn = t * lax.rsqrt(jnp.sum(t * t, axis=-1, keepdims=True) + 1e-24)
    mn_ref[0] = mn.astype(mn_ref.dtype)
    tn_ref[0] = tn.astype(tn_ref.dtype)

    sc = lax.dot_general(mn, tn, (((1,), (1,)), ((), ())),
                         preferred_element_type=jnp.float32) * inv_temp
    mx = jnp.max(sc, axis=-1, keepdims=True)
    lse = mx + jnp.log(jnp.sum(jnp.exp(sc - mx), axis=-1, keepdims=True))
    ri = lax.broadcasted_iota(jnp.int32, sc.shape, 0)
    ci = lax.broadcasted_iota(jnp.int32, sc.shape, 1)
    gold_sc = jnp.sum(jnp.where(ri == ci, sc, 0.0), axis=-1, keepdims=True)  # (S,1)
    nll = lse - gold_sc
    cor = (gold_sc >= mx).astype(jnp.float32)        # max(logprob) == mx - lse
    nll_sum = jnp.sum(jnp.sum(nll * w, axis=1, keepdims=True), axis=0, keepdims=True)
    cor_sum = jnp.sum(jnp.sum(cor * w, axis=1, keepdims=True), axis=0, keepdims=True)
    st_ref[...] += jnp.concatenate([nll_sum, cor_sum], axis=-1)   # (1,2)


def pallas_contrastive(masked_rep, truth_rep, cl3, inv_temp):
    """Cosine-normalize reps, compute the (S,S)/temp diagonal NLL per batch and
    reduce it against contrastive_labels in-kernel; only normalized reps and a
    (1,2) [sum(nll*cl), sum(correct*cl)] accumulator go back to HBM."""
    b, s, h = masked_rep.shape
    # TODO(synk): for very long sequences the (S,S) score tile should be
    # flash-tiled like attention; at BERT-scale S it fits VMEM comfortably.
    return pl.pallas_call(
        functools.partial(_contrastive_kernel, inv_temp=inv_temp),
        out_shape=(jax.ShapeDtypeStruct((b, s, h), jnp.float32),
                   jax.ShapeDtypeStruct((b, s, h), jnp.float32),
                   jax.ShapeDtypeStruct((1, 2), jnp.float32)),
        grid=(b,),
        in_specs=[pl.BlockSpec((1, s, h), lambda i: (i, 0, 0)),
                  pl.BlockSpec((1, s, h), lambda i: (i, 0, 0)),
                  pl.BlockSpec((1, s, 1), lambda i: (i, 0, 0))],
        out_specs=(pl.BlockSpec((1, s, h), lambda i: (i, 0, 0)),
                   pl.BlockSpec((1, s, h), lambda i: (i, 0, 0)),
                   pl.BlockSpec((1, 2), lambda i: (0, 0))),
        compiler_params=pltpu.CompilerParams(dimension_semantics=("arbitrary",)),
    )(masked_rep, truth_rep, cl3)


# ------------------------------ MLM token NLL --------------------------------
def _token_nll_kernel(logits_ref, gold_ref, msk_ref, st_ref,
                      m_sc, l_sc, g_sc, *, tv):
    ri, vi = pl.program_id(0), pl.program_id(1)

    @pl.when((ri == 0) & (vi == 0))
    def _init_out():
        st_ref[...] = jnp.zeros_like(st_ref)

    @pl.when(vi == 0)
    def _init_row():
        m_sc[...] = jnp.full_like(m_sc, -jnp.inf)
        l_sc[...] = jnp.zeros_like(l_sc)
        g_sc[...] = jnp.zeros_like(g_sc)

    logits = logits_ref[...].astype(jnp.float32)          # (tm, tv)
    gold = gold_ref[...]                                  # (tm, 1) int32
    col = vi * tv + lax.broadcasted_iota(jnp.int32, logits.shape, 1)

    m_prev = m_sc[...]
    m_new = jnp.maximum(m_prev, jnp.max(logits, axis=-1, keepdims=True))
    alpha = jnp.exp(m_prev - m_new)
    l_sc[...] = alpha * l_sc[...] + jnp.sum(jnp.exp(logits - m_new),
                                            axis=-1, keepdims=True)
    m_sc[...] = m_new
    g_sc[...] += jnp.sum(jnp.where(col == gold, logits, 0.0),
                         axis=-1, keepdims=True)

    @pl.when(vi == pl.num_programs(1) - 1)
    def _fin():
        lse = m_sc[...] + jnp.log(l_sc[...])
        nll = lse - g_sc[...]
        cor = (g_sc[...] >= m_sc[...]).astype(jnp.float32)   # reuse running max
        w = msk_ref[...]                                     # (tm, 1) f32
        nll_sum = jnp.sum(jnp.sum(nll * w, axis=1, keepdims=True),
                          axis=0, keepdims=True)
        cor_sum = jnp.sum(jnp.sum(cor * w, axis=1, keepdims=True),
                          axis=0, keepdims=True)
        st_ref[...] += jnp.concatenate([nll_sum, cor_sum], axis=-1)


def pallas_token_nll(logits2d, gold2d, msk2d):
    """Online-LSE masked token NLL: rows x vocab tiles stream through VMEM,
    output is just the (1,2) [sum(nll*msk), sum(correct*msk)] accumulator."""
    rows, v = logits2d.shape
    tm = _pick_tile(rows, (256, 128))
    tv = _pick_tile(v, _TV_PREFS)
    # TODO(synk): fusing this into the decoder matmul epilogue would remove the
    # logits HBM round trip entirely.
    return pl.pallas_call(
        functools.partial(_token_nll_kernel, tv=tv),
        out_shape=jax.ShapeDtypeStruct((1, 2), jnp.float32),
        grid=(rows // tm, v // tv),
        in_specs=[pl.BlockSpec((tm, tv), lambda i, j: (i, j)),
                  pl.BlockSpec((tm, 1), lambda i, j: (i, 0)),
                  pl.BlockSpec((tm, 1), lambda i, j: (i, 0))],
        out_specs=pl.BlockSpec((1, 2), lambda i, j: (0, 0)),
        scratch_shapes=[pltpu.VMEM((tm, 1), jnp.float32),
                        pltpu.VMEM((tm, 1), jnp.float32),
                        pltpu.VMEM((tm, 1), jnp.float32)],
        compiler_params=pltpu.CompilerParams(
            dimension_semantics=("arbitrary", "arbitrary")),
    )(logits2d, gold2d, msk2d)


# ----------------------------- model glue (plain JAX) ------------------------
def layer_norm(x, g, b, eps=LN_EPS):
    mu = jnp.mean(x, axis=-1, keepdims=True)
    var = jnp.mean((x - mu) ** 2, axis=-1, keepdims=True)
    return (x - mu) / jnp.sqrt(var + eps) * g + b


def bert_encoder(p, input_ids, token_type_ids, attention_mask):
    b, s = input_ids.shape
    x = (p["word_emb"][input_ids]
         + p["pos_emb"][:s][None, :, :]
         + p["tok_type_emb"][token_type_ids])
    x = layer_norm(x, p["emb_ln_g"], p["emb_ln_b"])
    x2 = x.reshape(b * s, H).astype(ACT_DTYPE)       # bf16 activations in HBM

    # fused QKV projection, kept in (b, s, 3H) layout (no head transposes)
    qkv = pallas_linear(x2, p["wqkv"], p["bqkv"], out_dtype=ACT_DTYPE).reshape(b, s, 3 * H)
    bias = ((1.0 - attention_mask.astype(jnp.float32)) * -10000.0)[:, None, :]  # (b,1,s)
    ctx = pallas_attention_qkv(qkv, bias, nh=NH, hd=HD,
                               scale=1.0 / math.sqrt(HD)).reshape(b * s, H)

    # output projection + residual + LN fused (K-tiled, f32 accumulator)
    x_attn = pallas_linear_ln(ctx, p["wo"], p["bo"], p["attn_ln_g"], p["attn_ln_b"],
                              residual=x2, out_dtype=ACT_DTYPE)
    ff = pallas_linear(x_attn, p["w1"], p["b1"], act="gelu", out_dtype=ACT_DTYPE)
    x_out = pallas_linear_ln(ff, p["w2"], p["b2"], p["ffn_ln_g"], p["ffn_ln_b"],
                             residual=x_attn, out_dtype=jnp.float32)

    x3 = x_out.reshape(b, s, H)
    pooled = pallas_linear(x3[:, 0, :].astype(ACT_DTYPE), p["wp"], p["bp"],
                           act="tanh", out_dtype=jnp.float32)
    return x3, pooled


def _cls_head_jnp(cp, rep, pooled):
    # plain-jnp path (also used inside jax.grad — pallas_call has no VJP rule)
    b, s, h = rep.shape
    wt = cp["wt"].astype(jnp.float32)
    wd = cp["wd"].astype(jnp.float32)
    t = _gelu(rep.reshape(b * s, h) @ wt + cp["bt"])
    t = layer_norm(t, cp["ln_g"], cp["ln_b"])
    logits = (t @ wd + cp["bd"]).reshape(b, s, V)
    sen = pooled @ cp["wsr"] + cp["bsr"]
    return logits, sen


def cls_head(cp, rep, pooled):
    b, s, h = rep.shape
    t = pallas_linear_ln(rep.reshape(b * s, h).astype(ACT_DTYPE), cp["wt"], cp["bt"],
                         cp["ln_g"], cp["ln_b"], act="gelu", out_dtype=ACT_DTYPE)
    logits = pallas_linear(t, cp["wd"], cp["bd"], out_dtype=jnp.float32).reshape(b, s, V)
    # (H -> 2) sentence-relation head is tiny: plain jnp, XLA fuses it.
    sen = pooled @ cp["wsr"] + cp["bsr"]
    return logits, sen


def projection(pp, x3d):
    b, s, h = x3d.shape
    y = pallas_linear(x3d.reshape(b * s, h).astype(ACT_DTYPE), pp["w"], pp["b"],
                      act="relu", out_dtype=jnp.float32)
    return y.reshape(b, s, h)


def avg_pool(hidden, mask):
    length = jnp.sum(mask, axis=1, keepdims=True).astype(jnp.float32)
    hidden = jnp.where(mask[:, :, None] == 0, 0.0, hidden)
    return jnp.sum(hidden, axis=1) / length


def ce_mean(logits, targets):
    lp = jax.nn.log_softmax(logits, axis=-1)
    return -jnp.mean(jnp.take_along_axis(lp, targets[:, None], axis=-1)[:, 0])


def cosine_matrix(a, b):
    # tiny (bsz x bsz) matrices: plain jnp (a pallas_call here is pure overhead)
    dots = a @ b.T
    na = jnp.sqrt(jnp.sum(a * a, axis=-1, keepdims=True))
    nb = jnp.sqrt(jnp.sum(b * b, axis=-1, keepdims=True))
    return dots / jnp.maximum(na * nb.T, 1e-8)


def cosine_vec(a, b):
    dots = jnp.sum(a * b, axis=-1)
    na = jnp.sqrt(jnp.sum(a * a, axis=-1))
    nb = jnp.sqrt(jnp.sum(b * b, axis=-1))
    return dots / jnp.maximum(na * nb, 1e-8)


def compute_mlm_loss(truth, msk, logits):
    b, s = truth.shape
    rows = b * s
    st = pallas_token_nll(logits.reshape(rows, V),
                          truth.reshape(rows, 1).astype(jnp.int32),
                          msk.reshape(rows, 1).astype(jnp.float32))
    mlm_loss = st[0, 0] / jnp.sum(msk.astype(jnp.float32))
    mlm_correct_num = st[0, 1]
    return mlm_loss, mlm_correct_num


def generate_adv(params, truth, inp, seg, msk, attn_msk, flags):
    rep_neg, pooled_neg = bert_encoder(params["neg"], inp, seg, attn_msk)
    # TODO(synk): the AdamW step / backward() on neg_model is a training
    # side-effect inside forward(); it does not change this call's outputs.
    dec_hiddens = jax.lax.stop_gradient(rep_neg)
    detach_pool = jax.lax.stop_gradient(pooled_neg)
    m = msk.astype(jnp.float32)
    truth_i = truth.astype(jnp.int32)

    def mlm_loss_fn(h):
        logits, _ = _cls_head_jnp(params["cls"], h, detach_pool)
        lp = jax.nn.log_softmax(logits, axis=-1)
        gold_lp = jnp.take_along_axis(lp, truth_i[..., None], axis=-1)[..., 0]
        return jnp.sum(-gold_lp * m) / jnp.sum(m)

    dec_grad = jax.grad(mlm_loss_fn)(dec_hiddens)
    dec_grad = dec_grad / (jnp.linalg.norm(dec_grad, axis=-1, keepdims=True) + 1e-12)
    perturbed_dec = dec_hiddens + NEG_EPS * dec_grad

    def sent_loss_fn(pool):
        _, scores = _cls_head_jnp(params["cls"], dec_hiddens, pool)
        return ce_mean(scores, flags)

    pool_grad = jax.grad(sent_loss_fn)(detach_pool)
    pool_grad = pool_grad / (jnp.linalg.norm(pool_grad, axis=-1, keepdims=True) + 1e-12)
    perturbed_pooled = detach_pool + NEG_EPS * pool_grad
    return perturbed_dec, perturbed_pooled


# ----------------------------- forward pass ----------------------------------
def forward(params, truth, inp, seg, msk, attn_msk, labels, contrastive_labels, nxt_snt_flag):
    # NOTE: `labels` is unused by the PyTorch forward (shadowed later); kept for parity.
    bsz, seqlen = truth.shape

    # student BERT + CLS head
    rep, model_pooled = bert_encoder(params["bert"], inp, seg, attn_msk)
    logits, sen_relation_scores = cls_head(params["cls"], rep, model_pooled)
    mlm_loss, mlm_correct_num = compute_mlm_loss(truth, msk, logits)

    # teacher BERT (its CLS outputs are discarded in the reference forward)
    truth_rep, teacher_pooled = bert_encoder(params["teacher"], truth, seg, attn_msk)

    # cosine contrastive scores/temp + diagonal NLL; scores stay in VMEM,
    # nll/correct reduced against contrastive_labels in-kernel.
    cl = contrastive_labels.astype(jnp.float32)
    masked_rep_n, truth_rep_n, cstats = pallas_contrastive(
        rep, truth_rep, cl[:, :, None], 1.0 / TEMP)
    total_contrastive_num = jnp.sum(cl)
    contrastive_loss = cstats[0, 0] / total_contrastive_num
    correct_contrastive_num = cstats[0, 1]

    # next-sentence prediction
    flags = nxt_snt_flag.astype(jnp.int32)
    next_sentence_loss = ce_mean(sen_relation_scores, flags)
    tot_loss = mlm_loss + next_sentence_loss + contrastive_loss
    ns_pred = jnp.argmax(sen_relation_scores, axis=-1)
    nxt_snt_correct_num = jnp.sum((ns_pred == flags).astype(jnp.float32))
    tot_tokens = jnp.sum(msk.astype(jnp.float32))

    # projection + masked average pooling (uses the *normalized* reps, matching
    # the PyTorch in-place reassignment of masked_rep / truth_rep)
    teacher_pooled_cl = projection(params["proj"], truth_rep_n)
    teacher_avg_cl = avg_pool(teacher_pooled_cl, cl)
    model_pooled_cl = projection(params["proj"], masked_rep_n)
    model_avg_cl = avg_pool(model_pooled_cl, cl)

    sim_matrix = cosine_matrix(teacher_avg_cl, model_avg_cl)
    sim_matrix_pooled = cosine_matrix(teacher_pooled, model_pooled)

    # adversarial negatives
    pert_neg_dec, pert_pooled = generate_adv(params, truth, inp, seg, msk, attn_msk, flags)
    pooled_pert_neg_dec = projection(params["proj"], pert_neg_dec)
    avg_perturbed_dec = avg_pool(pooled_pert_neg_dec, cl)

    adv_sim = cosine_vec(model_avg_cl, avg_perturbed_dec)[:, None]
    logits_c = jnp.concatenate([sim_matrix, adv_sim], axis=1) / TEMP
    arange_labels = jnp.arange(bsz, dtype=jnp.int32)
    cont_loss = ce_mean(logits_c, arange_labels)

    adv_sim_pooled = cosine_vec(model_pooled, pert_pooled)[:, None]
    logits_pooled = jnp.concatenate([sim_matrix_pooled, adv_sim_pooled], axis=1) / TEMP
    cont_loss_pooled = ce_mean(logits_pooled, arange_labels)

    # device (CUDA-style) branch of the reference forward: 9-tuple
    new_loss = tot_loss + cont_loss + cont_loss_pooled
    return (new_loss,
            jnp.reshape(mlm_correct_num, (1,)),
            jnp.reshape(tot_tokens, (1,)),
            jnp.reshape(nxt_snt_correct_num, (1,)),
            jnp.reshape(correct_contrastive_num, (1,)),
            jnp.reshape(total_contrastive_num, (1,)),
            tot_loss, cont_loss, cont_loss_pooled)


# ----------------------------- parameter init --------------------------------
def _init_bert(key):
    ks = jax.random.split(key, 8)
    nb = lambda k, s: (0.02 * jax.random.normal(k, s, jnp.float32)).astype(ACT_DTYPE)
    n = lambda k, s: 0.02 * jax.random.normal(k, s, jnp.float32)
    z = lambda s: jnp.zeros(s, jnp.float32)
    o = lambda s: jnp.ones(s, jnp.float32)
    return {
        "word_emb": n(ks[0], (V, H)), "pos_emb": n(ks[1], (MAX_POS, H)),
        "tok_type_emb": n(ks[2], (TYPE_VOCAB, H)),
        "emb_ln_g": o((H,)), "emb_ln_b": z((H,)),
        # fused QKV (bf16): columns [0:H]=Q, [H:2H]=K, [2H:3H]=V
        "wqkv": nb(ks[3], (H, 3 * H)), "bqkv": z((3 * H,)),
        "wo": nb(ks[4], (H, H)), "bo": z((H,)),
        "attn_ln_g": o((H,)), "attn_ln_b": z((H,)),
        "w1": nb(ks[5], (H, INTER)), "b1": z((INTER,)),
        "w2": nb(ks[6], (INTER, H)), "b2": z((H,)),
        "ffn_ln_g": o((H,)), "ffn_ln_b": z((H,)),
        "wp": nb(ks[7], (H, H)), "bp": z((H,)),
    }


def _init_cls(key):
    ks = jax.random.split(key, 3)
    nb = lambda k, s: (0.02 * jax.random.normal(k, s, jnp.float32)).astype(ACT_DTYPE)
    n = lambda k, s: 0.02 * jax.random.normal(k, s, jnp.float32)
    z = lambda s: jnp.zeros(s, jnp.float32)
    return {
        "wt": nb(ks[0], (H, H)), "bt": z((H,)),
        "ln_g": jnp.ones((H,), jnp.float32), "ln_b": z((H,)),
        "wd": nb(ks[1], (H, V)), "bd": z((V,)),
        "wsr": n(ks[2], (H, 2)), "bsr": z((2,)),      # tiny head stays f32/jnp
    }


def _init_proj(key):
    return {"w": (0.02 * jax.random.normal(key, (H, H), jnp.float32)).astype(ACT_DTYPE),
            "b": jnp.zeros((H,), jnp.float32)}


def init_params(key):
    k1, k2, k3, k4, k5 = jax.random.split(key, 5)
    return {"bert": _init_bert(k1), "teacher": _init_bert(k2), "neg": _init_bert(k3),
            "cls": _init_cls(k4), "proj": _init_proj(k5)}


# ----------------------------- main -------------------------------------------
if __name__ == "__main__":
    root = jax.random.PRNGKey(0)
    pkey, dkey = jax.random.split(root)
    params = init_params(pkey)

    k1, = jax.random.split(dkey, 1)
    truth = jax.random.randint(k1, (B, S), 0, V, dtype=jnp.int32)
    msk = jnp.zeros((B, S), jnp.int32).at[:, 1::3].set(1)          # MLM positions
    MASK_ID = 3
    inp = jnp.where(msk == 1, MASK_ID, truth)
    seg = jnp.concatenate([jnp.zeros((B, S // 2), jnp.int32),
                           jnp.ones((B, S - S // 2), jnp.int32)], axis=1)
    attn_msk = jnp.ones((B, S), jnp.int32).at[1, -1].set(0)
    labels = jnp.where(msk == 1, truth, -100)                       # unused (parity)
    contrastive_labels = attn_msk.astype(jnp.float32).at[:, 0].set(0.0)
    nxt_snt_flag = jnp.array([0, 1], dtype=jnp.int32)

    fwd = jax.jit(forward)
    out = fwd(params, truth, inp, seg, msk, attn_msk, labels,
              contrastive_labels, nxt_snt_flag)
    jax.block_until_ready(out)
    print("KERNEL_OK")
</pallas_src>

<mosaic_0001>
module attributes {stable_mosaic.version = 11 : i64} {
  func.func @_matmul_bias_kernel(%arg0: i32, %arg1: i32, %arg2: i32, %arg3: memref<16x32xbf16, #tpu.memory_space<vmem>>, %arg4: memref<32x64xbf16, #tpu.memory_space<vmem>>, %arg5: memref<1x64xf32, #tpu.memory_space<vmem>>, %arg6: memref<16x64xbf16, #tpu.memory_space<vmem>>, %arg7: memref<16x64xf32, #tpu.memory_space<vmem>>) attributes {dimension_semantics = [#tpu.dimension_semantics<parallel>, #tpu.dimension_semantics<parallel>, #tpu.dimension_semantics<arbitrary>], iteration_bounds = array<i64: 1, 1, 1>, scalar_prefetch = 0 : i64, scratch_operands = 1 : i64, tpu.core_type = #tpu.core_type<tc>, window_params = [{transform_indices = @transform_0, window_bounds = array<i64: 16, 32>}, {transform_indices = @transform_1, window_bounds = array<i64: 32, 64>}, {transform_indices = @transform_2, window_bounds = array<i64: 1, 64>}, {transform_indices = @transform_3, window_bounds = array<i64: 16, 64>}]} {
    %c0_i32 = arith.constant 0 : i32
    %0 = arith.cmpi eq, %arg2, %c0_i32 : i32
    %1 = arith.extui %0 : i1 to i32
    %c0_i32_0 = arith.constant 0 : i32
    %2 = arith.cmpi ne, %1, %c0_i32_0 : i32
    scf.if %2 {
      %cst_10 = arith.constant 0.000000e+00 : f32
      %12 = vector.broadcast %cst_10 : f32 to vector<16x64xf32>
      %c0_11 = arith.constant 0 : index
      %c0_12 = arith.constant 0 : index
      %13 = vector.load %arg7[%c0_11, %c0_12] : memref<16x64xf32, #tpu.memory_space<vmem>>, vector<16x64xf32>
      tpu.vector_store %arg7[%c0_11, %c0_12], %12 {strides = array<i32>} : memref<16x64xf32, #tpu.memory_space<vmem>>, vector<16x64xf32>,
    } else {
    }
    %c0 = arith.constant 0 : index
    %c0_1 = arith.constant 0 : index
    %3 = vector.load %arg7[%c0, %c0_1] : memref<16x64xf32, #tpu.memory_space<vmem>>, vector<16x64xf32>
    %c0_2 = arith.constant 0 : index
    %c0_3 = arith.constant 0 : index
    %4 = vector.load %arg3[%c0_2, %c0_3] : memref<16x32xbf16, #tpu.memory_space<vmem>>, vector<16x32xbf16>
    %c0_4 = arith.constant 0 : index
    %c0_5 = arith.constant 0 : index
    %5 = vector.load %arg4[%c0_4, %c0_5] : memref<32x64xbf16, #tpu.memory_space<vmem>>, vector<32x64xbf16>
    %cst = arith.constant dense<0.000000e+00> : vector<16x64xf32>
    %6 = tpu.matmul %4, %5, %cst {dimension_numbers = #tpu.dot_dimension_numbers<[1], [0], [0], [1], [0, 0, 1, 1], [], []>} : vector<16x32xbf16>, vector<32x64xbf16>, vector<16x64xf32> -> vector<16x64xf32>
    %7 = arith.addf %3, %6 : vector<16x64xf32>
    %c0_6 = arith.constant 0 : index
    %c0_7 = arith.constant 0 : index
    %8 = vector.load %arg7[%c0_6, %c0_7] : memref<16x64xf32, #tpu.memory_space<vmem>>, vector<16x64xf32>
    tpu.vector_store %arg7[%c0_6, %c0_7], %7 {strides = array<i32>} : memref<16x64xf32, #tpu.memory_space<vmem>>, vector<16x64xf32>,
    %c0_i32_8 = arith.constant 0 : i32
    %9 = arith.cmpi eq, %arg2, %c0_i32_8 : i32
    %10 = arith.extui %9 : i1 to i32
    %c0_i32_9 = arith.constant 0 : i32
    %11 = arith.cmpi ne, %10, %c0_i32_9 : i32
    scf.if %11 {
      %c0_10 = arith.constant 0 : index
      %c0_11 = arith.constant 0 : index
      %12 = vector.load %arg7[%c0_10, %c0_11] : memref<16x64xf32, #tpu.memory_space<vmem>>, vector<16x64xf32>
      %c0_12 = arith.constant 0 : index
      %c0_13 = arith.constant 0 : index
      %13 = vector.load %arg5[%c0_12, %c0_13] : memref<1x64xf32, #tpu.memory_space<vmem>>, vector<1x64xf32>
      %14 = vector.broadcast %13 : vector<1x64xf32> to vector<16x64xf32>
      %15 = arith.addf %12, %14 : vector<16x64xf32>
      %cst_14 = arith.constant 5.000000e-01 : f32
      %16 = vector.broadcast %cst_14 : f32 to vector<16x64xf32>
      %17 = arith.mulf %16, %15 : vector<16x64xf32>
      %cst_15 = arith.constant 4.471500e-02 : f32
      %18 = vector.broadcast %cst_15 : f32 to vector<16x64xf32>
      %19 = arith.mulf %18, %15 : vector<16x64xf32>
      %20 = arith.mulf %19, %15 : vector<16x64xf32>
      %21 = arith.mulf %20, %15 : vector<16x64xf32>
      %22 = arith.addf %15, %21 : vector<16x64xf32>
      %cst_16 = arith.constant 0.797884583 : f32
      %23 = vector.broadcast %cst_16 : f32 to vector<16x64xf32>
      %24 = arith.mulf %23, %22 : vector<16x64xf32>
      %25 = math.tanh %24 : vector<16x64xf32>
      %cst_17 = arith.constant 1.000000e+00 : f32
      %26 = vector.broadcast %cst_17 : f32 to vector<16x64xf32>
      %27 = arith.addf %26, %25 : vector<16x64xf32>
      %28 = arith.mulf %17, %27 : vector<16x64xf32>
      %29 = arith.truncf %28 : vector<16x64xf32> to vector<16x64xbf16>
      %c0_18 = arith.constant 0 : index
      %c0_19 = arith.constant 0 : index
      %30 = vector.load %arg6[%c0_18, %c0_19] : memref<16x64xbf16, #tpu.memory_space<vmem>>, vector<16x64xbf16>
      tpu.vector_store %arg6[%c0_18, %c0_19], %29 {strides = array<i32>} : memref<16x64xbf16, #tpu.memory_space<vmem>>, vector<16x64xbf16>,
    } else {
    }
    return
  }
  func.func @transform_0(%arg0: i32, %arg1: i32, %arg2: i32) -> (i32, i32) {
    %c0_i32 = arith.constant 0 : i32
    return %arg0, %arg2 : i32, i32
  }
  func.func @transform_1(%arg0: i32, %arg1: i32, %arg2: i32) -> (i32, i32) {
    %c0_i32 = arith.constant 0 : i32
    return %arg2, %arg1 : i32, i32
  }
  func.func @transform_2(%arg0: i32, %arg1: i32, %arg2: i32) -> (i32, i32) {
    %c0_i32 = arith.constant 0 : i32
    %c0_i32_0 = arith.constant 0 : i32
    return %c0_i32, %arg1 : i32, i32
  }
  func.func @transform_3(%arg0: i32, %arg1: i32, %arg2: i32) -> (i32, i32) {
    %c0_i32 = arith.constant 0 : i32
    return %arg0, %arg1 : i32, i32
  }
}

module attributes {stable_mosaic.version = 11 : i64} {
  func.func @_linear_ln_kernel(%arg0: i32, %arg1: i32, %arg2: memref<16x32xbf16, #tpu.memory_space<vmem>>, %arg3: memref<32x32xbf16, #tpu.memory_space<vmem>>, %arg4: memref<1x32xf32, #tpu.memory_space<vmem>>, %arg5: memref<1x32xf32, #tpu.memory_space<vmem>>, %arg6: memref<1x32xf32, #tpu.memory_space<vmem>>, %arg7: memref<16x32xbf16, #tpu.memory_space<vmem>>, %arg8: memref<16x32xbf16, #tpu.memory_space<vmem>>, %arg9: memref<16x32xf32, #tpu.memory_space<vmem>>) attributes {dimension_semantics = [#tpu.dimension_semantics<parallel>, #tpu.dimension_semantics<arbitrary>], iteration_bounds = array<i64: 1, 1>, scalar_prefetch = 0 : i64, scratch_operands = 1 : i64, tpu.core_type = #tpu.core_type<tc>, window_params = [{transform_indices = @transform_0, window_bounds = array<i64: 16, 32>}, {transform_indices = @transform_1, window_bounds = array<i64: 32, 32>}, {pipeline_mode = #tpu.pipeline_mode<synchronous>, transform_indices = @transform_2, window_bounds = array<i64: 1, 32>}, {pipeline_mode = #tpu.pipeline_mode<synchronous>, transform_indices = @transform_3, window_bounds = array<i64: 1, 32>}, {pipeline_mode = #tpu.pipeline_mode<synchronous>, transform_indices = @transform_4, window_bounds = array<i64: 1, 32>}, {transform_indices = @transform_5, window_bounds = array<i64: 16, 32>}, {transform_indices = @transform_6, window_bounds = array<i64: 16, 32>}]} {
    %c0_i32 = arith.constant 0 : i32
    %0 = arith.cmpi eq, %arg1, %c0_i32 : i32
    %1 = arith.extui %0 : i1 to i32
    %c0_i32_0 = arith.constant 0 : i32
    %2 = arith.cmpi ne, %1, %c0_i32_0 : i32
    scf.if %2 {
      %cst_10 = arith.constant 0.000000e+00 : f32
      %12 = vector.broadcast %cst_10 : f32 to vector<16x32xf32>
      %c0_11 = arith.constant 0 : index
      %c0_12 = arith.constant 0 : index
      %13 = vector.load %arg9[%c0_11, %c0_12] : memref<16x32xf32, #tpu.memory_space<vmem>>, vector<16x32xf32>
      tpu.vector_store %arg9[%c0_11, %c0_12], %12 {strides = array<i32>} : memref<16x32xf32, #tpu.memory_space<vmem>>, vector<16x32xf32>,
    } else {
    }
    %c0 = arith.constant 0 : index
    %c0_1 = arith.constant 0 : index
    %3 = vector.load %arg9[%c0, %c0_1] : memref<16x32xf32, #tpu.memory_space<vmem>>, vector<16x32xf32>
    %c0_2 = arith.constant 0 : index
    %c0_3 = arith.constant 0 : index
    %4 = vector.load %arg2[%c0_2, %c0_3] : memref<16x32xbf16, #tpu.memory_space<vmem>>, vector<16x32xbf16>
    %c0_4 = arith.constant 0 : index
    %c0_5 = arith.constant 0 : index
    %5 = vector.load %arg3[%c0_4, %c0_5] : memref<32x32xbf16, #tpu.memory_space<vmem>>, vector<32x32xbf16>
    %cst = arith.constant dense<0.000000e+00> : vector<16x32xf32>
    %6 = tpu.matmul %4, %5, %cst {dimension_numbers = #tpu.dot_dimension_numbers<[1], [0], [0], [1], [0, 0, 1, 1], [], []>} : vector<16x32xbf16>, vector<32x32xbf16>, vector<16x32xf32> -> vector<16x32xf32>
    %7 = arith.addf %3, %6 : vector<16x32xf32>
    %c0_6 = arith.constant 0 : index
    %c0_7 = arith.constant 0 : index
    %8 = vector.load %arg9[%c0_6, %c0_7] : memref<16x32xf32, #tpu.memory_space<vmem>>, vector<16x32xf32>
    tpu.vector_store %arg9[%c0_6, %c0_7], %7 {strides = array<i32>} : memref<16x32xf32, #tpu.memory_space<vmem>>, vector<16x32xf32>,
    %c0_i32_8 = arith.constant 0 : i32
    %9 = arith.cmpi eq, %arg1, %c0_i32_8 : i32
    %10 = arith.extui %9 : i1 to i32
    %c0_i32_9 = arith.constant 0 : i32
    %11 = arith.cmpi ne, %10, %c0_i32_9 : i32
    scf.if %11 {
      %c0_10 = arith.constant 0 : index
      %c0_11 = arith.constant 0 : index
      %12 = vector.load %arg9[%c0_10, %c0_11] : memref<16x32xf32, #tpu.memory_space<vmem>>, vector<16x32xf32>
      %c0_12 = arith.constant 0 : index
      %c0_13 = arith.constant 0 : index
      %13 = vector.load %arg4[%c0_12, %c0_13] : memref<1x32xf32, #tpu.memory_space<vmem>>, vector<1x32xf32>
      %14 = vector.broadcast %13 : vector<1x32xf32> to vector<16x32xf32>
      %15 = arith.addf %12, %14 : vector<16x32xf32>
      %c0_14 = arith.constant 0 : index
      %c0_15 = arith.constant 0 : index
      %16 = vector.load %arg7[%c0_14, %c0_15] : memref<16x32xbf16, #tpu.memory_space<vmem>>, vector<16x32xbf16>
      %17 = arith.extf %16 : vector<16x32xbf16> to vector<16x32xf32>
      %18 = arith.addf %15, %17 : vector<16x32xf32>
      %cst_16 = arith.constant dense<0.000000e+00> : vector<16xf32>
      %19 = vector.multi_reduction <add>, %18, %cst_16 [1] : vector<16x32xf32> to vector<16xf32>
      %20 = vector.shape_cast %19 : vector<16xf32> to vector<16x1xf32>
      %cst_17 = arith.constant 3.200000e+01 : f32
      %21 = vector.broadcast %cst_17 : f32 to vector<16x1xf32>
      %22 = arith.divf %20, %21 : vector<16x1xf32>
      %23 = vector.broadcast %22 : vector<16x1xf32> to vector<16x32xf32>
      %24 = arith.subf %18, %23 : vector<16x32xf32>
      %25 = arith.mulf %24, %24 : vector<16x32xf32>
      %cst_18 = arith.constant dense<0.000000e+00> : vector<16xf32>
      %26 = vector.multi_reduction <add>, %25, %cst_18 [1] : vector<16x32xf32> to vector<16xf32>
      %27 = vector.shape_cast %26 : vector<16xf32> to vector<16x1xf32>
      %cst_19 = arith.constant 3.200000e+01 : f32
      %28 = vector.broadcast %cst_19 : f32 to vector<16x1xf32>
      %29 = arith.divf %27, %28 : vector<16x1xf32>
      %30 = vector.broadcast %22 : vector<16x1xf32> to vector<16x32xf32>
      %31 = arith.subf %18, %30 : vector<16x32xf32>
      %cst_20 = arith.constant 9.99999996E-13 : f32
      %32 = vector.broadcast %cst_20 : f32 to vector<16x1xf32>
      %33 = arith.addf %29, %32 : vector<16x1xf32>
      %34 = math.rsqrt %33 : vector<16x1xf32>
      %35 = vector.broadcast %34 : vector<16x1xf32> to vector<16x32xf32>
      %36 = arith.mulf %31, %35 : vector<16x32xf32>
      %c0_21 = arith.constant 0 : index
      %c0_22 = arith.constant 0 : index
      %37 = vector.load %arg5[%c0_21, %c0_22] : memref<1x32xf32, #tpu.memory_space<vmem>>, vector<1x32xf32>
      %38 = vector.broadcast %37 : vector<1x32xf32> to vector<16x32xf32>
      %39 = arith.mulf %36, %38 : vector<16x32xf32>
      %c0_23 = arith.constant 0 : index
      %c0_24 = arith.constant 0 : index
      %40 = vector.load %arg6[%c0_23, %c0_24] : memref<1x32xf32, #tpu.memory_space<vmem>>, vector<1x32xf32>
      %41 = vector.broadcast %40 : vector<1x32xf32> to vector<16x32xf32>
      %42 = arith.addf %39, %41 : vector<16x32xf32>
      %43 = arith.truncf %42 : vector<16x32xf32> to vector<16x32xbf16>
      %c0_25 = arith.constant 0 : index
      %c0_26 = arith.constant 0 : index
      %44 = vector.load %arg8[%c0_25, %c0_26] : memref<16x32xbf16, #tpu.memory_space<vmem>>, vector<16x32xbf16>
      tpu.vector_store %arg8[%c0_25, %c0_26], %43 {strides = array<i32>} : memref<16x32xbf16, #tpu.memory_space<vmem>>, vector<16x32xbf16>,
    } else {
    }
    return
  }
  func.func @transform_0(%arg0: i32, %arg1: i32) -> (i32, i32) {
    %c0_i32 = arith.constant 0 : i32
    return %arg0, %arg1 : i32, i32
  }
  func.func @transform_1(%arg0: i32, %arg1: i32) -> (i32, i32) {
    %c0_i32 = arith.constant 0 : i32
    %c0_i32_0 = arith.constant 0 : i32
    return %arg1, %c0_i32 : i32, i32
  }
  func.func @transform_2(%arg0: i32, %arg1: i32) -> (i32, i32) {
    %c0_i32 = arith.constant 0 : i32
    %c0_i32_0 = arith.constant 0 : i32
    %c0_i32_1 = arith.constant 0 : i32
    return %c0_i32, %c0_i32_0 : i32, i32
  }
  func.func @transform_3(%arg0: i32, %arg1: i32) -> (i32, i32) {
    %c0_i32 = arith.constant 0 : i32
    %c0_i32_0 = arith.constant 0 : i32
    %c0_i32_1 = arith.constant 0 : i32
    return %c0_i32, %c0_i32_0 : i32, i32
  }
  func.func @transform_4(%arg0: i32, %arg1: i32) -> (i32, i32) {
    %c0_i32 = arith.constant 0 : i32
    %c0_i32_0 = arith.constant 0 : i32
    %c0_i32_1 = arith.constant 0 : i32
    return %c0_i32, %c0_i32_0 : i32, i32
  }
  func.func @transform_5(%arg0: i32, %arg1: i32) -> (i32, i32) {
    %c0_i32 = arith.constant 0 : i32
    %c0_i32_0 = arith.constant 0 : i32
    return %arg0, %c0_i32 : i32, i32
  }
  func.func @transform_6(%arg0: i32, %arg1: i32) -> (i32, i32) {
    %c0_i32 = arith.constant 0 : i32
    %c0_i32_0 = arith.constant 0 : i32
    return %arg0, %c0_i32 : i32, i32
  }
}

module attributes {stable_mosaic.version = 11 : i64} {
  func.func @_attention_kernel(%arg0: i32, %arg1: i32, %arg2: i32, %arg3: memref<1x8x96xbf16, #tpu.memory_space<vmem>>, %arg4: memref<1x8x96xbf16, #tpu.memory_space<vmem>>, %arg5: memref<1x1x8xf32, #tpu.memory_space<vmem>>, %arg6: memref<1x8x32xbf16, #tpu.memory_space<vmem>>, %arg7: memref<2x8x1xf32, #tpu.memory_space<vmem>>, %arg8: memref<2x8x1xf32, #tpu.memory_space<vmem>>, %arg9: memref<2x8x16xf32, #tpu.memory_space<vmem>>) attributes {dimension_semantics = [#tpu.dimension_semantics<parallel>, #tpu.dimension_semantics<parallel>, #tpu.dimension_semantics<arbitrary>], iteration_bounds = array<i64: 2, 1, 1>, scalar_prefetch = 0 : i64, scratch_operands = 3 : i64, tpu.core_type = #tpu.core_type<tc>, window_params = [{transform_indices = @transform_0, window_bounds = array<i64: 1, 8, 96>}, {transform_indices = @transform_1, window_bounds = array<i64: 1, 8, 96>}, {transform_indices = @transform_2, window_bounds = array<i64: 1, 1, 8>}, {transform_indices = @transform_3, window_bounds = array<i64: 1, 8, 32>}]} {
    %c0_i32 = arith.constant 0 : i32
    %0 = arith.cmpi eq, %arg2, %c0_i32 : i32
    %1 = arith.extui %0 : i1 to i32
    %c0_i32_0 = arith.constant 0 : i32
    %2 = arith.cmpi ne, %1, %c0_i32_0 : i32
    scf.if %2 {
      %cst_55 = arith.constant 0xFF800000 : f32
      %94 = vector.broadcast %cst_55 : f32 to vector<2x8x1xf32>
      %c0_56 = arith.constant 0 : index
      %c0_57 = arith.constant 0 : index
      %c0_58 = arith.constant 0 : index
      %95 = vector.load %arg7[%c0_56, %c0_57, %c0_58] : memref<2x8x1xf32, #tpu.memory_space<vmem>>, vector<2x8x1xf32>
      tpu.vector_store %arg7[%c0_56, %c0_57, %c0_58], %94 {strides = array<i32>} : memref<2x8x1xf32, #tpu.memory_space<vmem>>, vector<2x8x1xf32>,
      %cst_59 = arith.constant 0.000000e+00 : f32
      %96 = vector.broadcast %cst_59 : f32 to vector<2x8x1xf32>
      %c0_60 = arith.constant 0 : index
      %c0_61 = arith.constant 0 : index
      %c0_62 = arith.constant 0 : index
      %97 = vector.load %arg8[%c0_60, %c0_61, %c0_62] : memref<2x8x1xf32, #tpu.memory_space<vmem>>, vector<2x8x1xf32>
      tpu.vector_store %arg8[%c0_60, %c0_61, %c0_62], %96 {strides = array<i32>} : memref<2x8x1xf32, #tpu.memory_space<vmem>>, vector<2x8x1xf32>,
      %cst_63 = arith.constant 0.000000e+00 : f32
      %98 = vector.broadcast %cst_63 : f32 to vector<2x8x16xf32>
      %c0_64 = arith.constant 0 : index
      %c0_65 = arith.constant 0 : index
      %c0_66 = arith.constant 0 : index
      %99 = vector.load %arg9[%c0_64, %c0_65, %c0_66] : memref<2x8x16xf32, #tpu.memory_space<vmem>>, vector<2x8x16xf32>
      tpu.vector_store %arg9[%c0_64, %c0_65, %c0_66], %98 {strides = array<i32>} : memref<2x8x16xf32, #tpu.memory_space<vmem>>, vector<2x8x16xf32>,
    } else {
    }
    %c0 = arith.constant 0 : index
    %c0_1 = arith.constant 0 : index
    %c0_2 = arith.constant 0 : index
    %3 = vector.load %arg3[%c0, %c0_1, %c0_2] : memref<1x8x96xbf16, #tpu.memory_space<vmem>>, vector<1x8x96xbf16>
    %4 = vector.shape_cast %3 : vector<1x8x96xbf16> to vector<8x96xbf16>
    %c0_3 = arith.constant 0 : index
    %c0_4 = arith.constant 0 : index
    %c0_5 = arith.constant 0 : index
    %5 = vector.load %arg4[%c0_3, %c0_4, %c0_5] : memref<1x8x96xbf16, #tpu.memory_space<vmem>>, vector<1x8x96xbf16>
    %6 = vector.shape_cast %5 : vector<1x8x96xbf16> to vector<8x96xbf16>
    %c0_6 = arith.constant 0 : index
    %c0_7 = arith.constant 0 : index
    %c0_8 = arith.constant 0 : index
    %7 = vector.load %arg5[%c0_6, %c0_7, %c0_8] : memref<1x1x8xf32, #tpu.memory_space<vmem>>, vector<1x1x8xf32>
    %8 = vector.shape_cast %7 : vector<1x1x8xf32> to vector<1x8xf32>
    %9 = vector.extract_strided_slice %4 {offsets = [0, 0], sizes = [8, 16], strides = [1, 1]} : vector<8x96xbf16> to vector<8x16xbf16>
    %10 = vector.extract_strided_slice %6 {offsets = [0, 32], sizes = [8, 16], strides = [1, 1]} : vector<8x96xbf16> to vector<8x16xbf16>
    %11 = vector.extract_strided_slice %6 {offsets = [0, 64], sizes = [8, 16], strides = [1, 1]} : vector<8x96xbf16> to vector<8x16xbf16>
    %12 = tpu.transpose %10, [1, 0] : vector<8x16xbf16> -> vector<16x8xbf16>
    %cst = arith.constant dense<0.000000e+00> : vector<8x8xf32>
    %13 = tpu.matmul %9, %12, %cst {dimension_numbers = #tpu.dot_dimension_numbers<[1], [0], [0], [1], [0, 0, 1, 1], [], []>} : vector<8x16xbf16>, vector<16x8xbf16>, vector<8x8xf32> -> vector<8x8xf32>
    %cst_9 = arith.constant 2.500000e-01 : f32
    %14 = vector.broadcast %cst_9 : f32 to vector<8x8xf32>
    %15 = arith.mulf %13, %14 : vector<8x8xf32>
    %16 = vector.broadcast %8 : vector<1x8xf32> to vector<8x8xf32>
    %17 = arith.addf %15, %16 : vector<8x8xf32>
    %c0_10 = arith.constant 0 : index
    %c0_11 = arith.constant 0 : index
    %c0_12 = arith.constant 0 : index
    %18 = vector.load %arg7[%c0_10, %c0_11, %c0_12] : memref<2x8x1xf32, #tpu.memory_space<vmem>>, vector<1x8x1xf32>
    %19 = vector.shape_cast %18 : vector<1x8x1xf32> to vector<8x1xf32>
    %cst_13 = arith.constant dense<0xFF800000> : vector<8xf32>
    %20 = vector.multi_reduction <maximumf>, %17, %cst_13 [1] : vector<8x8xf32> to vector<8xf32>
    %21 = vector.shape_cast %20 : vector<8xf32> to vector<8x1xf32>
    %22 = arith.maximumf %19, %21 : vector<8x1xf32>
    %23 = arith.subf %19, %22 : vector<8x1xf32>
    %24 = math.exp %23 : vector<8x1xf32>
    %25 = vector.broadcast %22 : vector<8x1xf32> to vector<8x8xf32>
    %26 = arith.subf %17, %25 : vector<8x8xf32>
    %27 = math.exp %26 : vector<8x8xf32>
    %c0_14 = arith.constant 0 : index
    %c0_15 = arith.constant 0 : index
    %c0_16 = arith.constant 0 : index
    %28 = vector.load %arg8[%c0_14, %c0_15, %c0_16] : memref<2x8x1xf32, #tpu.memory_space<vmem>>, vector<1x8x1xf32>
    %29 = vector.shape_cast %28 : vector<1x8x1xf32> to vector<8x1xf32>
    %30 = arith.mulf %24, %29 : vector<8x1xf32>
    %cst_17 = arith.constant dense<0.000000e+00> : vector<8xf32>
    %31 = vector.multi_reduction <add>, %27, %cst_17 [1] : vector<8x8xf32> to vector<8xf32>
    %32 = vector.shape_cast %31 : vector<8xf32> to vector<8x1xf32>
    %33 = arith.addf %30, %32 : vector<8x1xf32>
    %c0_18 = arith.constant 0 : index
    %c0_19 = arith.constant 0 : index
    %c0_20 = arith.constant 0 : index
    %34 = vector.load %arg8[%c0_18, %c0_19, %c0_20] : memref<2x8x1xf32, #tpu.memory_space<vmem>>, vector<1x8x1xf32>
    %35 = vector.shape_cast %34 : vector<1x8x1xf32> to vector<8x1xf32>
    %36 = vector.shape_cast %33 : vector<8x1xf32> to vector<1x8x1xf32>
    tpu.vector_store %arg8[%c0_18, %c0_19, %c0_20], %36 {strides = array<i32>} : memref<2x8x1xf32, #tpu.memory_space<vmem>>, vector<1x8x1xf32>,
    %c0_21 = arith.constant 0 : index
    %c0_22 = arith.constant 0 : index
    %c0_23 = arith.constant 0 : index
    %37 = vector.load %arg9[%c0_21, %c0_22, %c0_23] : memref<2x8x16xf32, #tpu.memory_space<vmem>>, vector<1x8x16xf32>
    %38 = vector.shape_cast %37 : vector<1x8x16xf32> to vector<8x16xf32>
    %39 = vector.broadcast %24 : vector<8x1xf32> to vector<8x16xf32>
    %40 = arith.mulf %39, %38 : vector<8x16xf32>
    %41 = arith.truncf %27 : vector<8x8xf32> to vector<8x8xbf16>
    %cst_24 = arith.constant dense<0.000000e+00> : vector<8x16xf32>
    %42 = tpu.matmul %41, %11, %cst_24 {dimension_numbers = #tpu.dot_dimension_numbers<[1], [0], [0], [1], [0, 0, 1, 1], [], []>} : vector<8x8xbf16>, vector<8x16xbf16>, vector<8x16xf32> -> vector<8x16xf32>
    %43 = arith.addf %40, %42 : vector<8x16xf32>
    %c0_25 = arith.constant 0 : index
    %c0_26 = arith.constant 0 : index
    %c0_27 = arith.constant 0 : index
    %44 = vector.load %arg9[%c0_25, %c0_26, %c0_27] : memref<2x8x16xf32, #tpu.memory_space<vmem>>, vector<1x8x16xf32>
    %45 = vector.shape_cast %44 : vector<1x8x16xf32> to vector<8x16xf32>
    %46 = vector.shape_cast %43 : vector<8x16xf32> to vector<1x8x16xf32>
    tpu.vector_store %arg9[%c0_25, %c0_26, %c0_27], %46 {strides = array<i32>} : memref<2x8x16xf32, #tpu.memory_space<vmem>>, vector<1x8x16xf32>,
    %c0_28 = arith.constant 0 : index
    %c0_29 = arith.constant 0 : index
    %c0_30 = arith.constant 0 : index
    %47 = vector.load %arg7[%c0_28, %c0_29, %c0_30] : memref<2x8x1xf32, #tpu.memory_space<vmem>>, vector<1x8x1xf32>
    %48 = vector.shape_cast %47 : vector<1x8x1xf32> to vector<8x1xf32>
    %49 = vector.shape_cast %22 : vector<8x1xf32> to vector<1x8x1xf32>
    tpu.vector_store %arg7[%c0_28, %c0_29, %c0_30], %49 {strides = array<i32>} : memref<2x8x1xf32, #tpu.memory_space<vmem>>, vector<1x8x1xf32>,
    %50 = vector.extract_strided_slice %4 {offsets = [0, 16], sizes = [8, 16], strides = [1, 1]} : vector<8x96xbf16> to vector<8x16xbf16>
    %51 = vector.extract_strided_slice %6 {offsets = [0, 48], sizes = [8, 16], strides = [1, 1]} : vector<8x96xbf16> to vector<8x16xbf16>
    %52 = vector.extract_strided_slice %6 {offsets = [0, 80], sizes = [8, 16], strides = [1, 1]} : vector<8x96xbf16> to vector<8x16xbf16>
    %53 = tpu.transpose %51, [1, 0] : vector<8x16xbf16> -> vector<16x8xbf16>
    %cst_31 = arith.constant dense<0.000000e+00> : vector<8x8xf32>
    %54 = tpu.matmul %50, %53, %cst_31 {dimension_numbers = #tpu.dot_dimension_numbers<[1], [0], [0], [1], [0, 0, 1, 1], [], []>} : vector<8x16xbf16>, vector<16x8xbf16>, vector<8x8xf32> -> vector<8x8xf32>
    %cst_32 = arith.constant 2.500000e-01 : f32
    %55 = vector.broadcast %cst_32 : f32 to vector<8x8xf32>
    %56 = arith.mulf %54, %55 : vector<8x8xf32>
    %57 = vector.broadcast %8 : vector<1x8xf32> to vector<8x8xf32>
    %58 = arith.addf %56, %57 : vector<8x8xf32>
    %c1 = arith.constant 1 : index
    %c0_33 = arith.constant 0 : index
    %c0_34 = arith.constant 0 : index
    %59 = vector.load %arg7[%c1, %c0_33, %c0_34] : memref<2x8x1xf32, #tpu.memory_space<vmem>>, vector<1x8x1xf32>
    %60 = vector.shape_cast %59 : vector<1x8x1xf32> to vector<8x1xf32>
    %cst_35 = arith.constant dense<0xFF800000> : vector<8xf32>
    %61 = vector.multi_reduction <maximumf>, %58, %cst_35 [1] : vector<8x8xf32> to vector<8xf32>
    %62 = vector.shape_cast %61 : vector<8xf32> to vector<8x1xf32>
    %63 = arith.maximumf %60, %62 : vector<8x1xf32>
    %64 = arith.subf %60, %63 : vector<8x1xf32>
    %65 = math.exp %64 : vector<8x1xf32>
    %66 = vector.broadcast %63 : vector<8x1xf32> to vector<8x8xf32>
    %67 = arith.subf %58, %66 : vector<8x8xf32>
    %68 = math.exp %67 : vector<8x8xf32>
    %c1_36 = arith.constant 1 : index
    %c0_37 = arith.constant 0 : index
    %c0_38 = arith.constant 0 : index
    %69 = vector.load %arg8[%c1_36, %c0_37, %c0_38] : memref<2x8x1xf32, #tpu.memory_space<vmem>>, vector<1x8x1xf32>
    %70 = vector.shape_cast %69 : vector<1x8x1xf32> to vector<8x1xf32>
    %71 = arith.mulf %65, %70 : vector<8x1xf32>
    %cst_39 = arith.constant dense<0.000000e+00> : vector<8xf32>
    %72 = vector.multi_reduction <add>, %68, %cst_39 [1] : vector<8x8xf32> to vector<8xf32>
    %73 = vector.shape_cast %72 : vector<8xf32> to vector<8x1xf32>
    %74 = arith.addf %71, %73 : vector<8x1xf32>
    %c1_40 = arith.constant 1 : index
    %c0_41 = arith.constant 0 : index
    %c0_42 = arith.constant 0 : index
    %75 = vector.load %arg8[%c1_40, %c0_41, %c0_42] : memref<2x8x1xf32, #tpu.memory_space<vmem>>, vector<1x8x1xf32>
    %76 = vector.shape_cast %75 : vector<1x8x1xf32> to vector<8x1xf32>
    %77 = vector.shape_cast %74 : vector<8x1xf32> to vector<1x8x1xf32>
    tpu.vector_store %arg8[%c1_40, %c0_41, %c0_42], %77 {strides = array<i32>} : memref<2x8x1xf32, #tpu.memory_space<vmem>>, vector<1x8x1xf32>,
    %c1_43 = arith.constant 1 : index
    %c0_44 = arith.constant 0 : index
    %c0_45 = arith.constant 0 : index
    %78 = vector.load %arg9[%c1_43, %c0_44, %c0_45] : memref<2x8x16xf32, #tpu.memory_space<vmem>>, vector<1x8x16xf32>
    %79 = vector.shape_cast %78 : vector<1x8x16xf32> to vector<8x16xf32>
    %80 = vector.broadcast %65 : vector<8x1xf32> to vector<8x16xf32>
    %81 = arith.mulf %80, %79 : vector<8x16xf32>
    %82 = arith.truncf %68 : vector<8x8xf32> to vector<8x8xbf16>
    %cst_46 = arith.constant dense<0.000000e+00> : vector<8x16xf32>
    %83 = tpu.matmul %82, %52, %cst_46 {dimension_numbers = #tpu.dot_dimension_numbers<[1], [0], [0], [1], [0, 0, 1, 1], [], []>} : vector<8x8xbf16>, vector<8x16xbf16>, vector<8x16xf32> -> vector<8x16xf32>
    %84 = arith.addf %81, %83 : vector<8x16xf32>
    %c1_47 = arith.constant 1 : index
    %c0_48 = arith.constant 0 : index
    %c0_49 = arith.constant 0 : index
    %85 = vector.load %arg9[%c1_47, %c0_48, %c0_49] : memref<2x8x16xf32, #tpu.memory_space<vmem>>, vector<1x8x16xf32>
    %86 = vector.shape_cast %85 : vector<1x8x16xf32> to vector<8x16xf32>
    %87 = vector.shape_cast %84 : vector<8x16xf32> to vector<1x8x16xf32>
    tpu.vector_store %arg9[%c1_47, %c0_48, %c0_49], %87 {strides = array<i32>} : memref<2x8x16xf32, #tpu.memory_space<vmem>>, vector<1x8x16xf32>,
    %c1_50 = arith.constant 1 : index
    %c0_51 = arith.constant 0 : index
    %c0_52 = arith.constant 0 : index
    %88 = vector.load %arg7[%c1_50, %c0_51, %c0_52] : memref<2x8x1xf32, #tpu.memory_space<vmem>>, vector<1x8x1xf32>
    %89 = vector.shape_cast %88 : vector<1x8x1xf32> to vector<8x1xf32>
    %90 = vector.shape_cast %63 : vector<8x1xf32> to vector<1x8x1xf32>
    tpu.vector_store %arg7[%c1_50, %c0_51, %c0_52], %90 {strides = array<i32>} : memref<2x8x1xf32, #tpu.memory_space<vmem>>, vector<1x8x1xf32>,
    %c0_i32_53 = arith.constant 0 : i32
    %91 = arith.cmpi eq, %arg2, %c0_i32_53 : i32
    %92 = arith.extui %91 : i1 to i32
    %c0_i32_54 = arith.constant 0 : i32
    %93 = arith.cmpi ne, %92, %c0_i32_54 : i32
    scf.if %93 {
      %c0_55 = arith.constant 0 : index
      %c0_56 = arith.constant 0 : index
      %c0_57 = arith.constant 0 : index
      %94 = vector.load %arg8[%c0_55, %c0_56, %c0_57] : memref<2x8x1xf32, #tpu.memory_space<vmem>>, vector<1x8x1xf32>
      %95 = vector.shape_cast %94 : vector<1x8x1xf32> to vector<8x1xf32>
      %96 = tpu.reciprocal %95 {approx = true} : vector<8x1xf32> -> vector<8x1xf32>
      %c0_58 = arith.constant 0 : index
      %c0_59 = arith.constant 0 : index
      %c0_60 = arith.constant 0 : index
      %97 = vector.load %arg9[%c0_58, %c0_59, %c0_60] : memref<2x8x16xf32, #tpu.memory_space<vmem>>, vector<1x8x16xf32>
      %98 = vector.shape_cast %97 : vector<1x8x16xf32> to vector<8x16xf32>
      %99 = vector.broadcast %96 : vector<8x1xf32> to vector<8x16xf32>
      %100 = arith.mulf %98, %99 : vector<8x16xf32>
      %c1_61 = arith.constant 1 : index
      %c0_62 = arith.constant 0 : index
      %c0_63 = arith.constant 0 : index
      %101 = vector.load %arg8[%c1_61, %c0_62, %c0_63] : memref<2x8x1xf32, #tpu.memory_space<vmem>>, vector<1x8x1xf32>
      %102 = vector.shape_cast %101 : vector<1x8x1xf32> to vector<8x1xf32>
      %103 = tpu.reciprocal %102 {approx = true} : vector<8x1xf32> -> vector<8x1xf32>
      %c1_64 = arith.constant 1 : index
      %c0_65 = arith.constant 0 : index
      %c0_66 = arith.constant 0 : index
      %104 = vector.load %arg9[%c1_64, %c0_65, %c0_66] : memref<2x8x16xf32, #tpu.memory_space<vmem>>, vector<1x8x16xf32>
      %105 = vector.shape_cast %104 : vector<1x8x16xf32> to vector<8x16xf32>
      %106 = vector.broadcast %103 : vector<8x1xf32> to vector<8x16xf32>
      %107 = arith.mulf %105, %106 : vector<8x16xf32>
      %108 = tpu.concatenate %100, %107 in 1 : vector<8x16xf32>, vector<8x16xf32> -> vector<8x32xf32>
      %109 = arith.truncf %108 : vector<8x32xf32> to vector<8x32xbf16>
      %c0_67 = arith.constant 0 : index
      %c0_68 = arith.constant 0 : index
      %c0_69 = arith.constant 0 : index
      %110 = vector.load %arg6[%c0_67, %c0_68, %c0_69] : memref<1x8x32xbf16, #tpu.memory_space<vmem>>, vector<1x8x32xbf16>
      %111 = vector.shape_cast %110 : vector<1x8x32xbf16> to vector<8x32xbf16>
      %112 = vector.shape_cast %109 : vector<8x32xbf16> to vector<1x8x32xbf16>
      tpu.vector_store %arg6[%c0_67, %c0_68, %c0_69], %112 {strides = array<i32>} : memref<1x8x32xbf16, #tpu.memory_space<vmem>>, vector<1x8x32xbf16>,
    } else {
    }
    return
  }
  func.func @transform_0(%arg0: i32, %arg1: i32, %arg2: i32) -> (i32, i32, i32) {
    %c0_i32 = arith.constant 0 : i32
    %c0_i32_0 = arith.constant 0 : i32
    return %arg0, %arg1, %c0_i32 : i32, i32, i32
  }
  func.func @transform_1(%arg0: i32, %arg1: i32, %arg2: i32) -> (i32, i32, i32) {
    %c0_i32 = arith.constant 0 : i32
    %c0_i32_0 = arith.constant 0 : i32
    return %arg0, %arg2, %c0_i32 : i32, i32, i32
  }
  func.func @transform_2(%arg0: i32, %arg1: i32, %arg2: i32) -> (i32, i32, i32) {
    %c0_i32 = arith.constant 0 : i32
    %c0_i32_0 = arith.constant 0 : i32
    return %arg0, %c0_i32, %arg2 : i32, i32, i32
  }
  func.func @transform_3(%arg0: i32, %arg1: i32, %arg2: i32) -> (i32, i32, i32) {
    %c0_i32 = arith.constant 0 : i32
    %c0_i32_0 = arith.constant 0 : i32
    return %arg0, %arg1, %c0_i32 : i32, i32, i32
  }
}

module attributes {stable_mosaic.version = 11 : i64} {
  func.func @_matmul_bias_kernel(%arg0: i32, %arg1: i32, %arg2: i32, %arg3: memref<16x32xbf16, #tpu.memory_space<vmem>>, %arg4: memref<32x96xbf16, #tpu.memory_space<vmem>>, %arg5: memref<1x96xf32, #tpu.memory_space<vmem>>, %arg6: memref<16x96xbf16, #tpu.memory_space<vmem>>, %arg7: memref<16x96xf32, #tpu.memory_space<vmem>>) attributes {dimension_semantics = [#tpu.dimension_semantics<parallel>, #tpu.dimension_semantics<parallel>, #tpu.dimension_semantics<arbitrary>], iteration_bounds = array<i64: 1, 1, 1>, scalar_prefetch = 0 : i64, scratch_operands = 1 : i64, tpu.core_type = #tpu.core_type<tc>, window_params = [{transform_indices = @transform_0, window_bounds = array<i64: 16, 32>}, {transform_indices = @transform_1, window_bounds = array<i64: 32, 96>}, {transform_indices = @transform_2, window_bounds = array<i64: 1, 96>}, {transform_indices = @transform_3, window_bounds = array<i64: 16, 96>}]} {
    %c0_i32 = arith.constant 0 : i32
    %0 = arith.cmpi eq, %arg2, %c0_i32 : i32
    %1 = arith.extui %0 : i1 to i32
    %c0_i32_0 = arith.constant 0 : i32
    %2 = arith.cmpi ne, %1, %c0_i32_0 : i32
    scf.if %2 {
      %cst_10 = arith.constant 0.000000e+00 : f32
      %12 = vector.broadcast %cst_10 : f32 to vector<16x96xf32>
      %c0_11 = arith.constant 0 : index
      %c0_12 = arith.constant 0 : index
      %13 = vector.load %arg7[%c0_11, %c0_12] : memref<16x96xf32, #tpu.memory_space<vmem>>, vector<16x96xf32>
      tpu.vector_store %arg7[%c0_11, %c0_12], %12 {strides = array<i32>} : memref<16x96xf32, #tpu.memory_space<vmem>>, vector<16x96xf32>,
    } else {
    }
    %c0 = arith.constant 0 : index
    %c0_1 = arith.constant 0 : index
    %3 = vector.load %arg7[%c0, %c0_1] : memref<16x96xf32, #tpu.memory_space<vmem>>, vector<16x96xf32>
    %c0_2 = arith.constant 0 : index
    %c0_3 = arith.constant 0 : index
    %4 = vector.load %arg3[%c0_2, %c0_3] : memref<16x32xbf16, #tpu.memory_space<vmem>>, vector<16x32xbf16>
    %c0_4 = arith.constant 0 : index
    %c0_5 = arith.constant 0 : index
    %5 = vector.load %arg4[%c0_4, %c0_5] : memref<32x96xbf16, #tpu.memory_space<vmem>>, vector<32x96xbf16>
    %cst = arith.constant dense<0.000000e+00> : vector<16x96xf32>
    %6 = tpu.matmul %4, %5, %cst {dimension_numbers = #tpu.dot_dimension_numbers<[1], [0], [0], [1], [0, 0, 1, 1], [], []>} : vector<16x32xbf16>, vector<32x96xbf16>, vector<16x96xf32> -> vector<16x96xf32>
    %7 = arith.addf %3, %6 : vector<16x96xf32>
    %c0_6 = arith.constant 0 : index
    %c0_7 = arith.constant 0 : index
    %8 = vector.load %arg7[%c0_6, %c0_7] : memref<16x96xf32, #tpu.memory_space<vmem>>, vector<16x96xf32>
    tpu.vector_store %arg7[%c0_6, %c0_7], %7 {strides = array<i32>} : memref<16x96xf32, #tpu.memory_space<vmem>>, vector<16x96xf32>,
    %c0_i32_8 = arith.constant 0 : i32
    %9 = arith.cmpi eq, %arg2, %c0_i32_8 : i32
    %10 = arith.extui %9 : i1 to i32
    %c0_i32_9 = arith.constant 0 : i32
    %11 = arith.cmpi ne, %10, %c0_i32_9 : i32
    scf.if %11 {
      %c0_10 = arith.constant 0 : index
      %c0_11 = arith.constant 0 : index
      %12 = vector.load %arg7[%c0_10, %c0_11] : memref<16x96xf32, #tpu.memory_space<vmem>>, vector<16x96xf32>
      %c0_12 = arith.constant 0 : index
      %c0_13 = arith.constant 0 : index
      %13 = vector.load %arg5[%c0_12, %c0_13] : memref<1x96xf32, #tpu.memory_space<vmem>>, vector<1x96xf32>
      %14 = vector.broadcast %13 : vector<1x96xf32> to vector<16x96xf32>
      %15 = arith.addf %12, %14 : vector<16x96xf32>
      %16 = arith.truncf %15 : vector<16x96xf32> to vector<16x96xbf16>
      %c0_14 = arith.constant 0 : index
      %c0_15 = arith.constant 0 : index
      %17 = vector.load %arg6[%c0_14, %c0_15] : memref<16x96xbf16, #tpu.memory_space<vmem>>, vector<16x96xbf16>
      tpu.vector_store %arg6[%c0_14, %c0_15], %16 {strides = array<i32>} : memref<16x96xbf16, #tpu.memory_space<vmem>>, vector<16x96xbf16>,
    } else {
    }
    return
  }
  func.func @transform_0(%arg0: i32, %arg1: i32, %arg2: i32) -> (i32, i32) {
    %c0_i32 = arith.constant 0 : i32
    return %arg0, %arg2 : i32, i32
  }
  func.func @transform_1(%arg0: i32, %arg1: i32, %arg2: i32) -> (i32, i32) {
    %c0_i32 = arith.constant 0 : i32
    return %arg2, %arg1 : i32, i32
  }
  func.func @transform_2(%arg0: i32, %arg1: i32, %arg2: i32) -> (i32, i32) {
    %c0_i32 = arith.constant 0 : i32
    %c0_i32_0 = arith.constant 0 : i32
    return %c0_i32, %arg1 : i32, i32
  }
  func.func @transform_3(%arg0: i32, %arg1: i32, %arg2: i32) -> (i32, i32) {
    %c0_i32 = arith.constant 0 : i32
    return %arg0, %arg1 : i32, i32
  }
}

module attributes {stable_mosaic.version = 11 : i64} {
  func.func @_linear_ln_kernel(%arg0: i32, %arg1: i32, %arg2: memref<16x64xbf16, #tpu.memory_space<vmem>>, %arg3: memref<64x32xbf16, #tpu.memory_space<vmem>>, %arg4: memref<1x32xf32, #tpu.memory_space<vmem>>, %arg5: memref<1x32xf32, #tpu.memory_space<vmem>>, %arg6: memref<1x32xf32, #tpu.memory_space<vmem>>, %arg7: memref<16x32xbf16, #tpu.memory_space<vmem>>, %arg8: memref<16x32xf32, #tpu.memory_space<vmem>>, %arg9: memref<16x32xf32, #tpu.memory_space<vmem>>) attributes {dimension_semantics = [#tpu.dimension_semantics<parallel>, #tpu.dimension_semantics<arbitrary>], iteration_bounds = array<i64: 1, 1>, scalar_prefetch = 0 : i64, scratch_operands = 1 : i64, tpu.core_type = #tpu.core_type<tc>, window_params = [{transform_indices = @transform_0, window_bounds = array<i64: 16, 64>}, {transform_indices = @transform_1, window_bounds = array<i64: 64, 32>}, {pipeline_mode = #tpu.pipeline_mode<synchronous>, transform_indices = @transform_2, window_bounds = array<i64: 1, 32>}, {pipeline_mode = #tpu.pipeline_mode<synchronous>, transform_indices = @transform_3, window_bounds = array<i64: 1, 32>}, {pipeline_mode = #tpu.pipeline_mode<synchronous>, transform_indices = @transform_4, window_bounds = array<i64: 1, 32>}, {transform_indices = @transform_5, window_bounds = array<i64: 16, 32>}, {transform_indices = @transform_6, window_bounds = array<i64: 16, 32>}]} {
    %c0_i32 = arith.constant 0 : i32
    %0 = arith.cmpi eq, %arg1, %c0_i32 : i32
    %1 = arith.extui %0 : i1 to i32
    %c0_i32_0 = arith.constant 0 : i32
    %2 = arith.cmpi ne, %1, %c0_i32_0 : i32
    scf.if %2 {
      %cst_10 = arith.constant 0.000000e+00 : f32
      %12 = vector.broadcast %cst_10 : f32 to vector<16x32xf32>
      %c0_11 = arith.constant 0 : index
      %c0_12 = arith.constant 0 : index
      %13 = vector.load %arg9[%c0_11, %c0_12] : memref<16x32xf32, #tpu.memory_space<vmem>>, vector<16x32xf32>
      tpu.vector_store %arg9[%c0_11, %c0_12], %12 {strides = array<i32>} : memref<16x32xf32, #tpu.memory_space<vmem>>, vector<16x32xf32>,
    } else {
    }
    %c0 = arith.constant 0 : index
    %c0_1 = arith.constant 0 : index
    %3 = vector.load %arg9[%c0, %c0_1] : memref<16x32xf32, #tpu.memory_space<vmem>>, vector<16x32xf32>
    %c0_2 = arith.constant 0 : index
    %c0_3 = arith.constant 0 : index
    %4 = vector.load %arg2[%c0_2, %c0_3] : memref<16x64xbf16, #tpu.memory_space<vmem>>, vector<16x64xbf16>
    %c0_4 = arith.constant 0 : index
    %c0_5 = arith.constant 0 : index
    %5 = vector.load %arg3[%c0_4, %c0_5] : memref<64x32xbf16, #tpu.memory_space<vmem>>, vector<64x32xbf16>
    %cst = arith.constant dense<0.000000e+00> : vector<16x32xf32>
    %6 = tpu.matmul %4, %5, %cst {dimension_numbers = #tpu.dot_dimension_numbers<[1], [0], [0], [1], [0, 0, 1, 1], [], []>} : vector<16x64xbf16>, vector<64x32xbf16>, vector<16x32xf32> -> vector<16x32xf32>
    %7 = arith.addf %3, %6 : vector<16x32xf32>
    %c0_6 = arith.constant 0 : index
    %c0_7 = arith.constant 0 : index
    %8 = vector.load %arg9[%c0_6, %c0_7] : memref<16x32xf32, #tpu.memory_space<vmem>>, vector<16x32xf32>
    tpu.vector_store %arg9[%c0_6, %c0_7], %7 {strides = array<i32>} : memref<16x32xf32, #tpu.memory_space<vmem>>, vector<16x32xf32>,
    %c0_i32_8 = arith.constant 0 : i32
    %9 = arith.cmpi eq, %arg1, %c0_i32_8 : i32
    %10 = arith.extui %9 : i1 to i32
    %c0_i32_9 = arith.constant 0 : i32
    %11 = arith.cmpi ne, %10, %c0_i32_9 : i32
    scf.if %11 {
      %c0_10 = arith.constant 0 : index
      %c0_11 = arith.constant 0 : index
      %12 = vector.load %arg9[%c0_10, %c0_11] : memref<16x32xf32, #tpu.memory_space<vmem>>, vector<16x32xf32>
      %c0_12 = arith.constant 0 : index
      %c0_13 = arith.constant 0 : index
      %13 = vector.load %arg4[%c0_12, %c0_13] : memref<1x32xf32, #tpu.memory_space<vmem>>, vector<1x32xf32>
      %14 = vector.broadcast %13 : vector<1x32xf32> to vector<16x32xf32>
      %15 = arith.addf %12, %14 : vector<16x32xf32>
      %c0_14 = arith.constant 0 : index
      %c0_15 = arith.constant 0 : index
      %16 = vector.load %arg7[%c0_14, %c0_15] : memref<16x32xbf16, #tpu.memory_space<vmem>>, vector<16x32xbf16>
      %17 = arith.extf %16 : vector<16x32xbf16> to vector<16x32xf32>
      %18 = arith.addf %15, %17 : vector<16x32xf32>
      %cst_16 = arith.constant dense<0.000000e+00> : vector<16xf32>
      %19 = vector.multi_reduction <add>, %18, %cst_16 [1] : vector<16x32xf32> to vector<16xf32>
      %20 = vector.shape_cast %19 : vector<16xf32> to vector<16x1xf32>
      %cst_17 = arith.constant 3.200000e+01 : f32
      %21 = vector.broadcast %cst_17 : f32 to vector<16x1xf32>
      %22 = arith.divf %20, %21 : vector<16x1xf32>
      %23 = vector.broadcast %22 : vector<16x1xf32> to vector<16x32xf32>
      %24 = arith.subf %18, %23 : vector<16x32xf32>
      %25 = arith.mulf %24, %24 : vector<16x32xf32>
      %cst_18 = arith.constant dense<0.000000e+00> : vector<16xf32>
      %26 = vector.multi_reduction <add>, %25, %cst_18 [1] : vector<16x32xf32> to vector<16xf32>
      %27 = vector.shape_cast %26 : vector<16xf32> to vector<16x1xf32>
      %cst_19 = arith.constant 3.200000e+01 : f32
      %28 = vector.broadcast %cst_19 : f32 to vector<16x1xf32>
      %29 = arith.divf %27, %28 : vector<16x1xf32>
      %30 = vector.broadcast %22 : vector<16x1xf32> to vector<16x32xf32>
      %31 = arith.subf %18, %30 : vector<16x32xf32>
      %cst_20 = arith.constant 9.99999996E-13 : f32
      %32 = vector.broadcast %cst_20 : f32 to vector<16x1xf32>
      %33 = arith.addf %29, %32 : vector<16x1xf32>
      %34 = math.rsqrt %33 : vector<16x1xf32>
      %35 = vector.broadcast %34 : vector<16x1xf32> to vector<16x32xf32>
      %36 = arith.mulf %31, %35 : vector<16x32xf32>
      %c0_21 = arith.constant 0 : index
      %c0_22 = arith.constant 0 : index
      %37 = vector.load %arg5[%c0_21, %c0_22] : memref<1x32xf32, #tpu.memory_space<vmem>>, vector<1x32xf32>
      %38 = vector.broadcast %37 : vector<1x32xf32> to vector<16x32xf32>
      %39 = arith.mulf %36, %38 : vector<16x32xf32>
      %c0_23 = arith.constant 0 : index
      %c0_24 = arith.constant 0 : index
      %40 = vector.load %arg6[%c0_23, %c0_24] : memref<1x32xf32, #tpu.memory_space<vmem>>, vector<1x32xf32>
      %41 = vector.broadcast %40 : vector<1x32xf32> to vector<16x32xf32>
      %42 = arith.addf %39, %41 : vector<16x32xf32>
      %c0_25 = arith.constant 0 : index
      %c0_26 = arith.constant 0 : index
      %43 = vector.load %arg8[%c0_25, %c0_26] : memref<16x32xf32, #tpu.memory_space<vmem>>, vector<16x32xf32>
      tpu.vector_store %arg8[%c0_25, %c0_26], %42 {strides = array<i32>} : memref<16x32xf32, #tpu.memory_space<vmem>>, vector<16x32xf32>,
    } else {
    }
    return
  }
  func.func @transform_0(%arg0: i32, %arg1: i32) -> (i32, i32) {
    %c0_i32 = arith.constant 0 : i32
    return %arg0, %arg1 : i32, i32
  }
  func.func @transform_1(%arg0: i32, %arg1: i32) -> (i32, i32) {
    %c0_i32 = arith.constant 0 : i32
    %c0_i32_0 = arith.constant 0 : i32
    return %arg1, %c0_i32 : i32, i32
  }
  func.func @transform_2(%arg0: i32, %arg1: i32) -> (i32, i32) {
    %c0_i32 = arith.constant 0 : i32
    %c0_i32_0 = arith.constant 0 : i32
    %c0_i32_1 = arith.constant 0 : i32
    return %c0_i32, %c0_i32_0 : i32, i32
  }
  func.func @transform_3(%arg0: i32, %arg1: i32) -> (i32, i32) {
    %c0_i32 = arith.constant 0 : i32
    %c0_i32_0 = arith.constant 0 : i32
    %c0_i32_1 = arith.constant 0 : i32
    return %c0_i32, %c0_i32_0 : i32, i32
  }
  func.func @transform_4(%arg0: i32, %arg1: i32) -> (i32, i32) {
    %c0_i32 = arith.constant 0 : i32
    %c0_i32_0 = arith.constant 0 : i32
    %c0_i32_1 = arith.constant 0 : i32
    return %c0_i32, %c0_i32_0 : i32, i32
  }
  func.func @transform_5(%arg0: i32, %arg1: i32) -> (i32, i32) {
    %c0_i32 = arith.constant 0 : i32
    %c0_i32_0 = arith.constant 0 : i32
    return %arg0, %c0_i32 : i32, i32
  }
  func.func @transform_6(%arg0: i32, %arg1: i32) -> (i32, i32) {
    %c0_i32 = arith.constant 0 : i32
    %c0_i32_0 = arith.constant 0 : i32
    return %arg0, %c0_i32 : i32, i32
  }
}

module attributes {stable_mosaic.version = 11 : i64} {
  func.func @_matmul_bias_kernel(%arg0: i32, %arg1: i32, %arg2: i32, %arg3: memref<2x32xbf16, #tpu.memory_space<vmem>>, %arg4: memref<32x32xbf16, #tpu.memory_space<vmem>>, %arg5: memref<1x32xf32, #tpu.memory_space<vmem>>, %arg6: memref<2x32xf32, #tpu.memory_space<vmem>>, %arg7: memref<2x32xf32, #tpu.memory_space<vmem>>) attributes {dimension_semantics = [#tpu.dimension_semantics<parallel>, #tpu.dimension_semantics<parallel>, #tpu.dimension_semantics<arbitrary>], iteration_bounds = array<i64: 1, 1, 1>, scalar_prefetch = 0 : i64, scratch_operands = 1 : i64, tpu.core_type = #tpu.core_type<tc>, window_params = [{transform_indices = @transform_0, window_bounds = array<i64: 2, 32>}, {transform_indices = @transform_1, window_bounds = array<i64: 32, 32>}, {transform_indices = @transform_2, window_bounds = array<i64: 1, 32>}, {transform_indices = @transform_3, window_bounds = array<i64: 2, 32>}]} {
    %c0_i32 = arith.constant 0 : i32
    %0 = arith.cmpi eq, %arg2, %c0_i32 : i32
    %1 = arith.extui %0 : i1 to i32
    %c0_i32_0 = arith.constant 0 : i32
    %2 = arith.cmpi ne, %1, %c0_i32_0 : i32
    scf.if %2 {
      %cst_10 = arith.constant 0.000000e+00 : f32
      %12 = vector.broadcast %cst_10 : f32 to vector<2x32xf32>
      %c0_11 = arith.constant 0 : index
      %c0_12 = arith.constant 0 : index
      %13 = vector.load %arg7[%c0_11, %c0_12] : memref<2x32xf32, #tpu.memory_space<vmem>>, vector<2x32xf32>
      tpu.vector_store %arg7[%c0_11, %c0_12], %12 {strides = array<i32>} : memref<2x32xf32, #tpu.memory_space<vmem>>, vector<2x32xf32>,
    } else {
    }
    %c0 = arith.constant 0 : index
    %c0_1 = arith.constant 0 : index
    %3 = vector.load %arg7[%c0, %c0_1] : memref<2x32xf32, #tpu.memory_space<vmem>>, vector<2x32xf32>
    %c0_2 = arith.constant 0 : index
    %c0_3 = arith.constant 0 : index
    %4 = vector.load %arg3[%c0_2, %c0_3] : memref<2x32xbf16, #tpu.memory_space<vmem>>, vector<2x32xbf16>
    %c0_4 = arith.constant 0 : index
    %c0_5 = arith.constant 0 : index
    %5 = vector.load %arg4[%c0_4, %c0_5] : memref<32x32xbf16, #tpu.memory_space<vmem>>, vector<32x32xbf16>
    %cst = arith.constant dense<0.000000e+00> : vector<2x32xf32>
    %6 = tpu.matmul %4, %5, %cst {dimension_numbers = #tpu.dot_dimension_numbers<[1], [0], [0], [1], [0, 0, 1, 1], [], []>} : vector<2x32xbf16>, vector<32x32xbf16>, vector<2x32xf32> -> vector<2x32xf32>
    %7 = arith.addf %3, %6 : vector<2x32xf32>
    %c0_6 = arith.constant 0 : index
    %c0_7 = arith.constant 0 : index
    %8 = vector.load %arg7[%c0_6, %c0_7] : memref<2x32xf32, #tpu.memory_space<vmem>>, vector<2x32xf32>
    tpu.vector_store %arg7[%c0_6, %c0_7], %7 {strides = array<i32>} : memref<2x32xf32, #tpu.memory_space<vmem>>, vector<2x32xf32>,
    %c0_i32_8 = arith.constant 0 : i32
    %9 = arith.cmpi eq, %arg2, %c0_i32_8 : i32
    %10 = arith.extui %9 : i1 to i32
    %c0_i32_9 = arith.constant 0 : i32
    %11 = arith.cmpi ne, %10, %c0_i32_9 : i32
    scf.if %11 {
      %c0_10 = arith.constant 0 : index
      %c0_11 = arith.constant 0 : index
      %12 = vector.load %arg7[%c0_10, %c0_11] : memref<2x32xf32, #tpu.memory_space<vmem>>, vector<2x32xf32>
      %c0_12 = arith.constant 0 : index
      %c0_13 = arith.constant 0 : index
      %13 = vector.load %arg5[%c0_12, %c0_13] : memref<1x32xf32, #tpu.memory_space<vmem>>, vector<1x32xf32>
      %14 = vector.broadcast %13 : vector<1x32xf32> to vector<2x32xf32>
      %15 = arith.addf %12, %14 : vector<2x32xf32>
      %16 = math.tanh %15 : vector<2x32xf32>
      %c0_14 = arith.constant 0 : index
      %c0_15 = arith.constant 0 : index
      %17 = vector.load %arg6[%c0_14, %c0_15] : memref<2x32xf32, #tpu.memory_space<vmem>>, vector<2x32xf32>
      tpu.vector_store %arg6[%c0_14, %c0_15], %16 {strides = array<i32>} : memref<2x32xf32, #tpu.memory_space<vmem>>, vector<2x32xf32>,
    } else {
    }
    return
  }
  func.func @transform_0(%arg0: i32, %arg1: i32, %arg2: i32) -> (i32, i32) {
    %c0_i32 = arith.constant 0 : i32
    return %arg0, %arg2 : i32, i32
  }
  func.func @transform_1(%arg0: i32, %arg1: i32, %arg2: i32) -> (i32, i32) {
    %c0_i32 = arith.constant 0 : i32
    return %arg2, %arg1 : i32, i32
  }
  func.func @transform_2(%arg0: i32, %arg1: i32, %arg2: i32) -> (i32, i32) {
    %c0_i32 = arith.constant 0 : i32
    %c0_i32_0 = arith.constant 0 : i32
    return %c0_i32, %arg1 : i32, i32
  }
  func.func @transform_3(%arg0: i32, %arg1: i32, %arg2: i32) -> (i32, i32) {
    %c0_i32 = arith.constant 0 : i32
    return %arg0, %arg1 : i32, i32
  }
}

module attributes {stable_mosaic.version = 11 : i64} {
  func.func @_matmul_bias_kernel(%arg0: i32, %arg1: i32, %arg2: i32, %arg3: memref<16x32xbf16, #tpu.memory_space<vmem>>, %arg4: memref<32x32xbf16, #tpu.memory_space<vmem>>, %arg5: memref<1x32xf32, #tpu.memory_space<vmem>>, %arg6: memref<16x32xf32, #tpu.memory_space<vmem>>, %arg7: memref<16x32xf32, #tpu.memory_space<vmem>>) attributes {dimension_semantics = [#tpu.dimension_semantics<parallel>, #tpu.dimension_semantics<parallel>, #tpu.dimension_semantics<arbitrary>], iteration_bounds = array<i64: 1, 1, 1>, scalar_prefetch = 0 : i64, scratch_operands = 1 : i64, tpu.core_type = #tpu.core_type<tc>, window_params = [{transform_indices = @transform_0, window_bounds = array<i64: 16, 32>}, {transform_indices = @transform_1, window_bounds = array<i64: 32, 32>}, {transform_indices = @transform_2, window_bounds = array<i64: 1, 32>}, {transform_indices = @transform_3, window_bounds = array<i64: 16, 32>}]} {
    %c0_i32 = arith.constant 0 : i32
    %0 = arith.cmpi eq, %arg2, %c0_i32 : i32
    %1 = arith.extui %0 : i1 to i32
    %c0_i32_0 = arith.constant 0 : i32
    %2 = arith.cmpi ne, %1, %c0_i32_0 : i32
    scf.if %2 {
      %cst_10 = arith.constant 0.000000e+00 : f32
      %12 = vector.broadcast %cst_10 : f32 to vector<16x32xf32>
      %c0_11 = arith.constant 0 : index
      %c0_12 = arith.constant 0 : index
      %13 = vector.load %arg7[%c0_11, %c0_12] : memref<16x32xf32, #tpu.memory_space<vmem>>, vector<16x32xf32>
      tpu.vector_store %arg7[%c0_11, %c0_12], %12 {strides = array<i32>} : memref<16x32xf32, #tpu.memory_space<vmem>>, vector<16x32xf32>,
    } else {
    }
    %c0 = arith.constant 0 : index
    %c0_1 = arith.constant 0 : index
    %3 = vector.load %arg7[%c0, %c0_1] : memref<16x32xf32, #tpu.memory_space<vmem>>, vector<16x32xf32>
    %c0_2 = arith.constant 0 : index
    %c0_3 = arith.constant 0 : index
    %4 = vector.load %arg3[%c0_2, %c0_3] : memref<16x32xbf16, #tpu.memory_space<vmem>>, vector<16x32xbf16>
    %c0_4 = arith.constant 0 : index
    %c0_5 = arith.constant 0 : index
    %5 = vector.load %arg4[%c0_4, %c0_5] : memref<32x32xbf16, #tpu.memory_space<vmem>>, vector<32x32xbf16>
    %cst = arith.constant dense<0.000000e+00> : vector<16x32xf32>
    %6 = tpu.matmul %4, %5, %cst {dimension_numbers = #tpu.dot_dimension_numbers<[1], [0], [0], [1], [0, 0, 1, 1], [], []>} : vector<16x32xbf16>, vector<32x32xbf16>, vector<16x32xf32> -> vector<16x32xf32>
    %7 = arith.addf %3, %6 : vector<16x32xf32>
    %c0_6 = arith.constant 0 : index
    %c0_7 = arith.constant 0 : index
    %8 = vector.load %arg7[%c0_6, %c0_7] : memref<16x32xf32, #tpu.memory_space<vmem>>, vector<16x32xf32>
    tpu.vector_store %arg7[%c0_6, %c0_7], %7 {strides = array<i32>} : memref<16x32xf32, #tpu.memory_space<vmem>>, vector<16x32xf32>,
    %c0_i32_8 = arith.constant 0 : i32
    %9 = arith.cmpi eq, %arg2, %c0_i32_8 : i32
    %10 = arith.extui %9 : i1 to i32
    %c0_i32_9 = arith.constant 0 : i32
    %11 = arith.cmpi ne, %10, %c0_i32_9 : i32
    scf.if %11 {
      %c0_10 = arith.constant 0 : index
      %c0_11 = arith.constant 0 : index
      %12 = vector.load %arg7[%c0_10, %c0_11] : memref<16x32xf32, #tpu.memory_space<vmem>>, vector<16x32xf32>
      %c0_12 = arith.constant 0 : index
      %c0_13 = arith.constant 0 : index
      %13 = vector.load %arg5[%c0_12, %c0_13] : memref<1x32xf32, #tpu.memory_space<vmem>>, vector<1x32xf32>
      %14 = vector.broadcast %13 : vector<1x32xf32> to vector<16x32xf32>
      %15 = arith.addf %12, %14 : vector<16x32xf32>
      %cst_14 = arith.constant 0.000000e+00 : f32
      %16 = vector.broadcast %cst_14 : f32 to vector<16x32xf32>
      %17 = arith.maximumf %15, %16 : vector<16x32xf32>
      %c0_15 = arith.constant 0 : index
      %c0_16 = arith.constant 0 : index
      %18 = vector.load %arg6[%c0_15, %c0_16] : memref<16x32xf32, #tpu.memory_space<vmem>>, vector<16x32xf32>
      tpu.vector_store %arg6[%c0_15, %c0_16], %17 {strides = array<i32>} : memref<16x32xf32, #tpu.memory_space<vmem>>, vector<16x32xf32>,
    } else {
    }
    return
  }
  func.func @transform_0(%arg0: i32, %arg1: i32, %arg2: i32) -> (i32, i32) {
    %c0_i32 = arith.constant 0 : i32
    return %arg0, %arg2 : i32, i32
  }
  func.func @transform_1(%arg0: i32, %arg1: i32, %arg2: i32) -> (i32, i32) {
    %c0_i32 = arith.constant 0 : i32
    return %arg2, %arg1 : i32, i32
  }
  func.func @transform_2(%arg0: i32, %arg1: i32, %arg2: i32) -> (i32, i32) {
    %c0_i32 = arith.constant 0 : i32
    %c0_i32_0 = arith.constant 0 : i32
    return %c0_i32, %arg1 : i32, i32
  }
  func.func @transform_3(%arg0: i32, %arg1: i32, %arg2: i32) -> (i32, i32) {
    %c0_i32 = arith.constant 0 : i32
    return %arg0, %arg1 : i32, i32
  }
}

module attributes {stable_mosaic.version = 11 : i64} {
  func.func @_contrastive_kernel(%arg0: i32, %arg1: memref<1x8x32xf32, #tpu.memory_space<vmem>>, %arg2: memref<1x8x32xf32, #tpu.memory_space<vmem>>, %arg3: memref<1x8x1xf32, #tpu.memory_space<vmem>>, %arg4: memref<1x8x32xf32, #tpu.memory_space<vmem>>, %arg5: memref<1x8x32xf32, #tpu.memory_space<vmem>>, %arg6: memref<1x2xf32, #tpu.memory_space<vmem>>) attributes {dimension_semantics = [#tpu.dimension_semantics<arbitrary>], iteration_bounds = array<i64: 2>, scalar_prefetch = 0 : i64, scratch_operands = 0 : i64, tpu.core_type = #tpu.core_type<tc>, window_params = [{transform_indices = @transform_0, window_bounds = array<i64: 1, 8, 32>}, {transform_indices = @transform_1, window_bounds = array<i64: 1, 8, 32>}, {transform_indices = @transform_2, window_bounds = array<i64: 1, 8, 1>}, {transform_indices = @transform_3, window_bounds = array<i64: 1, 8, 32>}, {transform_indices = @transform_4, window_bounds = array<i64: 1, 8, 32>}, {pipeline_mode = #tpu.pipeline_mode<synchronous>, transform_indices = @transform_5, window_bounds = array<i64: 1, 2>}]} {
    %c0_i32 = arith.constant 0 : i32
    %0 = arith.cmpi eq, %arg0, %c0_i32 : i32
    %1 = arith.extui %0 : i1 to i32
    %c0_i32_0 = arith.constant 0 : i32
    %2 = arith.cmpi ne, %1, %c0_i32_0 : i32
    scf.if %2 {
      %cst_32 = arith.constant 0.000000e+00 : f32
      %68 = vector.broadcast %cst_32 : f32 to vector<1x2xf32>
      %c0_33 = arith.constant 0 : index
      %c0_34 = arith.constant 0 : index
      %69 = vector.load %arg6[%c0_33, %c0_34] : memref<1x2xf32, #tpu.memory_space<vmem>>, vector<1x2xf32>
      tpu.vector_store %arg6[%c0_33, %c0_34], %68 {strides = array<i32>} : memref<1x2xf32, #tpu.memory_space<vmem>>, vector<1x2xf32>,
    } else {
    }
    %c0 = arith.constant 0 : index
    %c0_1 = arith.constant 0 : index
    %c0_2 = arith.constant 0 : index
    %3 = vector.load %arg1[%c0, %c0_1, %c0_2] : memref<1x8x32xf32, #tpu.memory_space<vmem>>, vector<1x8x32xf32>
    %4 = vector.shape_cast %3 : vector<1x8x32xf32> to vector<8x32xf32>
    %c0_3 = arith.constant 0 : index
    %c0_4 = arith.constant 0 : index
    %c0_5 = arith.constant 0 : index
    %5 = vector.load %arg2[%c0_3, %c0_4, %c0_5] : memref<1x8x32xf32, #tpu.memory_space<vmem>>, vector<1x8x32xf32>
    %6 = vector.shape_cast %5 : vector<1x8x32xf32> to vector<8x32xf32>
    %c0_6 = arith.constant 0 : index
    %c0_7 = arith.constant 0 : index
    %c0_8 = arith.constant 0 : index
    %7 = vector.load %arg3[%c0_6, %c0_7, %c0_8] : memref<1x8x1xf32, #tpu.memory_space<vmem>>, vector<1x8x1xf32>
    %8 = vector.shape_cast %7 : vector<1x8x1xf32> to vector<8x1xf32>
    %9 = arith.mulf %4, %4 : vector<8x32xf32>
    %cst = arith.constant dense<0.000000e+00> : vector<8xf32>
    %10 = vector.multi_reduction <add>, %9, %cst [1] : vector<8x32xf32> to vector<8xf32>
    %11 = vector.shape_cast %10 : vector<8xf32> to vector<8x1xf32>
    %cst_9 = arith.constant 1.000000e-24 : f32
    %12 = vector.broadcast %cst_9 : f32 to vector<8x1xf32>
    %13 = arith.addf %11, %12 : vector<8x1xf32>
    %14 = math.rsqrt %13 : vector<8x1xf32>
    %15 = vector.broadcast %14 : vector<8x1xf32> to vector<8x32xf32>
    %16 = arith.mulf %4, %15 : vector<8x32xf32>
    %17 = arith.mulf %6, %6 : vector<8x32xf32>
    %cst_10 = arith.constant dense<0.000000e+00> : vector<8xf32>
    %18 = vector.multi_reduction <add>, %17, %cst_10 [1] : vector<8x32xf32> to vector<8xf32>
    %19 = vector.shape_cast %18 : vector<8xf32> to vector<8x1xf32>
    %cst_11 = arith.constant 1.000000e-24 : f32
    %20 = vector.broadcast %cst_11 : f32 to vector<8x1xf32>
    %21 = arith.addf %19, %20 : vector<8x1xf32>
    %22 = math.rsqrt %21 : vector<8x1xf32>
    %23 = vector.broadcast %22 : vector<8x1xf32> to vector<8x32xf32>
    %24 = arith.mulf %6, %23 : vector<8x32xf32>
    %c0_12 = arith.constant 0 : index
    %c0_13 = arith.constant 0 : index
    %c0_14 = arith.constant 0 : index
    %25 = vector.load %arg4[%c0_12, %c0_13, %c0_14] : memref<1x8x32xf32, #tpu.memory_space<vmem>>, vector<1x8x32xf32>
    %26 = vector.shape_cast %25 : vector<1x8x32xf32> to vector<8x32xf32>
    %27 = vector.shape_cast %16 : vector<8x32xf32> to vector<1x8x32xf32>
    tpu.vector_store %arg4[%c0_12, %c0_13, %c0_14], %27 {strides = array<i32>} : memref<1x8x32xf32, #tpu.memory_space<vmem>>, vector<1x8x32xf32>,
    %c0_15 = arith.constant 0 : index
    %c0_16 = arith.constant 0 : index
    %c0_17 = arith.constant 0 : index
    %28 = vector.load %arg5[%c0_15, %c0_16, %c0_17] : memref<1x8x32xf32, #tpu.memory_space<vmem>>, vector<1x8x32xf32>
    %29 = vector.shape_cast %28 : vector<1x8x32xf32> to vector<8x32xf32>
    %30 = vector.shape_cast %24 : vector<8x32xf32> to vector<1x8x32xf32>
    tpu.vector_store %arg5[%c0_15, %c0_16, %c0_17], %30 {strides = array<i32>} : memref<1x8x32xf32, #tpu.memory_space<vmem>>, vector<1x8x32xf32>,
    %cst_18 = arith.constant dense<0.000000e+00> : vector<8x8xf32>
    %31 = tpu.matmul %16, %24, %cst_18 {dimension_numbers = #tpu.dot_dimension_numbers<[1], [1], [0], [0], [0, 0, 1, 0], [], []>} : vector<8x32xf32>, vector<8x32xf32>, vector<8x8xf32> -> vector<8x8xf32>
    %cst_19 = arith.constant 1.000000e+02 : f32
    %32 = vector.broadcast %cst_19 : f32 to vector<8x8xf32>
    %33 = arith.mulf %31, %32 : vector<8x8xf32>
    %cst_20 = arith.constant dense<0xFF800000> : vector<8xf32>
    %34 = vector.multi_reduction <maximumf>, %33, %cst_20 [1] : vector<8x8xf32> to vector<8xf32>
    %35 = vector.shape_cast %34 : vector<8xf32> to vector<8x1xf32>
    %36 = vector.broadcast %35 : vector<8x1xf32> to vector<8x8xf32>
    %37 = arith.subf %33, %36 : vector<8x8xf32>
    %38 = math.exp %37 : vector<8x8xf32>
    %cst_21 = arith.constant dense<0.000000e+00> : vector<8xf32>
    %39 = vector.multi_reduction <add>, %38, %cst_21 [1] : vector<8x8xf32> to vector<8xf32>
    %40 = vector.shape_cast %39 : vector<8xf32> to vector<8x1xf32>
    %41 = math.log %40 : vector<8x1xf32>
    %42 = arith.addf %35, %41 : vector<8x1xf32>
    %43 = tpu.iota {dimensions = array<i32: 0>} : vector<8x8xi32>
    %44 = tpu.iota {dimensions = array<i32: 1>} : vector<8x8xi32>
    %45 = arith.cmpi eq, %43, %44 : vector<8x8xi32>
    %cst_22 = arith.constant 0.000000e+00 : f32
    %46 = vector.broadcast %cst_22 : f32 to vector<8x8xf32>
    %47 = arith.select %45, %33, %46 : vector<8x8xi1>, vector<8x8xf32>
    %cst_23 = arith.constant dense<0.000000e+00> : vector<8xf32>
    %48 = vector.multi_reduction <add>, %47, %cst_23 [1] : vector<8x8xf32> to vector<8xf32>
    %49 = vector.shape_cast %48 : vector<8xf32> to vector<8x1xf32>
    %50 = arith.subf %42, %49 : vector<8x1xf32>
    %51 = arith.cmpf oge, %49, %35 : vector<8x1xf32>
    %52 = arith.extui %51 : vector<8x1xi1> to vector<8x1xi32>
    %53 = arith.sitofp %52 : vector<8x1xi32> to vector<8x1xf32>
    %54 = arith.mulf %50, %8 : vector<8x1xf32>
    %cst_24 = arith.constant dense<0.000000e+00> : vector<8xf32>
    %55 = vector.multi_reduction <add>, %54, %cst_24 [1] : vector<8x1xf32> to vector<8xf32>
    %56 = vector.shape_cast %55 : vector<8xf32> to vector<8x1xf32>
    %cst_25 = arith.constant dense<0.000000e+00> : vector<1xf32>
    %57 = vector.multi_reduction <add>, %56, %cst_25 [0] : vector<8x1xf32> to vector<1xf32>
    %58 = vector.shape_cast %57 : vector<1xf32> to vector<1x1xf32>
    %59 = arith.mulf %53, %8 : vector<8x1xf32>
    %cst_26 = arith.constant dense<0.000000e+00> : vector<8xf32>
    %60 = vector.multi_reduction <add>, %59, %cst_26 [1] : vector<8x1xf32> to vector<8xf32>
    %61 = vector.shape_cast %60 : vector<8xf32> to vector<8x1xf32>
    %cst_27 = arith.constant dense<0.000000e+00> : vector<1xf32>
    %62 = vector.multi_reduction <add>, %61, %cst_27 [0] : vector<8x1xf32> to vector<1xf32>
    %63 = vector.shape_cast %62 : vector<1xf32> to vector<1x1xf32>
    %c0_28 = arith.constant 0 : index
    %c0_29 = arith.constant 0 : index
    %64 = vector.load %arg6[%c0_28, %c0_29] : memref<1x2xf32, #tpu.memory_space<vmem>>, vector<1x2xf32>
    %65 = tpu.concatenate %58, %63 in 1 : vector<1x1xf32>, vector<1x1xf32> -> vector<1x2xf32>
    %66 = arith.addf %64, %65 : vector<1x2xf32>
    %c0_30 = arith.constant 0 : index
    %c0_31 = arith.constant 0 : index
    %67 = vector.load %arg6[%c0_30, %c0_31] : memref<1x2xf32, #tpu.memory_space<vmem>>, vector<1x2xf32>
    tpu.vector_store %arg6[%c0_30, %c0_31], %66 {strides = array<i32>} : memref<1x2xf32, #tpu.memory_space<vmem>>, vector<1x2xf32>,
    return
  }
  func.func @transform_0(%arg0: i32) -> (i32, i32, i32) {
    %c0_i32 = arith.constant 0 : i32
    %c0_i32_0 = arith.constant 0 : i32
    %c0_i32_1 = arith.constant 0 : i32
    return %arg0, %c0_i32, %c0_i32_0 : i32, i32, i32
  }
  func.func @transform_1(%arg0: i32) -> (i32, i32, i32) {
    %c0_i32 = arith.constant 0 : i32
    %c0_i32_0 = arith.constant 0 : i32
    %c0_i32_1 = arith.constant 0 : i32
    return %arg0, %c0_i32, %c0_i32_0 : i32, i32, i32
  }
  func.func @transform_2(%arg0: i32) -> (i32, i32, i32) {
    %c0_i32 = arith.constant 0 : i32
    %c0_i32_0 = arith.constant 0 : i32
    %c0_i32_1 = arith.constant 0 : i32
    return %arg0, %c0_i32, %c0_i32_0 : i32, i32, i32
  }
  func.func @transform_3(%arg0: i32) -> (i32, i32, i32) {
    %c0_i32 = arith.constant 0 : i32
    %c0_i32_0 = arith.constant 0 : i32
    %c0_i32_1 = arith.constant 0 : i32
    return %arg0, %c0_i32, %c0_i32_0 : i32, i32, i32
  }
  func.func @transform_4(%arg0: i32) -> (i32, i32, i32) {
    %c0_i32 = arith.constant 0 : i32
    %c0_i32_0 = arith.constant 0 : i32
    %c0_i32_1 = arith.constant 0 : i32
    return %arg0, %c0_i32, %c0_i32_0 : i32, i32, i32
  }
  func.func @transform_5(%arg0: i32) -> (i32, i32) {
    %c0_i32 = arith.constant 0 : i32
    %c0_i32_0 = arith.constant 0 : i32
    %c0_i32_1 = arith.constant 0 : i32
    return %c0_i32, %c0_i32_0 : i32, i32
  }
}

module attributes {stable_mosaic.version = 11 : i64} {
  func.func @_linear_ln_kernel(%arg0: i32, %arg1: i32, %arg2: memref<16x32xbf16, #tpu.memory_space<vmem>>, %arg3: memref<32x32xbf16, #tpu.memory_space<vmem>>, %arg4: memref<1x32xf32, #tpu.memory_space<vmem>>, %arg5: memref<1x32xf32, #tpu.memory_space<vmem>>, %arg6: memref<1x32xf32, #tpu.memory_space<vmem>>, %arg7: memref<16x32xbf16, #tpu.memory_space<vmem>>, %arg8: memref<16x32xf32, #tpu.memory_space<vmem>>) attributes {dimension_semantics = [#tpu.dimension_semantics<parallel>, #tpu.dimension_semantics<arbitrary>], iteration_bounds = array<i64: 1, 1>, scalar_prefetch = 0 : i64, scratch_operands = 1 : i64, tpu.core_type = #tpu.core_type<tc>, window_params = [{transform_indices = @transform_0, window_bounds = array<i64: 16, 32>}, {transform_indices = @transform_1, window_bounds = array<i64: 32, 32>}, {pipeline_mode = #tpu.pipeline_mode<synchronous>, transform_indices = @transform_2, window_bounds = array<i64: 1, 32>}, {pipeline_mode = #tpu.pipeline_mode<synchronous>, transform_indices = @transform_3, window_bounds = array<i64: 1, 32>}, {pipeline_mode = #tpu.pipeline_mode<synchronous>, transform_indices = @transform_4, window_bounds = array<i64: 1, 32>}, {transform_indices = @transform_5, window_bounds = array<i64: 16, 32>}]} {
    %c0_i32 = arith.constant 0 : i32
    %0 = arith.cmpi eq, %arg1, %c0_i32 : i32
    %1 = arith.extui %0 : i1 to i32
    %c0_i32_0 = arith.constant 0 : i32
    %2 = arith.cmpi ne, %1, %c0_i32_0 : i32
    scf.if %2 {
      %cst_10 = arith.constant 0.000000e+00 : f32
      %12 = vector.broadcast %cst_10 : f32 to vector<16x32xf32>
      %c0_11 = arith.constant 0 : index
      %c0_12 = arith.constant 0 : index
      %13 = vector.load %arg8[%c0_11, %c0_12] : memref<16x32xf32, #tpu.memory_space<vmem>>, vector<16x32xf32>
      tpu.vector_store %arg8[%c0_11, %c0_12], %12 {strides = array<i32>} : memref<16x32xf32, #tpu.memory_space<vmem>>, vector<16x32xf32>,
    } else {
    }
    %c0 = arith.constant 0 : index
    %c0_1 = arith.constant 0 : index
    %3 = vector.load %arg8[%c0, %c0_1] : memref<16x32xf32, #tpu.memory_space<vmem>>, vector<16x32xf32>
    %c0_2 = arith.constant 0 : index
    %c0_3 = arith.constant 0 : index
    %4 = vector.load %arg2[%c0_2, %c0_3] : memref<16x32xbf16, #tpu.memory_space<vmem>>, vector<16x32xbf16>
    %c0_4 = arith.constant 0 : index
    %c0_5 = arith.constant 0 : index
    %5 = vector.load %arg3[%c0_4, %c0_5] : memref<32x32xbf16, #tpu.memory_space<vmem>>, vector<32x32xbf16>
    %cst = arith.constant dense<0.000000e+00> : vector<16x32xf32>
    %6 = tpu.matmul %4, %5, %cst {dimension_numbers = #tpu.dot_dimension_numbers<[1], [0], [0], [1], [0, 0, 1, 1], [], []>} : vector<16x32xbf16>, vector<32x32xbf16>, vector<16x32xf32> -> vector<16x32xf32>
    %7 = arith.addf %3, %6 : vector<16x32xf32>
    %c0_6 = arith.constant 0 : index
    %c0_7 = arith.constant 0 : index
    %8 = vector.load %arg8[%c0_6, %c0_7] : memref<16x32xf32, #tpu.memory_space<vmem>>, vector<16x32xf32>
    tpu.vector_store %arg8[%c0_6, %c0_7], %7 {strides = array<i32>} : memref<16x32xf32, #tpu.memory_space<vmem>>, vector<16x32xf32>,
    %c0_i32_8 = arith.constant 0 : i32
    %9 = arith.cmpi eq, %arg1, %c0_i32_8 : i32
    %10 = arith.extui %9 : i1 to i32
    %c0_i32_9 = arith.constant 0 : i32
    %11 = arith.cmpi ne, %10, %c0_i32_9 : i32
    scf.if %11 {
      %c0_10 = arith.constant 0 : index
      %c0_11 = arith.constant 0 : index
      %12 = vector.load %arg8[%c0_10, %c0_11] : memref<16x32xf32, #tpu.memory_space<vmem>>, vector<16x32xf32>
      %c0_12 = arith.constant 0 : index
      %c0_13 = arith.constant 0 : index
      %13 = vector.load %arg4[%c0_12, %c0_13] : memref<1x32xf32, #tpu.memory_space<vmem>>, vector<1x32xf32>
      %14 = vector.broadcast %13 : vector<1x32xf32> to vector<16x32xf32>
      %15 = arith.addf %12, %14 : vector<16x32xf32>
      %cst_14 = arith.constant 5.000000e-01 : f32
      %16 = vector.broadcast %cst_14 : f32 to vector<16x32xf32>
      %17 = arith.mulf %16, %15 : vector<16x32xf32>
      %cst_15 = arith.constant 4.471500e-02 : f32
      %18 = vector.broadcast %cst_15 : f32 to vector<16x32xf32>
      %19 = arith.mulf %18, %15 : vector<16x32xf32>
      %20 = arith.mulf %19, %15 : vector<16x32xf32>
      %21 = arith.mulf %20, %15 : vector<16x32xf32>
      %22 = arith.addf %15, %21 : vector<16x32xf32>
      %cst_16 = arith.constant 0.797884583 : f32
      %23 = vector.broadcast %cst_16 : f32 to vector<16x32xf32>
      %24 = arith.mulf %23, %22 : vector<16x32xf32>
      %25 = math.tanh %24 : vector<16x32xf32>
      %cst_17 = arith.constant 1.000000e+00 : f32
      %26 = vector.broadcast %cst_17 : f32 to vector<16x32xf32>
      %27 = arith.addf %26, %25 : vector<16x32xf32>
      %28 = arith.mulf %17, %27 : vector<16x32xf32>
      %cst_18 = arith.constant dense<0.000000e+00> : vector<16xf32>
      %29 = vector.multi_reduction <add>, %28, %cst_18 [1] : vector<16x32xf32> to vector<16xf32>
      %30 = vector.shape_cast %29 : vector<16xf32> to vector<16x1xf32>
      %cst_19 = arith.constant 3.200000e+01 : f32
      %31 = vector.broadcast %cst_19 : f32 to vector<16x1xf32>
      %32 = arith.divf %30, %31 : vector<16x1xf32>
      %33 = vector.broadcast %32 : vector<16x1xf32> to vector<16x32xf32>
      %34 = arith.subf %28, %33 : vector<16x32xf32>
      %35 = arith.mulf %34, %34 : vector<16x32xf32>
      %cst_20 = arith.constant dense<0.000000e+00> : vector<16xf32>
      %36 = vector.multi_reduction <add>, %35, %cst_20 [1] : vector<16x32xf32> to vector<16xf32>
      %37 = vector.shape_cast %36 : vector<16xf32> to vector<16x1xf32>
      %cst_21 = arith.constant 3.200000e+01 : f32
      %38 = vector.broadcast %cst_21 : f32 to vector<16x1xf32>
      %39 = arith.divf %37, %38 : vector<16x1xf32>
      %40 = vector.broadcast %32 : vector<16x1xf32> to vector<16x32xf32>
      %41 = arith.subf %28, %40 : vector<16x32xf32>
      %cst_22 = arith.constant 9.99999996E-13 : f32
      %42 = vector.broadcast %cst_22 : f32 to vector<16x1xf32>
      %43 = arith.addf %39, %42 : vector<16x1xf32>
      %44 = math.rsqrt %43 : vector<16x1xf32>
      %45 = vector.broadcast %44 : vector<16x1xf32> to vector<16x32xf32>
      %46 = arith.mulf %41, %45 : vector<16x32xf32>
      %c0_23 = arith.constant 0 : index
      %c0_24 = arith.constant 0 : index
      %47 = vector.load %arg5[%c0_23, %c0_24] : memref<1x32xf32, #tpu.memory_space<vmem>>, vector<1x32xf32>
      %48 = vector.broadcast %47 : vector<1x32xf32> to vector<16x32xf32>
      %49 = arith.mulf %46, %48 : vector<16x32xf32>
      %c0_25 = arith.constant 0 : index
      %c0_26 = arith.constant 0 : index
      %50 = vector.load %arg6[%c0_25, %c0_26] : memref<1x32xf32, #tpu.memory_space<vmem>>, vector<1x32xf32>
      %51 = vector.broadcast %50 : vector<1x32xf32> to vector<16x32xf32>
      %52 = arith.addf %49, %51 : vector<16x32xf32>
      %53 = arith.truncf %52 : vector<16x32xf32> to vector<16x32xbf16>
      %c0_27 = arith.constant 0 : index
      %c0_28 = arith.constant 0 : index
      %54 = vector.load %arg7[%c0_27, %c0_28] : memref<16x32xbf16, #tpu.memory_space<vmem>>, vector<16x32xbf16>
      tpu.vector_store %arg7[%c0_27, %c0_28], %53 {strides = array<i32>} : memref<16x32xbf16, #tpu.memory_space<vmem>>, vector<16x32xbf16>,
    } else {
    }
    return
  }
  func.func @transform_0(%arg0: i32, %arg1: i32) -> (i32, i32) {
    %c0_i32 = arith.constant 0 : i32
    return %arg0, %arg1 : i32, i32
  }
  func.func @transform_1(%arg0: i32, %arg1: i32) -> (i32, i32) {
    %c0_i32 = arith.constant 0 : i32
    %c0_i32_0 = arith.constant 0 : i32
    return %arg1, %c0_i32 : i32, i32
  }
  func.func @transform_2(%arg0: i32, %arg1: i32) -> (i32, i32) {
    %c0_i32 = arith.constant 0 : i32
    %c0_i32_0 = arith.constant 0 : i32
    %c0_i32_1 = arith.constant 0 : i32
    return %c0_i32, %c0_i32_0 : i32, i32
  }
  func.func @transform_3(%arg0: i32, %arg1: i32) -> (i32, i32) {
    %c0_i32 = arith.constant 0 : i32
    %c0_i32_0 = arith.constant 0 : i32
    %c0_i32_1 = arith.constant 0 : i32
    return %c0_i32, %c0_i32_0 : i32, i32
  }
  func.func @transform_4(%arg0: i32, %arg1: i32) -> (i32, i32) {
    %c0_i32 = arith.constant 0 : i32
    %c0_i32_0 = arith.constant 0 : i32
    %c0_i32_1 = arith.constant 0 : i32
    return %c0_i32, %c0_i32_0 : i32, i32
  }
  func.func @transform_5(%arg0: i32, %arg1: i32) -> (i32, i32) {
    %c0_i32 = arith.constant 0 : i32
    %c0_i32_0 = arith.constant 0 : i32
    return %arg0, %c0_i32 : i32, i32
  }
}

module attributes {stable_mosaic.version = 11 : i64} {
  func.func @_matmul_bias_kernel(%arg0: i32, %arg1: i32, %arg2: i32, %arg3: memref<16x32xbf16, #tpu.memory_space<vmem>>, %arg4: memref<32x64xbf16, #tpu.memory_space<vmem>>, %arg5: memref<1x64xf32, #tpu.memory_space<vmem>>, %arg6: memref<16x64xf32, #tpu.memory_space<vmem>>, %arg7: memref<16x64xf32, #tpu.memory_space<vmem>>) attributes {dimension_semantics = [#tpu.dimension_semantics<parallel>, #tpu.dimension_semantics<parallel>, #tpu.dimension_semantics<arbitrary>], iteration_bounds = array<i64: 1, 1, 1>, scalar_prefetch = 0 : i64, scratch_operands = 1 : i64, tpu.core_type = #tpu.core_type<tc>, window_params = [{transform_indices = @transform_0, window_bounds = array<i64: 16, 32>}, {transform_indices = @transform_1, window_bounds = array<i64: 32, 64>}, {transform_indices = @transform_2, window_bounds = array<i64: 1, 64>}, {transform_indices = @transform_3, window_bounds = array<i64: 16, 64>}]} {
    %c0_i32 = arith.constant 0 : i32
    %0 = arith.cmpi eq, %arg2, %c0_i32 : i32
    %1 = arith.extui %0 : i1 to i32
    %c0_i32_0 = arith.constant 0 : i32
    %2 = arith.cmpi ne, %1, %c0_i32_0 : i32
    scf.if %2 {
      %cst_10 = arith.constant 0.000000e+00 : f32
      %12 = vector.broadcast %cst_10 : f32 to vector<16x64xf32>
      %c0_11 = arith.constant 0 : index
      %c0_12 = arith.constant 0 : index
      %13 = vector.load %arg7[%c0_11, %c0_12] : memref<16x64xf32, #tpu.memory_space<vmem>>, vector<16x64xf32>
      tpu.vector_store %arg7[%c0_11, %c0_12], %12 {strides = array<i32>} : memref<16x64xf32, #tpu.memory_space<vmem>>, vector<16x64xf32>,
    } else {
    }
    %c0 = arith.constant 0 : index
    %c0_1 = arith.constant 0 : index
    %3 = vector.load %arg7[%c0, %c0_1] : memref<16x64xf32, #tpu.memory_space<vmem>>, vector<16x64xf32>
    %c0_2 = arith.constant 0 : index
    %c0_3 = arith.constant 0 : index
    %4 = vector.load %arg3[%c0_2, %c0_3] : memref<16x32xbf16, #tpu.memory_space<vmem>>, vector<16x32xbf16>
    %c0_4 = arith.constant 0 : index
    %c0_5 = arith.constant 0 : index
    %5 = vector.load %arg4[%c0_4, %c0_5] : memref<32x64xbf16, #tpu.memory_space<vmem>>, vector<32x64xbf16>
    %cst = arith.constant dense<0.000000e+00> : vector<16x64xf32>
    %6 = tpu.matmul %4, %5, %cst {dimension_numbers = #tpu.dot_dimension_numbers<[1], [0], [0], [1], [0, 0, 1, 1], [], []>} : vector<16x32xbf16>, vector<32x64xbf16>, vector<16x64xf32> -> vector<16x64xf32>
    %7 = arith.addf %3, %6 : vector<16x64xf32>
    %c0_6 = arith.constant 0 : index
    %c0_7 = arith.constant 0 : index
    %8 = vector.load %arg7[%c0_6, %c0_7] : memref<16x64xf32, #tpu.memory_space<vmem>>, vector<16x64xf32>
    tpu.vector_store %arg7[%c0_6, %c0_7], %7 {strides = array<i32>} : memref<16x64xf32, #tpu.memory_space<vmem>>, vector<16x64xf32>,
    %c0_i32_8 = arith.constant 0 : i32
    %9 = arith.cmpi eq, %arg2, %c0_i32_8 : i32
    %10 = arith.extui %9 : i1 to i32
    %c0_i32_9 = arith.constant 0 : i32
    %11 = arith.cmpi ne, %10, %c0_i32_9 : i32
    scf.if %11 {
      %c0_10 = arith.constant 0 : index
      %c0_11 = arith.constant 0 : index
      %12 = vector.load %arg7[%c0_10, %c0_11] : memref<16x64xf32, #tpu.memory_space<vmem>>, vector<16x64xf32>
      %c0_12 = arith.constant 0 : index
      %c0_13 = arith.constant 0 : index
      %13 = vector.load %arg5[%c0_12, %c0_13] : memref<1x64xf32, #tpu.memory_space<vmem>>, vector<1x64xf32>
      %14 = vector.broadcast %13 : vector<1x64xf32> to vector<16x64xf32>
      %15 = arith.addf %12, %14 : vector<16x64xf32>
      %c0_14 = arith.constant 0 : index
      %c0_15 = arith.constant 0 : index
      %16 = vector.load %arg6[%c0_14, %c0_15] : memref<16x64xf32, #tpu.memory_space<vmem>>, vector<16x64xf32>
      tpu.vector_store %arg6[%c0_14, %c0_15], %15 {strides = array<i32>} : memref<16x64xf32, #tpu.memory_space<vmem>>, vector<16x64xf32>,
    } else {
    }
    return
  }
  func.func @transform_0(%arg0: i32, %arg1: i32, %arg2: i32) -> (i32, i32) {
    %c0_i32 = arith.constant 0 : i32
    return %arg0, %arg2 : i32, i32
  }
  func.func @transform_1(%arg0: i32, %arg1: i32, %arg2: i32) -> (i32, i32) {
    %c0_i32 = arith.constant 0 : i32
    return %arg2, %arg1 : i32, i32
  }
  func.func @transform_2(%arg0: i32, %arg1: i32, %arg2: i32) -> (i32, i32) {
    %c0_i32 = arith.constant 0 : i32
    %c0_i32_0 = arith.constant 0 : i32
    return %c0_i32, %arg1 : i32, i32
  }
  func.func @transform_3(%arg0: i32, %arg1: i32, %arg2: i32) -> (i32, i32) {
    %c0_i32 = arith.constant 0 : i32
    return %arg0, %arg1 : i32, i32
  }
}

module attributes {stable_mosaic.version = 11 : i64} {
  func.func @_token_nll_kernel(%arg0: i32, %arg1: i32, %arg2: memref<16x64xf32, #tpu.memory_space<vmem>>, %arg3: memref<16x1xi32, #tpu.memory_space<vmem>>, %arg4: memref<16x1xf32, #tpu.memory_space<vmem>>, %arg5: memref<1x2xf32, #tpu.memory_space<vmem>>, %arg6: memref<16x1xf32, #tpu.memory_space<vmem>>, %arg7: memref<16x1xf32, #tpu.memory_space<vmem>>, %arg8: memref<16x1xf32, #tpu.memory_space<vmem>>) attributes {dimension_semantics = [#tpu.dimension_semantics<arbitrary>, #tpu.dimension_semantics<arbitrary>], iteration_bounds = array<i64: 1, 1>, scalar_prefetch = 0 : i64, scratch_operands = 3 : i64, tpu.core_type = #tpu.core_type<tc>, window_params = [{transform_indices = @transform_0, window_bounds = array<i64: 16, 64>}, {transform_indices = @transform_1, window_bounds = array<i64: 16, 1>}, {transform_indices = @transform_2, window_bounds = array<i64: 16, 1>}, {pipeline_mode = #tpu.pipeline_mode<synchronous>, transform_indices = @transform_3, window_bounds = array<i64: 1, 2>}]} {
    %c0_i32 = arith.constant 0 : i32
    %0 = arith.cmpi eq, %arg0, %c0_i32 : i32
    %c0_i32_0 = arith.constant 0 : i32
    %1 = arith.cmpi eq, %arg1, %c0_i32_0 : i32
    %2 = arith.andi %0, %1 : i1
    %3 = arith.extui %2 : i1 to i32
    %c0_i32_1 = arith.constant 0 : i32
    %4 = arith.cmpi ne, %3, %c0_i32_1 : i32
    scf.if %4 {
      %cst_24 = arith.constant 0.000000e+00 : f32
      %42 = vector.broadcast %cst_24 : f32 to vector<1x2xf32>
      %c0_25 = arith.constant 0 : index
      %c0_26 = arith.constant 0 : index
      %43 = vector.load %arg5[%c0_25, %c0_26] : memref<1x2xf32, #tpu.memory_space<vmem>>, vector<1x2xf32>
      tpu.vector_store %arg5[%c0_25, %c0_26], %42 {strides = array<i32>} : memref<1x2xf32, #tpu.memory_space<vmem>>, vector<1x2xf32>,
    } else {
    }
    %c0_i32_2 = arith.constant 0 : i32
    %5 = arith.cmpi eq, %arg1, %c0_i32_2 : i32
    %6 = arith.extui %5 : i1 to i32
    %c0_i32_3 = arith.constant 0 : i32
    %7 = arith.cmpi ne, %6, %c0_i32_3 : i32
    scf.if %7 {
      %cst_24 = arith.constant 0xFF800000 : f32
      %42 = vector.broadcast %cst_24 : f32 to vector<16x1xf32>
      %c0_25 = arith.constant 0 : index
      %c0_26 = arith.constant 0 : index
      %43 = vector.load %arg6[%c0_25, %c0_26] : memref<16x1xf32, #tpu.memory_space<vmem>>, vector<16x1xf32>
      tpu.vector_store %arg6[%c0_25, %c0_26], %42 {strides = array<i32>} : memref<16x1xf32, #tpu.memory_space<vmem>>, vector<16x1xf32>,
      %cst_27 = arith.constant 0.000000e+00 : f32
      %44 = vector.broadcast %cst_27 : f32 to vector<16x1xf32>
      %c0_28 = arith.constant 0 : index
      %c0_29 = arith.constant 0 : index
      %45 = vector.load %arg7[%c0_28, %c0_29] : memref<16x1xf32, #tpu.memory_space<vmem>>, vector<16x1xf32>
      tpu.vector_store %arg7[%c0_28, %c0_29], %44 {strides = array<i32>} : memref<16x1xf32, #tpu.memory_space<vmem>>, vector<16x1xf32>,
      %cst_30 = arith.constant 0.000000e+00 : f32
      %46 = vector.broadcast %cst_30 : f32 to vector<16x1xf32>
      %c0_31 = arith.constant 0 : index
      %c0_32 = arith.constant 0 : index
      %47 = vector.load %arg8[%c0_31, %c0_32] : memref<16x1xf32, #tpu.memory_space<vmem>>, vector<16x1xf32>
      tpu.vector_store %arg8[%c0_31, %c0_32], %46 {strides = array<i32>} : memref<16x1xf32, #tpu.memory_space<vmem>>, vector<16x1xf32>,
    } else {
    }
    %c0 = arith.constant 0 : index
    %c0_4 = arith.constant 0 : index
    %8 = vector.load %arg2[%c0, %c0_4] : memref<16x64xf32, #tpu.memory_space<vmem>>, vector<16x64xf32>
    %c0_5 = arith.constant 0 : index
    %c0_6 = arith.constant 0 : index
    %9 = vector.load %arg3[%c0_5, %c0_6] : memref<16x1xi32, #tpu.memory_space<vmem>>, vector<16x1xi32>
    %c64_i32 = arith.constant 64 : i32
    %10 = arith.muli %arg1, %c64_i32 : i32
    %11 = tpu.iota {dimensions = array<i32: 1>} : vector<16x64xi32>
    %12 = vector.broadcast %10 : i32 to vector<16x64xi32>
    %13 = arith.addi %12, %11 : vector<16x64xi32>
    %c0_7 = arith.constant 0 : index
    %c0_8 = arith.constant 0 : index
    %14 = vector.load %arg6[%c0_7, %c0_8] : memref<16x1xf32, #tpu.memory_space<vmem>>, vector<16x1xf32>
    %cst = arith.constant dense<0xFF800000> : vector<16xf32>
    %15 = vector.multi_reduction <maximumf>, %8, %cst [1] : vector<16x64xf32> to vector<16xf32>
    %16 = vector.shape_cast %15 : vector<16xf32> to vector<16x1xf32>
    %17 = arith.maximumf %14, %16 : vector<16x1xf32>
    %18 = arith.subf %14, %17 : vector<16x1xf32>
    %19 = math.exp %18 : vector<16x1xf32>
    %c0_9 = arith.constant 0 : index
    %c0_10 = arith.constant 0 : index
    %20 = vector.load %arg7[%c0_9, %c0_10] : memref<16x1xf32, #tpu.memory_space<vmem>>, vector<16x1xf32>
    %21 = arith.mulf %19, %20 : vector<16x1xf32>
    %22 = vector.broadcast %17 : vector<16x1xf32> to vector<16x64xf32>
    %23 = arith.subf %8, %22 : vector<16x64xf32>
    %24 = math.exp %23 : vector<16x64xf32>
    %cst_11 = arith.constant dense<0.000000e+00> : vector<16xf32>
    %25 = vector.multi_reduction <add>, %24, %cst_11 [1] : vector<16x64xf32> to vector<16xf32>
    %26 = vector.shape_cast %25 : vector<16xf32> to vector<16x1xf32>
    %27 = arith.addf %21, %26 : vector<16x1xf32>
    %c0_12 = arith.constant 0 : index
    %c0_13 = arith.constant 0 : index
    %28 = vector.load %arg7[%c0_12, %c0_13] : memref<16x1xf32, #tpu.memory_space<vmem>>, vector<16x1xf32>
    tpu.vector_store %arg7[%c0_12, %c0_13], %27 {strides = array<i32>} : memref<16x1xf32, #tpu.memory_space<vmem>>, vector<16x1xf32>,
    %c0_14 = arith.constant 0 : index
    %c0_15 = arith.constant 0 : index
    %29 = vector.load %arg6[%c0_14, %c0_15] : memref<16x1xf32, #tpu.memory_space<vmem>>, vector<16x1xf32>
    tpu.vector_store %arg6[%c0_14, %c0_15], %17 {strides = array<i32>} : memref<16x1xf32, #tpu.memory_space<vmem>>, vector<16x1xf32>,
    %c0_16 = arith.constant 0 : index
    %c0_17 = arith.constant 0 : index
    %30 = vector.load %arg8[%c0_16, %c0_17] : memref<16x1xf32, #tpu.memory_space<vmem>>, vector<16x1xf32>
    %31 = vector.broadcast %9 : vector<16x1xi32> to vector<16x64xi32>
    %32 = arith.cmpi eq, %13, %31 : vector<16x64xi32>
    %cst_18 = arith.constant 0.000000e+00 : f32
    %33 = vector.broadcast %cst_18 : f32 to vector<16x64xf32>
    %34 = arith.select %32, %8, %33 : vector<16x64xi1>, vector<16x64xf32>
    %cst_19 = arith.constant dense<0.000000e+00> : vector<16xf32>
    %35 = vector.multi_reduction <add>, %34, %cst_19 [1] : vector<16x64xf32> to vector<16xf32>
    %36 = vector.shape_cast %35 : vector<16xf32> to vector<16x1xf32>
    %37 = arith.addf %30, %36 : vector<16x1xf32>
    %c0_20 = arith.constant 0 : index
    %c0_21 = arith.constant 0 : index
    %38 = vector.load %arg8[%c0_20, %c0_21] : memref<16x1xf32, #tpu.memory_space<vmem>>, vector<16x1xf32>
    tpu.vector_store %arg8[%c0_20, %c0_21], %37 {strides = array<i32>} : memref<16x1xf32, #tpu.memory_space<vmem>>, vector<16x1xf32>,
    %c0_i32_22 = arith.constant 0 : i32
    %39 = arith.cmpi eq, %arg1, %c0_i32_22 : i32
    %40 = arith.extui %39 : i1 to i32
    %c0_i32_23 = arith.constant 0 : i32
    %41 = arith.cmpi ne, %40, %c0_i32_23 : i32
    scf.if %41 {
      %c0_24 = arith.constant 0 : index
      %c0_25 = arith.constant 0 : index
      %42 = vector.load %arg6[%c0_24, %c0_25] : memref<16x1xf32, #tpu.memory_space<vmem>>, vector<16x1xf32>
      %c0_26 = arith.constant 0 : index
      %c0_27 = arith.constant 0 : index
      %43 = vector.load %arg7[%c0_26, %c0_27] : memref<16x1xf32, #tpu.memory_space<vmem>>, vector<16x1xf32>
      %44 = math.log %43 : vector<16x1xf32>
      %45 = arith.addf %42, %44 : vector<16x1xf32>
      %c0_28 = arith.constant 0 : index
      %c0_29 = arith.constant 0 : index
      %46 = vector.load %arg8[%c0_28, %c0_29] : memref<16x1xf32, #tpu.memory_space<vmem>>, vector<16x1xf32>
      %47 = arith.subf %45, %46 : vector<16x1xf32>
      %c0_30 = arith.constant 0 : index
      %c0_31 = arith.constant 0 : index
      %48 = vector.load %arg8[%c0_30, %c0_31] : memref<16x1xf32, #tpu.memory_space<vmem>>, vector<16x1xf32>
      %c0_32 = arith.constant 0 : index
      %c0_33 = arith.constant 0 : index
      %49 = vector.load %arg6[%c0_32, %c0_33] : memref<16x1xf32, #tpu.memory_space<vmem>>, vector<16x1xf32>
      %50 = arith.cmpf oge, %48, %49 : vector<16x1xf32>
      %51 = arith.extui %50 : vector<16x1xi1> to vector<16x1xi32>
      %52 = arith.sitofp %51 : vector<16x1xi32> to vector<16x1xf32>
      %c0_34 = arith.constant 0 : index
      %c0_35 = arith.constant 0 : index
      %53 = vector.load %arg4[%c0_34, %c0_35] : memref<16x1xf32, #tpu.memory_space<vmem>>, vector<16x1xf32>
      %54 = arith.mulf %47, %53 : vector<16x1xf32>
      %cst_36 = arith.constant dense<0.000000e+00> : vector<16xf32>
      %55 = vector.multi_reduction <add>, %54, %cst_36 [1] : vector<16x1xf32> to vector<16xf32>
      %56 = vector.shape_cast %55 : vector<16xf32> to vector<16x1xf32>
      %cst_37 = arith.constant dense<0.000000e+00> : vector<1xf32>
      %57 = vector.multi_reduction <add>, %56, %cst_37 [0] : vector<16x1xf32> to vector<1xf32>
      %58 = vector.shape_cast %57 : vector<1xf32> to vector<1x1xf32>
      %59 = arith.mulf %52, %53 : vector<16x1xf32>
      %cst_38 = arith.constant dense<0.000000e+00> : vector<16xf32>
      %60 = vector.multi_reduction <add>, %59, %cst_38 [1] : vector<16x1xf32> to vector<16xf32>
      %61 = vector.shape_cast %60 : vector<16xf32> to vector<16x1xf32>
      %cst_39 = arith.constant dense<0.000000e+00> : vector<1xf32>
      %62 = vector.multi_reduction <add>, %61, %cst_39 [0] : vector<16x1xf32> to vector<1xf32>
      %63 = vector.shape_cast %62 : vector<1xf32> to vector<1x1xf32>
      %c0_40 = arith.constant 0 : index
      %c0_41 = arith.constant 0 : index
      %64 = vector.load %arg5[%c0_40, %c0_41] : memref<1x2xf32, #tpu.memory_space<vmem>>, vector<1x2xf32>
      %65 = tpu.concatenate %58, %63 in 1 : vector<1x1xf32>, vector<1x1xf32> -> vector<1x2xf32>
      %66 = arith.addf %64, %65 : vector<1x2xf32>
      %c0_42 = arith.constant 0 : index
      %c0_43 = arith.constant 0 : index
      %67 = vector.load %arg5[%c0_42, %c0_43] : memref<1x2xf32, #tpu.memory_space<vmem>>, vector<1x2xf32>
      tpu.vector_store %arg5[%c0_42, %c0_43], %66 {strides = array<i32>} : memref<1x2xf32, #tpu.memory_space<vmem>>, vector<1x2xf32>,
    } else {
    }
    return
  }
  func.func @transform_0(%arg0: i32, %arg1: i32) -> (i32, i32) {
    %c0_i32 = arith.constant 0 : i32
    return %arg0, %arg1 : i32, i32
  }
  func.func @transform_1(%arg0: i32, %arg1: i32) -> (i32, i32) {
    %c0_i32 = arith.constant 0 : i32
    %c0_i32_0 = arith.constant 0 : i32
    return %arg0, %c0_i32 : i32, i32
  }
  func.func @transform_2(%arg0: i32, %arg1: i32) -> (i32, i32) {
    %c0_i32 = arith.constant 0 : i32
    %c0_i32_0 = arith.constant 0 : i32
    return %arg0, %c0_i32 : i32, i32
  }
  func.func @transform_3(%arg0: i32, %arg1: i32) -> (i32, i32) {
    %c0_i32 = arith.constant 0 : i32
    %c0_i32_0 = arith.constant 0 : i32
    %c0_i32_1 = arith.constant 0 : i32
    return %c0_i32, %c0_i32_0 : i32, i32
  }
}

</mosaic_0001>

<bundles_post_ra>
// kernel: forward.43
= control target key start
LH: loop header
LB: loop body
LE: loop exit
PB: predicated region body
PF: predicated region fallthrough
CT: control target
= control target key end

     0   :  { %vm19_vm0 = vcmask 785408   ;;  %v108_v1 = vmov 0.0   ;;  %vm47_vm1 = vcmask 261120   ;;  %vm83_vm2 = vcmask 781312   ;;  %s151_s1 = inlined_call_operand.vmem [shape: bf16[32,96], index: 1, kind: input, shape index: {}]   ;;  %s152_s2 = inlined_call_operand.vmem [shape: f32[1,96], index: 2, kind: input, shape index: {}]   ;;  %s153_s0 = inlined_call_operand.vmem [shape: bf16[16,32], index: 0, kind: input, shape index: {}]   ;;  %s154_s3 = inlined_call_operand.vmem [shape: bf16[16,96], index: 3, kind: output, shape index: {}]  }
   0x1   :  { %v105_v0 = vld [vmem:[%s151_s1 + $0x8] sm:$0xff]  ;;  %20 = vst.msk [vmem:[#allocation2] sm:$0xff] %vm19_vm0, %v108_v1  ;;  %v104_v2 = vld [vmem:[%s151_s1] sm:$0xff] }
   0x2   :  { %21 = vst.msk [vmem:[#allocation2 + $0x8] sm:$0xff] %vm19_vm0, %v108_v1  ;;  %57 = vmatpush.bf16.msra.mxu0 %v105_v0  ;;  %v103_v3 = vld [vmem:[%s153_s0] sm:$0xff] }
   0x3   :  { %v107_v8 = vld [vmem:[%s152_s2] ss:$0 sm:$0xff] }
   0x6   :  { %58 = vmatpush.bf16.msra.mxu0 %v104_v2 }
   0x8   :  { %v22_v4 = vld [vmem:[#allocation2] sm:$0xff] }
   0x9   :  { %102 = vmatmul.msk.bf16.vlgmr.msra.gmra.mxu0 %vm47_vm1, %v103_v3  ;;  %v23_v7 = vld [vmem:[#allocation2 + $0x8] sm:$0xff] }
  0x86   :  { %v60_v5 = vpop.f32.mrf.mxu0 }
  0x87   :  { %v65_v6 = vadd.f32 %v60_v5, %v22_v4 }
  0x89   :  { %68 = vst.msk [vmem:[#allocation2] sm:$0xff] %vm19_vm0, %v65_v6 }
  0x8e   :  { %v62_v9 = vpop.f32.mrf.mxu0 }
  0x8f   :  { %v66_v10 = vadd.f32 %v62_v9, %v23_v7 }
  0x90   :  { %v73_v11 = vld [vmem:[#allocation2] sm:$0xff] }
  0x91   :  { %v79_v12 = vadd.f32 %v107_v8, %v73_v11  ;;  %69 = vst.msk [vmem:[#allocation2 + $0x8] sm:$0xff] %vm19_vm0, %v66_v10 }
  0x93   :  { %v81_v13 = vpack.c.bf16 %v79_v12, %v79_v12 }
  0x95   :  { %84 = vst.msk [vmem:[%s154_s3] sm:$0xf] %vm83_vm2, %v81_v13 }
  0x98   :  { %v74_v14 = vld [vmem:[#allocation2 + $0x8] sm:$0xff] }
  0x99   :  { %v80_v15 = vadd.f32 %v107_v8, %v74_v14 }
  0x9b   :  { %v82_v16 = vpack.c.bf16 %v80_v15, %v80_v15 }
  0x9d   :  { %85 = vst.msk [vmem:[%s154_s3 + $0x4] sm:$0xf] %vm83_vm2, %v82_v16 }

// kernel: forward.46
= control target key start
LH: loop header
LB: loop body
LE: loop exit
PB: predicated region body
PF: predicated region fallthrough
CT: control target
= control target key end

     0   :  { %vm19_vm0 = vcmask 523264   ;;  %v130_v1 = vmov 0.0   ;;  %vm47_vm1 = vcmask 261120   ;;  %vm101_vm2 = vcmask 519168   ;;  %s173_s1 = inlined_call_operand.vmem [shape: bf16[32,64], index: 1, kind: input, shape index: {}]   ;;  %s174_s2 = inlined_call_operand.vmem [shape: f32[1,64], index: 2, kind: input, shape index: {}]   ;;  %s175_s0 = inlined_call_operand.vmem [shape: bf16[16,32], index: 0, kind: input, shape index: {}]   ;;  %s176_s3 = inlined_call_operand.vmem [shape: bf16[16,64], index: 3, kind: output, shape index: {}]  }
   0x1   :  { %v123_v0 = vld [vmem:[%s173_s1 + $0x8] sm:$0xff]  ;;  %20 = vst.msk [vmem:[#allocation2] sm:$0xff] %vm19_vm0, %v130_v1  ;;  %v122_v2 = vld [vmem:[%s173_s1] sm:$0xff] }
   0x2   :  { %21 = vst.msk [vmem:[#allocation2 + $0x8] sm:$0xff] %vm19_vm0, %v130_v1  ;;  %57 = vmatpush.bf16.msra.mxu0 %v123_v0  ;;  %v121_v3 = vld [vmem:[%s175_s0] sm:$0xff] }
   0x3   :  { %v125_v8 = vld [vmem:[%s174_s2] ss:$0 sm:$0xff] }
   0x6   :  { %58 = vmatpush.bf16.msra.mxu0 %v122_v2 }
   0x8   :  { %v22_v4 = vld [vmem:[#allocation2] sm:$0xff] }
   0x9   :  { %120 = vmatmul.msk.bf16.vlgmr.msra.gmra.mxu0 %vm47_vm1, %v121_v3  ;;  %v23_v7 = vld [vmem:[#allocation2 + $0x8] sm:$0xff] }
  0x86   :  { %v60_v5 = vpop.f32.mrf.mxu0 }
  0x87   :  { %v65_v6 = vadd.f32 %v60_v5, %v22_v4 }
  0x89   :  { %68 = vst.msk [vmem:[#allocation2] sm:$0xff] %vm19_vm0, %v65_v6 }
  0x8e   :  { %v62_v9 = vpop.f32.mrf.mxu0 }
  0x8f   :  { %v66_v10 = vadd.f32 %v62_v9, %v23_v7 }
  0x90   :  { %v73_v11 = vld [vmem:[#allocation2] sm:$0xff] }
  0x91   :  { %v79_v12 = vadd.f32 %v125_v8, %v73_v11  ;;  %69 = vst.msk [vmem:[#allocation2 + $0x8] sm:$0xff] %vm19_vm0, %v66_v10 }
  0x93   :  { %v83_v13 = vmul.f32 0.044715, %v79_v12  ;;  %v81_v26 = vmul.f32 0.5, %v79_v12 }
  0x95   :  { %v85_v14 = vmul.f32 %v83_v13, %v79_v12 }
  0x97   :  { %v87_v15 = vmul.f32 %v85_v14, %v79_v12 }
  0x98   :  { %v74_v16 = vld [vmem:[#allocation2 + $0x8] sm:$0xff] }
  0x99   :  { %v89_v17 = vadd.f32 %v87_v15, %v79_v12  ;;  %v80_v18 = vadd.f32 %v125_v8, %v74_v16 }
  0x9b   :  { %v91_v19 = vmul.f32 0.7978846, %v89_v17  ;;  %v84_v20 = vmul.f32 0.044715, %v80_v18  ;;  %v82_v31 = vmul.f32 0.5, %v80_v18 }
  0x9d   :  { %126 = vtanh.f32 %v91_v19  ;;  %v86_v21 = vmul.f32 %v84_v20, %v80_v18 }
  0x9f   :  { %v88_v22 = vmul.f32 %v86_v21, %v80_v18 }
  0xa1   :  { %v90_v23 = vadd.f32 %v88_v22, %v80_v18 }
  0xa3   :  { %v127_v24 = vpop.eup %126  ;;  %v92_v25 = vmul.f32 0.7978846, %v90_v23 }
  0xa4   :  { %v95_v27 = vadd.f32 1.0, %v127_v24 }
  0xa5   :  { %128 = vtanh.f32 %v92_v25 }
  0xa6   :  { %v97_v28 = vmul.f32 %v95_v27, %v81_v26 }
  0xa8   :  { %v99_v29 = vpack.c.bf16 %v97_v28, %v97_v28 }
  0xaa   :  { %102 = vst.msk [vmem:[%s176_s3] sm:$0xf] %vm101_vm2, %v99_v29 }
  0xab   :  { %v129_v30 = vpop.eup %128 }
  0xac   :  { %v96_v32 = vadd.f32 1.0, %v129_v30 }
  0xae   :  { %v98_v33 = vmul.f32 %v96_v32, %v82_v31 }
  0xb0   :  { %v100_v34 = vpack.c.bf16 %v98_v33, %v98_v33 }
  0xb2   :  { %103 = vst.msk [vmem:[%s176_s3 + $0x4] sm:$0xf] %vm101_vm2, %v100_v34 }

// kernel: forward.45
= control target key start
LH: loop header
LB: loop body
LE: loop exit
PB: predicated region body
PF: predicated region fallthrough
CT: control target
= control target key end

     0   :  { %vm28_vm0 = vcmask 261120   ;;  %v198_v1 = vmov 0.0   ;;  %v199_v22 = vmov 32.0   ;;  %vm160_vm6 = vcmask 257024   ;;  %s271_s1 = inlined_call_operand.vmem [shape: bf16[32,32], index: 1, kind: input, shape index: {}]   ;;  %s272_s0 = inlined_call_operand.vmem [shape: bf16[16,32], index: 0, kind: input, shape index: {}]   ;;  %s273_s2 = inlined_call_operand.vmem [shape: f32[1,32], index: 2, kind: input, shape index: {}]   ;;  %s274_s5 = inlined_call_operand.vmem [shape: bf16[16,32], index: 5, kind: input, shape index: {}]   ;;  %s275_s3 = inlined_call_operand.vmem [shape: f32[1,32], index: 3, kind: input, shape index: {}]   ;;  %s276_s4 = inlined_call_operand.vmem [shape: f32[1,32], index: 4, kind: input, shape index: {}]   ;;  %s277_s6 = inlined_call_operand.vmem [shape: bf16[16,32], index: 6, kind: output, shape index: {}]  }
   0x1   :  { %v182_v0 = vld [vmem:[%s271_s1 + $0x8] sm:$0xff]  ;;  %29 = vst.msk [vmem:[#allocation2] sm:$0xff] %vm28_vm0, %v198_v1  ;;  %v181_v2 = vld [vmem:[%s271_s1] sm:$0xff]  ;;  %192 = vrcp.f32 %v199_v22 }
   0x2   :  { %30 = vst.msk [vmem:[#allocation2 + $0x8] sm:$0xff] %vm28_vm0, %v198_v1  ;;  %66 = vmatpush.bf16.msra.mxu0 %v182_v0  ;;  %v180_v3 = vld [vmem:[%s272_s0] sm:$0xff] }
   0x3   :  { %v184_v8 = vld [vmem:[%s274_s5] sm:$0xff]  }
   0x4   :  { %v189_v9 = vld [vmem:[%s273_s2] ss:$0 sm:$0xff]  ;;  %v185_v12 = vunpack.c.l.bf16 %v184_v8  ;;  %v186_v17 = vunpack.c.h.bf16 %v184_v8 }
   0x5   :  { %v190_v53 = vld [vmem:[%s275_s3] ss:$0 sm:$0xff] }
   0x6   :  { %67 = vmatpush.bf16.msra.mxu0 %v181_v2  ;;  %v191_v56 = vld [vmem:[%s276_s4] ss:$0 sm:$0xff] }
   0x7   :  { %v193_v23 = vpop.eup %192 }
   0x8   :  { %v31_v4 = vld [vmem:[#allocation2] sm:$0xff]  ;;  %v102_v24 = vmul.f32 32.0, %v193_v23  ;;  %vm106_vm1 = vweird.f32 %v193_v23 }
   0x9   :  { %179 = vmatmul.msk.bf16.vlgmr.msra.gmra.mxu0 %vm28_vm0, %v180_v3  ;;  %v32_v7 = vld [vmem:[#allocation2 + $0x8] sm:$0xff] }
   0xa   :  { %v103_v25 = vsub.f32 1.0, %v102_v24 }
   0xc   :  { %v104_v26 = vmul.f32 %v193_v23, %v103_v25 }
   0xe   :  { %v105_v27 = vadd.f32 %v193_v23, %v104_v26 }
  0x10   :  { %v107_v28 = vsel %vm106_vm1, %v193_v23, %v105_v27 }
  0x86   :  { %v69_v5 = vpop.f32.mrf.mxu0 }
  0x87   :  { %v74_v6 = vadd.f32 %v69_v5, %v31_v4 }
  0x89   :  { %76 = vst.msk [vmem:[#allocation2] sm:$0xff] %vm28_vm0, %v74_v6 }
  0x8e   :  { %v71_v10 = vpop.f32.mrf.mxu0 }
  0x8f   :  { %v75_v11 = vadd.f32 %v71_v10, %v32_v7 }
  0x90   :  { %v81_v13 = vld [vmem:[#allocation2] sm:$0xff] }
  0x91   :  { %77 = vst.msk [vmem:[#allocation2 + $0x8] sm:$0xff] %vm28_vm0, %v75_v11  ;;  %v87_v14 = vadd.f32 %v189_v9, %v81_v13 }
  0x93   :  { %v93_v15 = vadd.f32 %v185_v12, %v87_v14 }
  0x95   :  { %v95_v16 = vsel %vm28_vm0, %v93_v15, 0.0 }
  0x96   :  { %96 = vadd.xlane.f32.xlu0 %v95_v16 }
  0x98   :  { %v82_v18 = vld [vmem:[#allocation2 + $0x8] sm:$0xff] }
  0x99   :  { %v88_v19 = vadd.f32 %v189_v9, %v82_v18 }
  0x9b   :  { %v94_v20 = vadd.f32 %v186_v17, %v88_v19 }
  0x9d   :  { %v98_v21 = vsel %vm28_vm0, %v94_v20, 0.0 }
  0x9e   :  { %99 = vadd.xlane.f32.xlu0 %v98_v21 }
 0x109   :  { %v97_v29 = vpop.xlane.xlu0 %96 }
 0x10a   :  { %v108_v30 = vmul.f32 %v107_v28, %v97_v29 }
 0x10c   :  { %v110_v31 = vsub.f32 %v93_v15, %v108_v30 }
 0x10e   :  { %v112_v32 = vmul.f32 %v110_v31, %v110_v31 }
 0x110   :  { %v114_v33 = vsel %vm28_vm0, %v112_v32, 0.0 }
 0x111   :  { %115 = vadd.xlane.f32.xlu1 %v114_v33  ;;  %v100_v34 = vpop.xlane.xlu0 %99 }
 0x112   :  { %v109_v35 = vmul.f32 %v107_v28, %v100_v34 }
 0x114   :  { %v111_v36 = vsub.f32 %v94_v20, %v109_v35 }
 0x116   :  { %v113_v37 = vmul.f32 %v111_v36, %v111_v36 }
 0x118   :  { %v117_v38 = vsel %vm28_vm0, %v113_v37, 0.0 }
 0x119   :  { %118 = vadd.xlane.f32.xlu1 %v117_v38 }
 0x184   :  { %v116_v39 = vpop.xlane.xlu1 %115 }
 0x185   :  { %v120_v40 = vmul.f32 %v116_v39, %v107_v28 }
 0x187   :  { %v122_v41 = vadd.f32 1e-12, %v120_v40 }
 0x189   :  { %194 = vrsqrt.f32 %v122_v41  ;;  %vm130_vm3 = vweird.f32 %v122_v41 }
 0x18c   :  { %v119_v42 = vpop.xlane.xlu1 %118 }
 0x18d   :  { %v121_v43 = vmul.f32 %v119_v42, %v107_v28 }
 0x18f   :  { %v195_v44 = vpop.eup %194  ;;  %v123_v45 = vadd.f32 1e-12, %v121_v43 }
 0x190   :  { %v125_v46 = vmul.f32 %v195_v44, %v122_v41  ;;  %vm131_vm2 = vweird.f32 %v195_v44 }
 0x191   :  { %196 = vrsqrt.f32 %v123_v45  ;;  %vm132_vm4 = vmor %vm130_vm3, %vm131_vm2  ;;  %vm140_vm7 = vweird.f32 %v123_v45 }
 0x192   :  { %v126_v47 = vmul.f32 %v195_v44, %v125_v46 }
 0x194   :  { %v127_v48 = vmul.f32 0.5, %v126_v47 }
 0x196   :  { %v128_v49 = vsub.f32 1.5, %v127_v48 }
 0x197   :  { %v197_v50 = vpop.eup %196 }
 0x198   :  { %v129_v51 = vmul.f32 %v195_v44, %v128_v49  ;;  %v135_v52 = vmul.f32 %v197_v50, %v123_v45  ;;  %vm141_vm5 = vweird.f32 %v197_v50 }
 0x199   :  { %vm142_vm8 = vmor %vm140_vm7, %vm141_vm5 }
 0x19a   :  { %v133_v54 = vsel %vm132_vm4, %v195_v44, %v129_v51  ;;  %v136_v55 = vmul.f32 %v197_v50, %v135_v52 }
 0x19b   :  { %v144_v57 = vmul.f32 %v133_v54, %v110_v31 }
 0x19c   :  { %v137_v58 = vmul.f32 0.5, %v136_v55 }
 0x19d   :  { %v150_v59 = vmul.f32 %v190_v53, %v144_v57 }
 0x19e   :  { %v138_v60 = vsub.f32 1.5, %v137_v58 }
 0x19f   :  { %v156_v61 = vadd.f32 %v191_v56, %v150_v59 }
 0x1a0   :  { %v139_v62 = vmul.f32 %v197_v50, %v138_v60 }
 0x1a1   :  { %v158_v63 = vpack.c.bf16 %v156_v61, %v156_v61 }
 0x1a2   :  { %v143_v0 = vsel %vm142_vm8, %v197_v50, %v139_v62 }
 0x1a3   :  { %161 = vst.msk [vmem:[%s277_s6] sm:$0xf] %vm160_vm6, %v158_v63  ;;  %v145_v1 = vmul.f32 %v143_v0, %v111_v36 }
 0x1a5   :  { %v151_v2 = vmul.f32 %v190_v53, %v145_v1 }
 0x1a7   :  { %v157_v3 = vadd.f32 %v191_v56, %v151_v2 }
 0x1a9   :  { %v159_v4 = vpack.c.bf16 %v157_v3, %v157_v3 }
 0x1ab   :  { %162 = vst.msk [vmem:[%s277_s6 + $0x4] sm:$0xf] %vm160_vm6, %v159_v4 }

// kernel: forward.44
= control target key start
LH: loop header
LB: loop body
LE: loop exit
PB: predicated region body
PF: predicated region fallthrough
CT: control target
= control target key end

     0   :  { %s696_s12 = smov 0   ;;  %s698_s13 = smov 0   ;;  %s775_s0 = inlined_call_operand.vmem [shape: bf16[2,8,96], index: 0, kind: input, shape index: {}, may-alias: {0,1}]   ;;  %s776_s1 = inlined_call_operand.vmem [shape: bf16[2,8,96], index: 1, kind: input, shape index: {}, may-alias: {0,1}]   ;;  %s777_s2 = inlined_call_operand.vmem [shape: f32[2,1,8], index: 2, kind: input, shape index: {}]   ;;  %s778_s3 = inlined_call_operand.vmem [shape: bf16[2,8,32], index: 3, kind: output, shape index: {}]  }
   0x1   :  { %s700_s14 = smov 0  }
   0x2 LB: > { %s32_s15 = sadd.s32 1, %s661_s13  ;;  %p584_p0 = scmp.ge.s32.totalorder %s665_s14, 1  ;;  %s665_s14 = sphi %s700_s14, %s13_s14   ;;  %s661_s13 = sphi %s698_s13, %s780_s13   ;;  %s657_s12 = sphi %s696_s12, %s779_s12  }
   0x3   : > { %p34_p1 = scmp.ge.s32.totalorder %s32_s15, 2  ;;  %p189_p2 = scmp.lt.s32.totalorder %s665_s14, 3 }
   0x5   : > { %s782_s15 = smov (%p34_p1, %s32_s15), 0  ;;  %p190_p3 = pnand %p584_p0, %p189_p2 }
   0x6   : > { %p230_p4 = scmp.lt.s32.totalorder (!%p190_p3), %s657_s12, 1  ;;  %s667_s23 = smov (!%p190_p3), 80  }
   0x7   : > { %193 = sbr.rel (%p190_p3) target bundleno = 952 (0x3b8), region = 32  ;;  %s668_s24 = smov (!%p190_p3), 96  }
   0x8   : > { %s669_s25 = smov (!%p190_p3), 112   ;;  %s670_s29 = smov (!%p190_p3), 48  }
   0x9   : > { %s674_s30 = smov (!%p190_p3), 64   ;;  %s675_s4 = smov (!%p190_p3), 16  }
   0xc   : > { %s784_s12 = smov (!%p230_p4, %s657_s12), 1  ;;  %vm267_vm0 = vcmask 130048   ;;  %vm262_vm1 = vcmask 7168   ;;  %v671_v11 = vmov -inf   ;;  %vm304_vm2 = vcmask 64512  }
   0xd   : > { %s717_s16 = sshll.u32 %s784_s12, 2  ;;  %s249_s28 = scalar_lea.vmem %s777_s2, %s784_s12  ;;  %264 = vst.msk [vmem:[#allocation2 + $0x8] sm:$0xff] %vm262_vm1, %v671_v11  ;;  %v672_v18 = vmov 0   ;;  %v673_v19 = vmov 0.0   ;;  %vm341_vm3 = vcmask 1043456   ;;  %vm474_vm4 = vcmask 257024  }
   0xe   : > { %s243_s19 = scalar_lea.vmem %s776_s1, %s717_s16  ;;  %s236_s22 = scalar_lea.vmem %s775_s0, %s717_s16  ;;  %263 = vst.msk [vmem:[#allocation2] sm:$0xff] %vm262_vm1, %v671_v11  ;;  %v630_v12 = vld [vmem:[%s249_s28] ss:$0 sm:$0xff]  ;;  %627 = vset.pattern.permute.xlu2 %v672_v18  ;;  %629 = vset.pattern.permute.xlu1 %v672_v18 }
   0xf   : > { %v271_v0 = vld [vmem:[%s243_s19] sm:$0xf]  ;;  %628 = vset.pattern.permute.xlu0 %v672_v18  ;;  %269 = vst.msk [vmem:[#allocation4 + $0x8] sm:$0xff] %vm267_vm0, %v673_v19  ;;  %s256_s7 = scalar_lea.vmem %s778_s3, %s717_s16 }
  0x10   : > { %v274_v1 = vunpack.c.l.b16 %v271_v0  ;;  %v270_v2 = vld [vmem:[%s236_s22] sm:$0xf]  ;;  %265 = vst.msk [vmem:[#allocation3] sm:$0xff] %vm262_vm1, %v673_v19 }
  0x11   : > { %v362_v4 = vunpack.c.l.b16 %v270_v2  ;;  %266 = vst.msk [vmem:[#allocation3 + $0x8] sm:$0xff] %vm262_vm1, %v673_v19 }
  0x12   : > { %v727_v3 = vpack.c.b16 %v274_v1, %v274_v1  ;;  %268 = vst.msk [vmem:[#allocation4] sm:$0xff] %vm267_vm0, %v673_v19 }
  0x13   : > { %v363_v5 = vpack.c.b16 %v362_v4, %v362_v4 }
  0x14   : > { %366 = vrot.lane.b32.xlu0 %v727_v3, %s667_s23  ;;  %276 = vrot.lane.b32.xlu1 %v727_v3, %s668_s24  ;;  %v390_v22 = vld [vmem:[#allocation2 + $0x8] sm:$0xff] }
  0x15   : > { %v303_v38 = vld [vmem:[#allocation2] sm:$0xff] }
  0x16   : > { %v415_v45 = vld [vmem:[#allocation4 + $0x8] sm:$0xff] }
  0x17   : > { %v320_v1 = vld [vmem:[#allocation3] sm:$0xff] }
  0x18   : > { %v407_v59 = vld [vmem:[#allocation3 + $0x8] sm:$0xff] }
  0x1c   : > { %364 = vrot.lane.b32.xlu0 %v363_v5, %s669_s25  ;;  %v328_v5 = vld [vmem:[#allocation4] sm:$0xff] }
  0x24   : > { %423 = vrot.lane.b32.xlu0 %v727_v3, %s670_s29 }
  0x86   : > { %v367_v6 = vpop.permute.xlu0 %366  ;;  %v277_v9 = vpop.permute.xlu1 %276 }
  0x87   : > { %v372_v7 = vsel %vm267_vm0, %v367_v6, 0  ;;  %v283_v10 = vsel %vm267_vm0, %v277_v9, 0 }
  0x88   : > { %381 = vmatpush.bf16.xpose.msra.mxu2 %v372_v7  ;;  %292 = vmatpush.bf16.xpose.msra.mxu0 %v283_v10 }
  0x8e   : > { %v365_v8 = vpop.permute.xlu0 %364 }
  0x8f   : > { %590 = vmatmul.msk.bf16.vlgmr.msra.gmra.mxu2 %vm267_vm0, %v365_v8  ;;  %588 = vmatmul.msk.bf16.vlgmr.msra.gmra.mxu0 %vm267_vm0, %v270_v2 }
  0x96   : > { %v424_v31 = vpop.permute.xlu0 %423 }
  0x97   : > { %v429_v32 = vsel %vm341_vm3, %v424_v31, 0 }
  0x98   : > { %438 = vmatpush.bf16.msra.mxu3 %v429_v32 }
 0x10c   : > { %v294_v20 = vpop.f32.mrf.mxu0 }
 0x10d   : > { %v298_v28 = vmul.f32 0.25, %v294_v20 }
 0x10f   : > { %v302_v29 = vadd.f32 %v630_v12, %v298_v28 }
 0x111   : > { %v305_v30 = vsel %vm304_vm2, %v302_v29, -inf }
 0x112   : > { %v383_v13 = vpop.f32.mrf.mxu2 }
 0x113   : > { %v387_v14 = vmul.f32 0.25, %v383_v13 }
 0x114   : > { %v296_v21 = vpop.f32.mrf.mxu0 }
 0x115   : > { %v388_v15 = vadd.f32 %v630_v12, %v387_v14 }
 0x117   : > { %v391_v16 = vsel %vm304_vm2, %v388_v15, -inf }
 0x118   : > { %392 = vmax.xlane.f32.xlu1 %v391_v16 }
 0x11a   : > { %v385_v17 = vpop.f32.mrf.mxu2 }
 0x18b   : > { %v393_v23 = vpop.xlane.xlu1 %392 }
 0x18c   : > { %v394_v24 = vmax.f32 %v390_v22, %v393_v23 }
 0x18e   : > { %v395_v25 = vsub.f32 %v390_v22, %v394_v24  ;;  %446 = vst.msk [vmem:[#allocation2 + $0x8] sm:$0xff] %vm262_vm1, %v394_v24  ;;  %400 = vperm.xlu2 %627, %v394_v24  }
 0x190   : > { %v396_v26 = vmul.f32 1.442695, %v395_v25 }
 0x192   : > { %631 = vpow2.f32 %v396_v26 }
 0x198   : > { %v632_v27 = vpop.eup %631 }
 0x199   : > { %418 = vperm.xlu1 %629, %v632_v27   ;;  %v408_v60 = vmul.f32 %v632_v27, %v407_v59 }
 0x1b7   : > { %306 = vmax.xlane.f32.xlu2 %v305_v30 }
 0x1e8   : > { %v401_v33 = vpop.permute.xlu2 %400 }
 0x1e9   : > { %v403_v34 = vsub.f32 %v388_v15, %v401_v33 }
 0x1eb   : > { %v404_v35 = vmul.f32 1.442695, %v403_v34 }
 0x1ed   : > { %633 = vpow2.f32 %v404_v35 }
 0x1f3   : > { %v634_v36 = vpop.eup %633 }
 0x1f4   : > { %v422_v37 = vpack.c.bf16 %v634_v36, %v634_v36  ;;  %v409_v44 = vsel %vm304_vm2, %v634_v36, 0.0 }
 0x1f6   : > { %591 = vmatmul.msk.bf16.vlgmr.msra.gmra.mxu3 %vm304_vm2, %v422_v37 }
 0x20b   : > { %v419_v46 = vpop.permute.xlu1 %418 }
 0x20c   : > { %v421_v47 = vmul.f32 %v419_v46, %v415_v45 }
 0x22a   : > { %v307_v39 = vpop.xlane.xlu2 %306 }
 0x22b   : > { %v308_v40 = vmax.f32 %v303_v38, %v307_v39 }
 0x22d   : > { %v309_v41 = vsub.f32 %v303_v38, %v308_v40  ;;  %360 = vst.msk [vmem:[#allocation2] sm:$0xff] %vm262_vm1, %v308_v40  ;;  %314 = vperm.xlu0 %628, %v308_v40  }
 0x22f   : > { %v310_v42 = vmul.f32 1.442695, %v309_v41 }
 0x231   : > { %635 = vpow2.f32 %v310_v42 }
 0x235   : > { %336 = vrot.lane.b32.xlu0 %v727_v3, %s674_s30 }
 0x237   : > { %v636_v43 = vpop.eup %635 }
 0x238   : > { %331 = vperm.xlu1 %629, %v636_v43   ;;  %v321_v2 = vmul.f32 %v636_v43, %v320_v1 }
 0x25f   : > { %410 = vadd.xlane.f32.xlu0 %v409_v44 }
 0x279   : > { %v440_v48 = vpop.f32.mrf.mxu3 }
 0x27a   : > { %v444_v49 = vadd.f32 %v440_v48, %v421_v47 }
 0x27c   : > { %445 = vst.msk [vmem:[#allocation4 + $0x8] sm:$0xff] %vm267_vm0, %v444_v49 }
 0x281   : > { %v442_v50 = vpop.f32.mrf.mxu3 }
 0x283   : > { %v461_v13 = vld [vmem:[#allocation4 + $0x8] sm:$0xff] }
 0x29f   : > { %v315_v51 = vpop.permute.xlu0 %314 }
 0x2a0   : > { %v317_v52 = vsub.f32 %v302_v29, %v315_v51 }
 0x2a2   : > { %v318_v53 = vmul.f32 1.442695, %v317_v52 }
 0x2a4   : > { %637 = vpow2.f32 %v318_v53 }
 0x2a7   : > { %v337_v54 = vpop.permute.xlu0 %336 }
 0x2a8   : > { %v343_v55 = vsel %vm341_vm3, %v337_v54, 0 }
 0x2a9   : > { %352 = vmatpush.bf16.msra.mxu1 %v343_v55 }
 0x2aa   : > { %v638_v56 = vpop.eup %637  ;;  %v332_v6 = vpop.permute.xlu1 %331 }
 0x2ab   : > { %v322_v57 = vsel %vm304_vm2, %v638_v56, 0.0  ;;  %v335_v58 = vpack.c.bf16 %v638_v56, %v638_v56  ;;  %v334_v7 = vmul.f32 %v332_v6, %v328_v5 }
 0x2ac   : > { %323 = vadd.xlane.f32.xlu2 %v322_v57 }
 0x2ad   : > { %589 = vmatmul.msk.bf16.vlgmr.msra.gmra.mxu1 %vm304_vm2, %v335_v58 }
 0x2d2   : > { %v411_v61 = vpop.xlane.xlu0 %410 }
 0x2d3   : > { %v412_v62 = vadd.f32 %v411_v61, %v408_v60 }
 0x2d5   : > { %413 = vst.msk [vmem:[#allocation3 + $0x8] sm:$0xff] %vm262_vm1, %v412_v62 }
 0x2dc   : > { %v459_v63 = vld [vmem:[#allocation3 + $0x8] sm:$0xff] }
 0x2dd   : > { %639 = vrcp.f32 %v459_v63 }
 0x2e3   : > { %v640_v0 = vpop.eup %639 }
 0x2e4   : > { %464 = vperm.xlu2 %627, %v640_v0  }
 0x31f   : > { %v324_v3 = vpop.xlane.xlu2 %323 }
 0x320   : > { %v325_v4 = vadd.f32 %v324_v3, %v321_v2 }
 0x322   : > { %327 = vst.msk [vmem:[#allocation3] sm:$0xff] %vm262_vm1, %v325_v4 }
 0x329   : > { %v450_v8 = vld [vmem:[#allocation3] sm:$0xff] }
 0x32a   : > { %v354_v9 = vpop.f32.mrf.mxu1  ;;  %641 = vrcp.f32 %v450_v8 }
 0x32b   : > { %v358_v10 = vadd.f32 %v354_v9, %v334_v7 }
 0x32d   : > { %359 = vst.msk [vmem:[#allocation4] sm:$0xff] %vm267_vm0, %v358_v10 }
 0x330   : > { %v642_v11 = vpop.eup %641 }
 0x331   : > { %455 = vperm.xlu2 %627, %v642_v11  }
 0x332   : > { %v356_v12 = vpop.f32.mrf.mxu1 }
 0x334   : > { %v452_v17 = vld [vmem:[#allocation4] sm:$0xff] }
 0x33e   : > { %v465_v14 = vpop.permute.xlu2 %464 }
 0x33f   : > { %v467_v15 = vmul.f32 %v465_v14, %v461_v13 }
 0x341   : > { %469 = vrot.lane.b32.xlu1 %v467_v15, %s675_s4 }
 0x38b   : > { %v456_v16 = vpop.permute.xlu2 %455 }
 0x38c   : > { %v458_v18 = vmul.f32 %v456_v16, %v452_v17 }
 0x3b3   : > { %v470_v19 = vpop.permute.xlu1 %469 }
 0x3b4   : > { %v472_v20 = vsel %vm267_vm0, %v458_v18, %v470_v19 }
 0x3b5   : > { %v473_v21 = vpack.c.bf16 %v472_v20, %v472_v20 }
 0x3b7   : > { %475 = vst.msk [vmem:[%s256_s7] sm:$0xf] %vm474_vm4, %v473_v21 }
 0x3b8 PF: > { %s13_s14 = sadd.s32 1, %s665_s14   ;;  %s779_s12 = smov %s661_s13 }
 0x3b9   : > { %p10_p5 = scmp.ge.s32.totalorder %s13_s14, 4   ;;  %s780_s13 = smov %s782_s15 }
 0x3bb   :  { %12 = sbr.rel (!%p10_p5) target bundleno = 2 (0x2), region = 79 }

// kernel: div.11
= control target key start
LH: loop header
LB: loop body
LE: loop exit
PB: predicated region body
PF: predicated region fallthrough
CT: control target
= control target key end

     0   :  { %s50_s0 = inlined_call_operand.vmem [shape: f32[16], index: 0, kind: input, shape index: {}]   ;;  %s51_s1 = inlined_call_operand.vmem [shape: f32[16], index: 1, kind: input, shape index: {}]   ;;  %s52_s2 = inlined_call_operand.vmem [shape: f32[16], index: 2, kind: output, shape index: {}]  }
   0x1   :  { %v4_v0 = vld [vmem:[%s51_s1] sm:$0x1] }
   0x2   :  { %24 = vrcp.f32 %v4_v0  ;;  %v18_v3 = vand.u32 2147483648, %v4_v0  ;;  %vm12_vm0 = vweird.f32 %v4_v0  ;;  %v16_v5 = vand.u32 2147483647, %v4_v0  ;;  %v3_v9 = vld [vmem:[%s50_s0] sm:$0x1] }
   0x4   :  { %v19_v7 = vor.u32 1.1754944e-38, %v18_v3  ;;  %vm17_vm3 = vcmp.eq.f32.partialorder %v16_v5, 8.507059e+37 }
   0x8   :  { %v25_v1 = vpop.eup %24 }
   0x9   :  { %v8_v2 = vmul.f32 %v25_v1, %v4_v0  ;;  %vm13_vm1 = vweird.f32 %v25_v1 }
   0xa   :  { %vm14_vm2 = vmor %vm12_vm0, %vm13_vm1 }
   0xb   :  { %v9_v4 = vsub.f32 1.0, %v8_v2 }
   0xd   :  { %v10_v6 = vmul.f32 %v25_v1, %v9_v4 }
   0xf   :  { %v11_v8 = vadd.f32 %v25_v1, %v10_v6 }
  0x11   :  { %v15_v10 = vsel %vm14_vm2, %v25_v1, %v11_v8 }
  0x12   :  { %v20_v11 = vsel %vm17_vm3, %v19_v7, %v15_v10 }
  0x13   :  { %v21_v12 = vmul.f32 %v20_v11, %v3_v9 }
  0x15   :  { %23 = vst [vmem:[%s52_s2] sm:$0x1] %v21_v12 }

// kernel: forward.47
= control target key start
LH: loop header
LB: loop body
LE: loop exit
PB: predicated region body
PF: predicated region fallthrough
CT: control target
= control target key end

     0   :  { %vm28_vm0 = vcmask 261120   ;;  %v222_v1 = vmov 0.0   ;;  %vm72_vm1 = vcmask 523264   ;;  %v223_v24 = vmov 32.0   ;;  %s302_s1 = inlined_call_operand.vmem [shape: bf16[64,32], index: 1, kind: input, shape index: {}]   ;;  %s303_s0 = inlined_call_operand.vmem [shape: bf16[16,64], index: 0, kind: input, shape index: {}]   ;;  %s304_s2 = inlined_call_operand.vmem [shape: f32[1,32], index: 2, kind: input, shape index: {}]   ;;  %s305_s5 = inlined_call_operand.vmem [shape: bf16[16,32], index: 5, kind: input, shape index: {}]   ;;  %s306_s3 = inlined_call_operand.vmem [shape: f32[1,32], index: 3, kind: input, shape index: {}]   ;;  %s307_s4 = inlined_call_operand.vmem [shape: f32[1,32], index: 4, kind: input, shape index: {}]   ;;  %s308_s6 = inlined_call_operand.vmem [shape: f32[16,32], index: 6, kind: output, shape index: {}]  }
   0x1   :  { %v206_v0 = vld [vmem:[%s302_s1 + $0x18] sm:$0xff]  ;;  %29 = vst.msk [vmem:[#allocation2] sm:$0xff] %vm28_vm0, %v222_v1  ;;  %v205_v2 = vld [vmem:[%s302_s1 + $0x10] sm:$0xff]  ;;  %v204_v3 = vld [vmem:[%s302_s1 + $0x8] sm:$0xff]  ;;  %216 = vrcp.f32 %v223_v24 }
   0x2   :  { %30 = vst.msk [vmem:[#allocation2 + $0x8] sm:$0xff] %vm28_vm0, %v222_v1  ;;  %80 = vmatpush.bf16.msra.mxu0 %v206_v0  ;;  %v203_v4 = vld [vmem:[%s302_s1] sm:$0xff] }
   0x3   :  { %v202_v5 = vld [vmem:[%s303_s0] sm:$0xff] }
   0x4   :  { %v208_v10 = vld [vmem:[%s305_s5] sm:$0xff]  }
   0x5   :  { %v213_v11 = vld [vmem:[%s304_s2] ss:$0 sm:$0xff]  ;;  %v209_v14 = vunpack.c.l.bf16 %v208_v10  ;;  %v210_v19 = vunpack.c.h.bf16 %v208_v10 }
   0x6   :  { %81 = vmatpush.bf16.msra.mxu0 %v205_v2  ;;  %v214_v55 = vld [vmem:[%s306_s3] ss:$0 sm:$0xff] }
   0x7   :  { %v217_v25 = vpop.eup %216  ;;  %v215_v58 = vld [vmem:[%s307_s4] ss:$0 sm:$0xff] }
   0x8   :  { %v31_v6 = vld [vmem:[#allocation2] sm:$0xff]  ;;  %v119_v26 = vmul.f32 32.0, %v217_v25  ;;  %vm123_vm2 = vweird.f32 %v217_v25 }
   0x9   :  { %v32_v9 = vld [vmem:[#allocation2 + $0x8] sm:$0xff] }
   0xa   :  { %82 = vmatpush.bf16.msra.mxu0 %v204_v3  ;;  %v120_v27 = vsub.f32 1.0, %v119_v26 }
   0xc   :  { %v121_v28 = vmul.f32 %v217_v25, %v120_v27 }
   0xe   :  { %83 = vmatpush.bf16.msra.mxu0 %v203_v4  ;;  %v122_v29 = vadd.f32 %v217_v25, %v121_v28 }
  0x10   :  { %v124_v30 = vsel %vm123_vm2, %v217_v25, %v122_v29 }
  0x11   :  { %201 = vmatmul.msk.bf16.vlgmr.msra.gmra.mxu0 %vm72_vm1, %v202_v5 }
  0x8e   :  { %v85_v7 = vpop.f32.mrf.mxu0 }
  0x8f   :  { %v90_v8 = vadd.f32 %v85_v7, %v31_v6 }
  0x91   :  { %93 = vst.msk [vmem:[#allocation2] sm:$0xff] %vm28_vm0, %v90_v8 }
  0x96   :  { %v87_v12 = vpop.f32.mrf.mxu0 }
  0x97   :  { %v91_v13 = vadd.f32 %v87_v12, %v32_v9 }
  0x98   :  { %v98_v15 = vld [vmem:[#allocation2] sm:$0xff] }
  0x99   :  { %94 = vst.msk [vmem:[#allocation2 + $0x8] sm:$0xff] %vm28_vm0, %v91_v13  ;;  %v104_v16 = vadd.f32 %v213_v11, %v98_v15 }
  0x9b   :  { %v110_v17 = vadd.f32 %v209_v14, %v104_v16 }
  0x9d   :  { %v112_v18 = vsel %vm28_vm0, %v110_v17, 0.0 }
  0x9e   :  { %113 = vadd.xlane.f32.xlu0 %v112_v18 }
  0xa0   :  { %v99_v20 = vld [vmem:[#allocation2 + $0x8] sm:$0xff] }
  0xa1   :  { %v105_v21 = vadd.f32 %v213_v11, %v99_v20 }
  0xa3   :  { %v111_v22 = vadd.f32 %v210_v19, %v105_v21 }
  0xa5   :  { %v115_v23 = vsel %vm28_vm0, %v111_v22, 0.0 }
  0xa6   :  { %116 = vadd.xlane.f32.xlu0 %v115_v23 }
 0x111   :  { %v114_v31 = vpop.xlane.xlu0 %113 }
 0x112   :  { %v125_v32 = vmul.f32 %v124_v30, %v114_v31 }
 0x114   :  { %v127_v33 = vsub.f32 %v110_v17, %v125_v32 }
 0x116   :  { %v129_v34 = vmul.f32 %v127_v33, %v127_v33 }
 0x118   :  { %v131_v35 = vsel %vm28_vm0, %v129_v34, 0.0 }
 0x119   :  { %132 = vadd.xlane.f32.xlu1 %v131_v35  ;;  %v117_v36 = vpop.xlane.xlu0 %116 }
 0x11a   :  { %v126_v37 = vmul.f32 %v124_v30, %v117_v36 }
 0x11c   :  { %v128_v38 = vsub.f32 %v111_v22, %v126_v37 }
 0x11e   :  { %v130_v39 = vmul.f32 %v128_v38, %v128_v38 }
 0x120   :  { %v134_v40 = vsel %vm28_vm0, %v130_v39, 0.0 }
 0x121   :  { %135 = vadd.xlane.f32.xlu1 %v134_v40 }
 0x18c   :  { %v133_v41 = vpop.xlane.xlu1 %132 }
 0x18d   :  { %v137_v42 = vmul.f32 %v133_v41, %v124_v30 }
 0x18f   :  { %v139_v43 = vadd.f32 1e-12, %v137_v42 }
 0x191   :  { %218 = vrsqrt.f32 %v139_v43  ;;  %vm147_vm4 = vweird.f32 %v139_v43 }
 0x194   :  { %v136_v44 = vpop.xlane.xlu1 %135 }
 0x195   :  { %v138_v45 = vmul.f32 %v136_v44, %v124_v30 }
 0x197   :  { %v219_v46 = vpop.eup %218  ;;  %v140_v47 = vadd.f32 1e-12, %v138_v45 }
 0x198   :  { %v142_v48 = vmul.f32 %v219_v46, %v139_v43  ;;  %vm148_vm3 = vweird.f32 %v219_v46 }
 0x199   :  { %220 = vrsqrt.f32 %v140_v47  ;;  %vm149_vm5 = vmor %vm147_vm4, %vm148_vm3  ;;  %vm157_vm7 = vweird.f32 %v140_v47 }
 0x19a   :  { %v143_v49 = vmul.f32 %v219_v46, %v142_v48 }
 0x19c   :  { %v144_v50 = vmul.f32 0.5, %v143_v49 }
 0x19e   :  { %v145_v51 = vsub.f32 1.5, %v144_v50 }
 0x19f   :  { %v221_v52 = vpop.eup %220 }
 0x1a0   :  { %v146_v53 = vmul.f32 %v219_v46, %v145_v51  ;;  %v152_v54 = vmul.f32 %v221_v52, %v140_v47  ;;  %vm158_vm6 = vweird.f32 %v221_v52 }
 0x1a1   :  { %vm159_vm8 = vmor %vm157_vm7, %vm158_vm6 }
 0x1a2   :  { %v150_v56 = vsel %vm149_vm5, %v219_v46, %v146_v53  ;;  %v153_v57 = vmul.f32 %v221_v52, %v152_v54 }
 0x1a3   :  { %v161_v59 = vmul.f32 %v150_v56, %v127_v33 }
 0x1a4   :  { %v154_v60 = vmul.f32 0.5, %v153_v57 }
 0x1a5   :  { %v167_v61 = vmul.f32 %v214_v55, %v161_v59 }
 0x1a6   :  { %v155_v62 = vsub.f32 1.5, %v154_v60 }
 0x1a7   :  { %v173_v63 = vadd.f32 %v215_v58, %v167_v61 }
 0x1a8   :  { %v156_v0 = vmul.f32 %v221_v52, %v155_v62 }
 0x1a9   :  { %175 = vst.msk [vmem:[%s308_s6] sm:$0xff] %vm28_vm0, %v173_v63 }
 0x1aa   :  { %v160_v1 = vsel %vm159_vm8, %v221_v52, %v156_v0 }
 0x1ab   :  { %v162_v2 = vmul.f32 %v160_v1, %v128_v38 }
 0x1ad   :  { %v168_v3 = vmul.f32 %v214_v55, %v162_v2 }
 0x1af   :  { %v174_v4 = vadd.f32 %v215_v58, %v168_v3 }
 0x1b1   :  { %176 = vst.msk [vmem:[%s308_s6 + $0x8] sm:$0xff] %vm28_vm0, %v174_v4 }

// kernel: forward.48
= control target key start
LH: loop header
LB: loop body
LE: loop exit
PB: predicated region body
PF: predicated region fallthrough
CT: control target
= control target key end

     0   :  { %vm19_vm0 = vcmask 254976   ;;  %v89_v1 = vmov 0.0   ;;  %vm39_vm1 = vcmask 261120   ;;  %s128_s1 = inlined_call_operand.vmem [shape: bf16[32,32], index: 1, kind: input, shape index: {}]   ;;  %s129_s2 = inlined_call_operand.vmem [shape: f32[1,32], index: 2, kind: input, shape index: {}]   ;;  %s130_s0 = inlined_call_operand.vmem [shape: bf16[2,32], index: 0, kind: input, shape index: {}]   ;;  %s131_s3 = inlined_call_operand.vmem [shape: f32[2,32], index: 3, kind: output, shape index: {}]  }
   0x1   :  { %v84_v0 = vld [vmem:[%s128_s1 + $0x8] sm:$0xff]  ;;  %20 = vst.msk [vmem:[#allocation2] sm:$0x3] %vm19_vm0, %v89_v1  ;;  %v83_v2 = vld [vmem:[%s128_s1] sm:$0xff] }
   0x2   :  { %49 = vmatpush.bf16.msra.mxu0 %v84_v0  ;;  %v22_v3 = vld [vmem:[%s130_s0] sm:$0x1] }
   0x3   :  { %v86_v7 = vld [vmem:[%s129_s2] ss:$0 sm:$0xff] }
   0x6   :  { %50 = vmatpush.bf16.msra.mxu0 %v83_v2 }
   0x8   :  { %v21_v4 = vld [vmem:[#allocation2] sm:$0x3] }
   0x9   :  { %82 = vmatmul.msk.bf16.vlgmr.msra.gmra.mxu0 %vm39_vm1, %v22_v3 }
  0x86   :  { %v52_v5 = vpop.f32.mrf.mxu0 }
  0x87   :  { %v56_v6 = vadd.f32 %v52_v5, %v21_v4 }
  0x89   :  { %58 = vst.msk [vmem:[#allocation2] sm:$0x3] %vm19_vm0, %v56_v6 }
  0x8e   :  { %v54_v8 = vpop.f32.mrf.mxu0 }
  0x90   :  { %v62_v9 = vld [vmem:[#allocation2] sm:$0x3] }
  0x91   :  { %v67_v10 = vadd.f32 %v86_v7, %v62_v9 }
  0x93   :  { %87 = vtanh.f32 %v67_v10 }
  0x99   :  { %v88_v11 = vpop.eup %87 }
  0x9a   :  { %69 = vst.msk [vmem:[%s131_s3] sm:$0x3] %vm19_vm0, %v88_v11 }

// kernel: forward.49
= control target key start
LH: loop header
LB: loop body
LE: loop exit
PB: predicated region body
PF: predicated region fallthrough
CT: control target
= control target key end

     0   :  { %vm19_vm0 = vcmask 261120   ;;  %v106_v1 = vmov 0.0   ;;  %s152_s1 = inlined_call_operand.vmem [shape: bf16[32,32], index: 1, kind: input, shape index: {}]   ;;  %s153_s2 = inlined_call_operand.vmem [shape: f32[1,32], index: 2, kind: input, shape index: {}]   ;;  %s154_s0 = inlined_call_operand.vmem [shape: bf16[16,32], index: 0, kind: input, shape index: {}]   ;;  %s155_s3 = inlined_call_operand.vmem [shape: f32[16,32], index: 3, kind: output, shape index: {}]  }
   0x1   :  { %v103_v0 = vld [vmem:[%s152_s1 + $0x8] sm:$0xff]  ;;  %20 = vst.msk [vmem:[#allocation2] sm:$0xff] %vm19_vm0, %v106_v1  ;;  %v102_v2 = vld [vmem:[%s152_s1] sm:$0xff] }
   0x2   :  { %21 = vst.msk [vmem:[#allocation2 + $0x8] sm:$0xff] %vm19_vm0, %v106_v1  ;;  %57 = vmatpush.bf16.msra.mxu0 %v103_v0  ;;  %v101_v3 = vld [vmem:[%s154_s0] sm:$0xff] }
   0x3   :  { %v105_v8 = vld [vmem:[%s153_s2] ss:$0 sm:$0xff] }
   0x6   :  { %58 = vmatpush.bf16.msra.mxu0 %v102_v2 }
   0x8   :  { %v22_v4 = vld [vmem:[#allocation2] sm:$0xff] }
   0x9   :  { %100 = vmatmul.msk.bf16.vlgmr.msra.gmra.mxu0 %vm19_vm0, %v101_v3  ;;  %v23_v7 = vld [vmem:[#allocation2 + $0x8] sm:$0xff] }
  0x86   :  { %v60_v5 = vpop.f32.mrf.mxu0 }
  0x87   :  { %v65_v6 = vadd.f32 %v60_v5, %v22_v4 }
  0x89   :  { %67 = vst.msk [vmem:[#allocation2] sm:$0xff] %vm19_vm0, %v65_v6 }
  0x8e   :  { %v62_v9 = vpop.f32.mrf.mxu0 }
  0x8f   :  { %v66_v10 = vadd.f32 %v62_v9, %v23_v7 }
  0x90   :  { %v72_v11 = vld [vmem:[#allocation2] sm:$0xff] }
  0x91   :  { %v78_v12 = vadd.f32 %v105_v8, %v72_v11  ;;  %68 = vst.msk [vmem:[#allocation2 + $0x8] sm:$0xff] %vm19_vm0, %v66_v10 }
  0x93   :  { %v80_v13 = vmax.f32 %v78_v12, 0.0 }
  0x95   :  { %82 = vst.msk [vmem:[%s155_s3] sm:$0xff] %vm19_vm0, %v80_v13 }
  0x98   :  { %v73_v14 = vld [vmem:[#allocation2 + $0x8] sm:$0xff] }
  0x99   :  { %v79_v15 = vadd.f32 %v105_v8, %v73_v14 }
  0x9b   :  { %v81_v16 = vmax.f32 %v79_v15, 0.0 }
  0x9d   :  { %83 = vst.msk [vmem:[%s155_s3 + $0x8] sm:$0xff] %vm19_vm0, %v81_v16 }

// kernel: forward.40
= control target key start
LH: loop header
LB: loop body
LE: loop exit
PB: predicated region body
PF: predicated region fallthrough
CT: control target
= control target key end

     0   :  { %s577_s18 = smov 0   ;;  %s646_s0 = inlined_call_operand.vmem [shape: f32[2,8,32], index: 0, kind: input, shape index: {}]   ;;  %s647_s1 = inlined_call_operand.vmem [shape: f32[2,8,32], index: 1, kind: input, shape index: {}]   ;;  %s648_s2 = inlined_call_operand.vmem [shape: f32[2,8,1], index: 2, kind: input, shape index: {}]   ;;  %s649_s3 = inlined_call_operand.vmem [shape: f32[2,8,32], index: 3, kind: output, shape index: {0}]   ;;  %s650_s4 = inlined_call_operand.vmem [shape: f32[2,8,32], index: 4, kind: output, shape index: {1}]   ;;  %s651_s5 = inlined_call_operand.vmem [shape: f32[1,2], index: 5, kind: output, shape index: {2}]  }
   0x1 LB: > { %s501_s19 = sadd.s32 4294967295, %s542_s18   ;;  %p505_p0 = scmp.ge.s32.totalorder %s542_s18, 1  ;;  %s542_s18 = sphi %s577_s18, %s16_s18  }
   0x2   : > { %p204_p1 = scmp.lt.s32.totalorder %s542_s18, 3 }
   0x4   : > { %p205_p2 = pnand %p505_p0, %p204_p1 }
   0x5   : > { %p242_p3 = scmp.lt.s32.totalorder (!%p205_p2), %s501_s19, 1  ;;  %p511_p4 = scmp.ne.s32.totalorder (!%p205_p2), %s501_s19, 0 }
   0x6   : > { %208 = sbr.rel (%p205_p2) target bundleno = 574 (0x23e), region = 32 }
   0xb   : > { %s243_s20 = scalar_select %p242_p3, %s501_s19, 1 }
   0xc   : > { %265 = sbr.rel (%p511_p4) target bundleno = 19 (0x13), region = 36 }
   0xd   : > { %s585_s21 = sshll.u32 %s243_s20, 3 }
   0xe   : > { %s245_s24 = scalar_lea.vmem %s646_s0, %s585_s21  ;;  %s249_s27 = scalar_lea.vmem %s647_s1, %s585_s21 }
   0xf   : > { %s253_s30 = scalar_lea.vmem %s648_s2, %s585_s21  ;;  %s257_s8 = scalar_lea.vmem %s649_s3, %s585_s21 }
  0x10   : > { %s261_s11 = scalar_lea.vmem %s650_s4, %s585_s21 }
  0x11   : > { %vm266_vm0 = vcmask 8192   ;;  %v544_v0 = vmov 0.0  }
  0x12   : > { %267 = vst.msk [vmem:[%s651_s5] sm:$0x1] %vm266_vm0, %v544_v0 }
  0x13 PF: > { %v269_v1 = vld [vmem:[%s249_s27] sm:$0xff]  ;;  %vm272_vm1 = vcmask 261120   ;;  %v346_v27 = vlaneseq  ;;  %vm333_vm8 = vcmask 64512   ;;  %vm361_vm11 = vcmask 7168   ;;  %s546_s21 = smov 1  }
  0x14   : > { %v288_v2 = vmul.f32 %v269_v1, %v269_v1  ;;  %v268_v3 = vld [vmem:[%s245_s24] sm:$0xff]  ;;  %v545_v40 = vmov 0.0   ;;  %vm385_vm12 = vcmask 8192  }
  0x15   : > { %v271_v5 = vmul.f32 %v268_v3, %v268_v3  ;;  %v347_v30 = vshrl.u32 %v346_v27, 7  ;;  %v349_v31 = vand.u32 127, %v346_v27  ;;  %v270_v38 = vld [vmem:[%s253_s30] sm:$0xff] }
  0x16   : > { %v289_v4 = vsel %vm272_vm1, %v288_v2, 0.0 }
  0x17   : > { %290 = vadd.xlane.f32.xlu0 %v289_v4  ;;  %v273_v6 = vsel %vm272_vm1, %v271_v5, 0.0  ;;  %vm350_vm9 = vcmp.eq.s32.totalorder %v347_v30, %v349_v31 }
  0x19   : > { %v378_v0 = vld [vmem:[%s651_s5] sm:$0x1] }
  0x1f   : > { %274 = vadd.xlane.f32.xlu0 %v273_v6 }
  0x8a   : > { %v291_v7 = vpop.xlane.xlu0 %290 }
  0x8b   : > { %v292_v8 = vadd.f32 1e-24, %v291_v7 }
  0x8d   : > { %528 = vrsqrt.f32 %v292_v8  ;;  %vm299_vm3 = vweird.f32 %v292_v8 }
  0x92   : > { %v275_v9 = vpop.xlane.xlu0 %274 }
  0x93   : > { %v529_v10 = vpop.eup %528  ;;  %v276_v11 = vadd.f32 1e-24, %v275_v9 }
  0x94   : > { %v294_v12 = vmul.f32 %v529_v10, %v292_v8  ;;  %vm300_vm2 = vweird.f32 %v529_v10 }
  0x95   : > { %530 = vrsqrt.f32 %v276_v11  ;;  %vm301_vm4 = vmor %vm299_vm3, %vm300_vm2  ;;  %vm283_vm6 = vweird.f32 %v276_v11 }
  0x96   : > { %v295_v13 = vmul.f32 %v529_v10, %v294_v12 }
  0x98   : > { %v296_v14 = vmul.f32 0.5, %v295_v13 }
  0x9a   : > { %v297_v15 = vsub.f32 1.5, %v296_v14 }
  0x9b   : > { %v531_v16 = vpop.eup %530 }
  0x9c   : > { %v278_v17 = vmul.f32 %v531_v16, %v276_v11  ;;  %v298_v18 = vmul.f32 %v529_v10, %v297_v15  ;;  %vm284_vm5 = vweird.f32 %v531_v16 }
  0x9d   : > { %vm285_vm7 = vmor %vm283_vm6, %vm284_vm5 }
  0x9e   : > { %v279_v19 = vmul.f32 %v531_v16, %v278_v17  ;;  %v302_v20 = vsel %vm301_vm4, %v529_v10, %v298_v18 }
  0x9f   : > { %v303_v21 = vmul.f32 %v302_v20, %v269_v1 }
  0xa0   : > { %v280_v22 = vmul.f32 0.5, %v279_v19 }
  0xa1   : > { %305 = vst.msk [vmem:[%s261_s11] sm:$0xff] %vm272_vm1, %v303_v21  ;;  %512 = vmatpush.xpose.msk.msra.mxu0 %vm272_vm1, %v303_v21 }
  0xa2   : > { %v281_v23 = vsub.f32 1.5, %v280_v22 }
  0xa4   : > { %v282_v24 = vmul.f32 %v531_v16, %v281_v23 }
  0xa6   : > { %v286_v25 = vsel %vm285_vm7, %v531_v16, %v282_v24 }
  0xa7   : > { %v287_v26 = vmul.f32 %v286_v25, %v268_v3 }
  0xa9   : > { %304 = vst.msk [vmem:[%s257_s8] sm:$0xff] %vm272_vm1, %v287_v26  ;;  %513 = vmatmul.msk.f32.vlgmr.msra.gmra.mxu0 %vm272_vm1, %v287_v26 }
 0x126   : > { %v329_v28 = vpop.f32.mrf.mxu0 }
 0x127   : > { %v332_v29 = vmul.f32 100.0, %v329_v28 }
 0x129   : > { %v334_v32 = vsel %vm333_vm8, %v332_v29, -inf  ;;  %v351_v33 = vsel %vm350_vm9, %v332_v29, 0.0 }
 0x12a   : > { %335 = vmax.xlane.f32.xlu1 %v334_v32  ;;  %v352_v34 = vsel %vm333_vm8, %v351_v33, 0.0 }
 0x132   : > { %353 = vadd.xlane.f32.xlu1 %v352_v34 }
 0x19d   : > { %v336_v35 = vpop.xlane.xlu1 %335 }
 0x19e   : > { %v337_v36 = vsub.f32 %v332_v29, %v336_v35 }
 0x1a0   : > { %v338_v37 = vmul.f32 1.442695, %v337_v36 }
 0x1a2   : > { %532 = vpow2.f32 %v338_v37 }
 0x1a5   : > { %v354_v39 = vpop.xlane.xlu1 %353 }
 0x1a6   : > { %vm356_vm10 = vcmp.ge.f32.partialorder %v354_v39, %v336_v35 }
 0x1a7   : > { %v514_v41 = vsel %vm356_vm10, 1.0, %v545_v40 }
 0x1a8   : > { %v533_v42 = vpop.eup %532  ;;  %v369_v43 = vmul.f32 %v514_v41, %v270_v38 }
 0x1a9   : > { %v340_v44 = vsel %vm333_vm8, %v533_v42, 0.0 }
 0x1aa   : > { %v371_v45 = vsel %vm361_vm11, %v369_v43, 0.0  ;;  %341 = vadd.xlane.f32.xlu2 %v340_v44 }
 0x1ab   : > { %v372_v46 = vrot.slane %v371_v45, 4 }
 0x1ad   : > { %v373_v47 = vadd.f32 %v372_v46, %v371_v45 }
 0x1af   : > { %v374_v48 = vrot.slane %v373_v47, 2 }
 0x1b1   : > { %v375_v49 = vadd.f32 %v374_v48, %v373_v47 }
 0x1b3   : > { %v376_v50 = vrot.slane %v375_v49, 1 }
 0x1b5   : > { %v377_v51 = vadd.f32 %v376_v50, %v375_v49 }
 0x1c2   : > { %380 = vrot.lane.b32.xlu2 %v377_v51, %s546_s21 }
 0x21d   : > { %v342_v52 = vpop.xlane.xlu2 %341 }
 0x21e   : > { %534 = vlog2.f32 %v342_v52 }
 0x224   : > { %v535_v53 = vpop.eup %534 }
 0x225   : > { %v344_v54 = vmul.f32 0.6931472, %v535_v53  ;;  %v381_v2 = vpop.permute.xlu2 %380 }
 0x227   : > { %v345_v55 = vadd.f32 %v344_v54, %v336_v35 }
 0x229   : > { %v355_v56 = vsub.f32 %v345_v55, %v354_v39 }
 0x22b   : > { %v359_v57 = vmul.f32 %v355_v56, %v270_v38 }
 0x22d   : > { %v362_v58 = vsel %vm361_vm11, %v359_v57, 0.0 }
 0x22e   : > { %v363_v59 = vrot.slane %v362_v58, 4 }
 0x230   : > { %v364_v60 = vadd.f32 %v363_v59, %v362_v58 }
 0x232   : > { %v365_v61 = vrot.slane %v364_v60, 2 }
 0x234   : > { %v366_v62 = vadd.f32 %v365_v61, %v364_v60 }
 0x236   : > { %v367_v63 = vrot.slane %v366_v62, 1 }
 0x238   : > { %v368_v1 = vadd.f32 %v367_v63, %v366_v62 }
 0x23a   : > { %v383_v3 = vsel %vm361_vm11, %v368_v1, %v381_v2 }
 0x23b   : > { %v384_v4 = vadd.f32 %v383_v3, %v378_v0 }
 0x23d   : > { %386 = vst.msk [vmem:[%s651_s5] sm:$0x1] %vm385_vm12, %v384_v4 }
 0x23e PF: > { %s16_s18 = sadd.s32 1, %s542_s18  }
 0x23f   : > { %p13_p5 = scmp.ge.s32.totalorder %s16_s18, 4  }
 0x241   :  { %15 = sbr.rel (!%p13_p5) target bundleno = 1 (0x1), region = 92 }

// kernel: forward.32
= control target key start
LH: loop header
LB: loop body
LE: loop exit
PB: predicated region body
PF: predicated region fallthrough
CT: control target
= control target key end

     0   :  { %vm19_vm0 = vcmask 523264   ;;  %v105_v1 = vmov 0.0   ;;  %vm47_vm1 = vcmask 261120   ;;  %s150_s1 = inlined_call_operand.vmem [shape: bf16[32,64], index: 1, kind: input, shape index: {}]   ;;  %s151_s2 = inlined_call_operand.vmem [shape: f32[1,64], index: 2, kind: input, shape index: {}]   ;;  %s152_s0 = inlined_call_operand.vmem [shape: bf16[16,32], index: 0, kind: input, shape index: {}]   ;;  %s153_s3 = inlined_call_operand.vmem [shape: f32[16,64], index: 3, kind: output, shape index: {}]  }
   0x1   :  { %v102_v0 = vld [vmem:[%s150_s1 + $0x8] sm:$0xff]  ;;  %20 = vst.msk [vmem:[#allocation2] sm:$0xff] %vm19_vm0, %v105_v1  ;;  %v101_v2 = vld [vmem:[%s150_s1] sm:$0xff] }
   0x2   :  { %21 = vst.msk [vmem:[#allocation2 + $0x8] sm:$0xff] %vm19_vm0, %v105_v1  ;;  %57 = vmatpush.bf16.msra.mxu0 %v102_v0  ;;  %v100_v3 = vld [vmem:[%s152_s0] sm:$0xff] }
   0x3   :  { %v104_v8 = vld [vmem:[%s151_s2] ss:$0 sm:$0xff] }
   0x6   :  { %58 = vmatpush.bf16.msra.mxu0 %v101_v2 }
   0x8   :  { %v22_v4 = vld [vmem:[#allocation2] sm:$0xff] }
   0x9   :  { %99 = vmatmul.msk.bf16.vlgmr.msra.gmra.mxu0 %vm47_vm1, %v100_v3  ;;  %v23_v7 = vld [vmem:[#allocation2 + $0x8] sm:$0xff] }
  0x86   :  { %v60_v5 = vpop.f32.mrf.mxu0 }
  0x87   :  { %v65_v6 = vadd.f32 %v60_v5, %v22_v4 }
  0x89   :  { %68 = vst.msk [vmem:[#allocation2] sm:$0xff] %vm19_vm0, %v65_v6 }
  0x8e   :  { %v62_v9 = vpop.f32.mrf.mxu0 }
  0x8f   :  { %v66_v10 = vadd.f32 %v62_v9, %v23_v7 }
  0x90   :  { %v73_v11 = vld [vmem:[#allocation2] sm:$0xff] }
  0x91   :  { %v79_v12 = vadd.f32 %v104_v8, %v73_v11  ;;  %69 = vst.msk [vmem:[#allocation2 + $0x8] sm:$0xff] %vm19_vm0, %v66_v10 }
  0x93   :  { %81 = vst.msk [vmem:[%s153_s3] sm:$0xff] %vm19_vm0, %v79_v12 }
  0x98   :  { %v74_v13 = vld [vmem:[#allocation2 + $0x8] sm:$0xff] }
  0x99   :  { %v80_v14 = vadd.f32 %v104_v8, %v74_v13 }
  0x9b   :  { %82 = vst.msk [vmem:[%s153_s3 + $0x8] sm:$0xff] %vm19_vm0, %v80_v14 }

// kernel: forward.31
= control target key start
LH: loop header
LB: loop body
LE: loop exit
PB: predicated region body
PF: predicated region fallthrough
CT: control target
= control target key end

     0   :  { %vm25_vm0 = vcmask 261120   ;;  %v207_v1 = vmov 0.0   ;;  %v208_v35 = vmov 32.0   ;;  %vm169_vm6 = vcmask 257024   ;;  %s272_s1 = inlined_call_operand.vmem [shape: bf16[32,32], index: 1, kind: input, shape index: {}]   ;;  %s273_s0 = inlined_call_operand.vmem [shape: bf16[16,32], index: 0, kind: input, shape index: {}]   ;;  %s274_s2 = inlined_call_operand.vmem [shape: f32[1,32], index: 2, kind: input, shape index: {}]   ;;  %s275_s3 = inlined_call_operand.vmem [shape: f32[1,32], index: 3, kind: input, shape index: {}]   ;;  %s276_s4 = inlined_call_operand.vmem [shape: f32[1,32], index: 4, kind: input, shape index: {}]   ;;  %s277_s5 = inlined_call_operand.vmem [shape: bf16[16,32], index: 5, kind: output, shape index: {}]  }
   0x1   :  { %v191_v0 = vld [vmem:[%s272_s1 + $0x8] sm:$0xff]  ;;  %26 = vst.msk [vmem:[#allocation2] sm:$0xff] %vm25_vm0, %v207_v1  ;;  %v190_v2 = vld [vmem:[%s272_s1] sm:$0xff] }
   0x2   :  { %27 = vst.msk [vmem:[#allocation2 + $0x8] sm:$0xff] %vm25_vm0, %v207_v1  ;;  %63 = vmatpush.bf16.msra.mxu0 %v191_v0  ;;  %v189_v3 = vld [vmem:[%s273_s0] sm:$0xff] }
   0x3   :  { %v194_v8 = vld [vmem:[%s274_s2] ss:$0 sm:$0xff] }
   0x6   :  { %64 = vmatpush.bf16.msra.mxu0 %v190_v2  ;;  %v195_v2 = vld [vmem:[%s275_s3] ss:$0 sm:$0xff] }
   0x8   :  { %v28_v4 = vld [vmem:[#allocation2] sm:$0xff] }
   0x9   :  { %188 = vmatmul.msk.bf16.vlgmr.msra.gmra.mxu0 %vm25_vm0, %v189_v3  ;;  %v29_v7 = vld [vmem:[#allocation2 + $0x8] sm:$0xff] }
  0x86   :  { %v66_v5 = vpop.f32.mrf.mxu0 }
  0x87   :  { %v71_v6 = vadd.f32 %v66_v5, %v28_v4  ;;  %v196_v5 = vld [vmem:[%s276_s4] ss:$0 sm:$0xff] }
  0x89   :  { %73 = vst.msk [vmem:[#allocation2] sm:$0xff] %vm25_vm0, %v71_v6 }
  0x8e   :  { %v68_v9 = vpop.f32.mrf.mxu0 }
  0x8f   :  { %v72_v10 = vadd.f32 %v68_v9, %v29_v7 }
  0x90   :  { %v78_v11 = vld [vmem:[#allocation2] sm:$0xff] }
  0x91   :  { %74 = vst.msk [vmem:[#allocation2 + $0x8] sm:$0xff] %vm25_vm0, %v72_v10  ;;  %v84_v12 = vadd.f32 %v194_v8, %v78_v11 }
  0x93   :  { %v88_v13 = vmul.f32 0.044715, %v84_v12  ;;  %v86_v26 = vmul.f32 0.5, %v84_v12 }
  0x95   :  { %v90_v14 = vmul.f32 %v88_v13, %v84_v12 }
  0x97   :  { %v92_v15 = vmul.f32 %v90_v14, %v84_v12 }
  0x98   :  { %v79_v16 = vld [vmem:[#allocation2 + $0x8] sm:$0xff] }
  0x99   :  { %v94_v17 = vadd.f32 %v92_v15, %v84_v12  ;;  %v85_v18 = vadd.f32 %v194_v8, %v79_v16 }
  0x9b   :  { %v96_v19 = vmul.f32 0.7978846, %v94_v17  ;;  %v89_v20 = vmul.f32 0.044715, %v85_v18  ;;  %v87_v31 = vmul.f32 0.5, %v85_v18 }
  0x9d   :  { %197 = vtanh.f32 %v96_v19  ;;  %v91_v21 = vmul.f32 %v89_v20, %v85_v18 }
  0x9f   :  { %v93_v22 = vmul.f32 %v91_v21, %v85_v18 }
  0xa1   :  { %v95_v23 = vadd.f32 %v93_v22, %v85_v18 }
  0xa3   :  { %v198_v24 = vpop.eup %197  ;;  %v97_v25 = vmul.f32 0.7978846, %v95_v23 }
  0xa4   :  { %v100_v27 = vadd.f32 1.0, %v198_v24 }
  0xa5   :  { %199 = vtanh.f32 %v97_v25 }
  0xa6   :  { %v102_v28 = vmul.f32 %v100_v27, %v86_v26  ;;  %201 = vrcp.f32 %v208_v35 }
  0xa8   :  { %v104_v29 = vsel %vm25_vm0, %v102_v28, 0.0 }
  0xa9   :  { %105 = vadd.xlane.f32.xlu0 %v104_v29 }
  0xab   :  { %v200_v30 = vpop.eup %199 }
  0xac   :  { %v101_v32 = vadd.f32 1.0, %v200_v30  ;;  %v202_v36 = vpop.eup %201 }
  0xad   :  { %v111_v37 = vmul.f32 32.0, %v202_v36  ;;  %vm115_vm1 = vweird.f32 %v202_v36 }
  0xae   :  { %v103_v33 = vmul.f32 %v101_v32, %v87_v31 }
  0xaf   :  { %v112_v38 = vsub.f32 1.0, %v111_v37 }
  0xb0   :  { %v107_v34 = vsel %vm25_vm0, %v103_v33, 0.0 }
  0xb1   :  { %108 = vadd.xlane.f32.xlu0 %v107_v34  ;;  %v113_v39 = vmul.f32 %v202_v36, %v112_v38 }
  0xb3   :  { %v114_v40 = vadd.f32 %v202_v36, %v113_v39 }
  0xb5   :  { %v116_v41 = vsel %vm115_vm1, %v202_v36, %v114_v40 }
 0x11c   :  { %v106_v42 = vpop.xlane.xlu0 %105 }
 0x11d   :  { %v117_v43 = vmul.f32 %v116_v41, %v106_v42 }
 0x11f   :  { %v119_v44 = vsub.f32 %v102_v28, %v117_v43 }
 0x121   :  { %v121_v45 = vmul.f32 %v119_v44, %v119_v44 }
 0x123   :  { %v123_v46 = vsel %vm25_vm0, %v121_v45, 0.0 }
 0x124   :  { %124 = vadd.xlane.f32.xlu1 %v123_v46  ;;  %v109_v47 = vpop.xlane.xlu0 %108 }
 0x125   :  { %v118_v48 = vmul.f32 %v116_v41, %v109_v47 }
 0x127   :  { %v120_v49 = vsub.f32 %v103_v33, %v118_v48 }
 0x129   :  { %v122_v50 = vmul.f32 %v120_v49, %v120_v49 }
 0x12b   :  { %v126_v51 = vsel %vm25_vm0, %v122_v50, 0.0 }
 0x12c   :  { %127 = vadd.xlane.f32.xlu1 %v126_v51 }
 0x197   :  { %v125_v52 = vpop.xlane.xlu1 %124 }
 0x198   :  { %v129_v53 = vmul.f32 %v125_v52, %v116_v41 }
 0x19a   :  { %v131_v54 = vadd.f32 1e-12, %v129_v53 }
 0x19c   :  { %203 = vrsqrt.f32 %v131_v54  ;;  %vm139_vm3 = vweird.f32 %v131_v54 }
 0x19f   :  { %v128_v55 = vpop.xlane.xlu1 %127 }
 0x1a0   :  { %v130_v56 = vmul.f32 %v128_v55, %v116_v41 }
 0x1a2   :  { %v204_v57 = vpop.eup %203  ;;  %v132_v58 = vadd.f32 1e-12, %v130_v56 }
 0x1a3   :  { %v134_v59 = vmul.f32 %v204_v57, %v131_v54  ;;  %vm140_vm2 = vweird.f32 %v204_v57 }
 0x1a4   :  { %205 = vrsqrt.f32 %v132_v58  ;;  %vm141_vm4 = vmor %vm139_vm3, %vm140_vm2  ;;  %vm149_vm7 = vweird.f32 %v132_v58 }
 0x1a5   :  { %v135_v60 = vmul.f32 %v204_v57, %v134_v59 }
 0x1a7   :  { %v136_v61 = vmul.f32 0.5, %v135_v60 }
 0x1a9   :  { %v137_v62 = vsub.f32 1.5, %v136_v61 }
 0x1aa   :  { %v206_v63 = vpop.eup %205 }
 0x1ab   :  { %v138_v0 = vmul.f32 %v204_v57, %v137_v62  ;;  %v144_v1 = vmul.f32 %v206_v63, %v132_v58  ;;  %vm150_vm5 = vweird.f32 %v206_v63 }
 0x1ac   :  { %vm151_vm8 = vmor %vm149_vm7, %vm150_vm5 }
 0x1ad   :  { %v142_v3 = vsel %vm141_vm4, %v204_v57, %v138_v0  ;;  %v145_v4 = vmul.f32 %v206_v63, %v144_v1 }
 0x1ae   :  { %v153_v6 = vmul.f32 %v142_v3, %v119_v44 }
 0x1af   :  { %v146_v7 = vmul.f32 0.5, %v145_v4 }
 0x1b0   :  { %v159_v8 = vmul.f32 %v195_v2, %v153_v6 }
 0x1b1   :  { %v147_v9 = vsub.f32 1.5, %v146_v7 }
 0x1b2   :  { %v165_v10 = vadd.f32 %v196_v5, %v159_v8 }
 0x1b3   :  { %v148_v11 = vmul.f32 %v206_v63, %v147_v9 }
 0x1b4   :  { %v167_v12 = vpack.c.bf16 %v165_v10, %v165_v10 }
 0x1b5   :  { %v152_v13 = vsel %vm151_vm8, %v206_v63, %v148_v11 }
 0x1b6   :  { %170 = vst.msk [vmem:[%s277_s5] sm:$0xf] %vm169_vm6, %v167_v12  ;;  %v154_v14 = vmul.f32 %v152_v13, %v120_v49 }
 0x1b8   :  { %v160_v15 = vmul.f32 %v195_v2, %v154_v14 }
 0x1ba   :  { %v166_v16 = vadd.f32 %v196_v5, %v160_v15 }
 0x1bc   :  { %v168_v17 = vpack.c.bf16 %v166_v16, %v166_v16 }
 0x1be   :  { %171 = vst.msk [vmem:[%s277_s5 + $0x4] sm:$0xf] %vm169_vm6, %v168_v17 }

// kernel: forward.33
= control target key start
LH: loop header
LB: loop body
LE: loop exit
PB: predicated region body
PF: predicated region fallthrough
CT: control target
= control target key end

     0   :  { %vm43_vm0 = vcmask 523264   ;;  %v198_v0 = vmov 0   ;;  %vm25_vm1 = vcmask 7168   ;;  %v199_v7 = vmov -inf   ;;  %s201_s22 = smov 1   ;;  %s293_s1 = inlined_call_operand.vmem [shape: s32[16,1], index: 1, kind: input, shape index: {}]   ;;  %s294_s0 = inlined_call_operand.vmem [shape: f32[16,64], index: 0, kind: input, shape index: {}]   ;;  %s295_s2 = inlined_call_operand.vmem [shape: f32[16,1], index: 2, kind: input, shape index: {}]   ;;  %s296_s3 = inlined_call_operand.vmem [shape: f32[1,2], index: 3, kind: output, shape index: {}]  }
   0x1   :  { %183 = vset.pattern.permute.xlu1 %v198_v0  ;;  %v34_v1 = vld [vmem:[%s293_s1] sm:$0xff]  ;;  %184 = vset.pattern.permute.xlu2 %v198_v0  ;;  %v33_v4 = vld [vmem:[%s294_s0 + $0x8] sm:$0xff]  ;;  %26 = vst.msk [vmem:[#allocation2] sm:$0xff] %vm25_vm1, %v199_v7  ;;  %v200_v8 = vmov 0.0   ;;  %v37_v9 = vlaneseq  ;;  %vm20_vm6 = vcmask 8192  }
   0x2   :  { %v32_v2 = vld [vmem:[%s294_s0] sm:$0xff]  ;;  %94 = vperm.xlu1 %183, %v34_v1   ;;  %185 = vset.pattern.permute.xlu0 %v198_v0  ;;  %v35_v5 = vld [vmem:[%s293_s1 + $0x8] sm:$0xff]  ;;  %v47_v6 = vsel %vm43_vm0, %v33_v4, -inf  ;;  %27 = vst.msk [vmem:[#allocation2 + $0x8] sm:$0xff] %vm25_vm1, %v199_v7 }
   0x3   :  { %v44_v3 = vsel %vm43_vm0, %v32_v2, -inf  ;;  %30 = vst.msk [vmem:[#allocation4] sm:$0xff] %vm25_vm1, %v200_v8  ;;  %v38_v10 = vand.u32 127, %v37_v9  ;;  %v136_v44 = vld [vmem:[%s295_s2] sm:$0xff]  ;;  %v137_v47 = vld [vmem:[%s295_s2 + $0x8] sm:$0xff] }
   0x4   :  { %45 = vmax.xlane.f32.xlu0 %v44_v3  ;;  %28 = vst.msk [vmem:[#allocation3] sm:$0xff] %vm25_vm1, %v200_v8 }
   0x5   :  { %29 = vst.msk [vmem:[#allocation3 + $0x8] sm:$0xff] %vm25_vm1, %v200_v8 }
   0x6   :  { %31 = vst.msk [vmem:[#allocation4 + $0x8] sm:$0xff] %vm25_vm1, %v200_v8 }
   0x7   :  { %21 = vst.msk [vmem:[%s296_s3] sm:$0x1] %vm20_vm6, %v200_v8 }
   0x8   :  { %v246_v12 = vld [vmem:[#allocation2] sm:$0xff] }
   0x9   :  { %v42_v19 = vld [vmem:[#allocation2 + $0x8] sm:$0xff] }
   0xa   :  { %97 = vperm.xlu1 %183, %v35_v5   ;;  %v91_v35 = vld [vmem:[#allocation4] sm:$0xff] }
   0xb   :  { %v58_v63 = vld [vmem:[#allocation3] sm:$0xff] }
   0xc   :  { %48 = vmax.xlane.f32.xlu0 %v47_v6 }
   0xd   :  { %v92_v38 = vld [vmem:[#allocation4 + $0x8] sm:$0xff] }
  0x74   :  { %v95_v11 = vpop.permute.xlu1 %94 }
  0x75   :  { %vm99_vm2 = vcmp.eq.s32.totalorder %v38_v10, %v95_v11 }
  0x76   :  { %v101_v14 = vsel %vm99_vm2, %v32_v2, 0.0 }
  0x77   :  { %v46_v13 = vpop.xlane.xlu0 %45  ;;  %v103_v16 = vsel %vm43_vm0, %v101_v14, 0.0 }
  0x78   :  { %v249_v15 = vmax.f32 %v246_v12, %v46_v13  ;;  %104 = vadd.xlane.f32.xlu0 %v103_v16 }
  0x7a   :  { %v52_v17 = vsub.f32 %v246_v12, %v249_v15  ;;  %89 = vst.msk [vmem:[#allocation2] sm:$0xff] %vm25_vm1, %v249_v15  ;;  %64 = vperm.xlu2 %184, %v249_v15  }
  0x7c   :  { %v98_v18 = vpop.permute.xlu1 %97  ;;  %v54_v60 = vmul.f32 1.442695, %v52_v17 }
  0x7d   :  { %vm100_vm3 = vcmp.eq.s32.totalorder %v38_v10, %v98_v18 }
  0x7e   :  { %v102_v21 = vsel %vm100_vm3, %v33_v4, 0.0 }
  0x7f   :  { %v49_v20 = vpop.xlane.xlu0 %48  ;;  %v106_v23 = vsel %vm43_vm0, %v102_v21, 0.0 }
  0x80   :  { %v51_v22 = vmax.f32 %v42_v19, %v49_v20  ;;  %107 = vadd.xlane.f32.xlu1 %v106_v23 }
  0x81   :  { %v116_v42 = vld [vmem:[#allocation2] sm:$0xff] }
  0x82   :  { %v53_v24 = vsub.f32 %v42_v19, %v51_v22  ;;  %90 = vst.msk [vmem:[#allocation2 + $0x8] sm:$0xff] %vm25_vm1, %v51_v22  ;;  %69 = vperm.xlu2 %184, %v51_v22  }
  0x84   :  { %v56_v61 = vmul.f32 1.442695, %v53_v24 }
  0x89   :  { %v117_v45 = vld [vmem:[#allocation2 + $0x8] sm:$0xff] }
  0xd4   :  { %v65_v25 = vpop.permute.xlu2 %64 }
  0xd5   :  { %v72_v26 = vsub.f32 %v32_v2, %v65_v25 }
  0xd7   :  { %v74_v27 = vmul.f32 1.442695, %v72_v26 }
  0xd9   :  { %186 = vpow2.f32 %v74_v27 }
  0xdc   :  { %v70_v28 = vpop.permute.xlu2 %69 }
  0xdd   :  { %v73_v29 = vsub.f32 %v33_v4, %v70_v28  ;;  %v59_v4 = vld [vmem:[#allocation3 + $0x8] sm:$0xff] }
  0xdf   :  { %v187_v30 = vpop.eup %186  ;;  %v76_v31 = vmul.f32 1.442695, %v73_v29  ;;  %v164_v29 = vld [vmem:[%s296_s3] sm:$0x1] }
  0xe0   :  { %v78_v32 = vsel %vm43_vm0, %v187_v30, 0.0 }
  0xe1   :  { %188 = vpow2.f32 %v76_v31  ;;  %79 = vadd.xlane.f32.xlu2 %v78_v32 }
  0xe2   :  { %190 = vpow2.f32 %v54_v60 }
  0xe3   :  { %192 = vpow2.f32 %v56_v61 }
  0xe7   :  { %v189_v33 = vpop.eup %188 }
  0xe8   :  { %v81_v34 = vsel %vm43_vm0, %v189_v33, 0.0  ;;  %v191_v62 = vpop.eup %190 }
  0xe9   :  { %82 = vadd.xlane.f32.xlu0 %v81_v34  ;;  %v60_v0 = vmul.f32 %v191_v62, %v58_v63  ;;  %v193_v3 = vpop.eup %192 }
  0xea   :  { %v61_v5 = vmul.f32 %v193_v3, %v59_v4 }
  0xeb   :  { %v105_v36 = vpop.xlane.xlu0 %104 }
  0xec   :  { %v109_v37 = vadd.f32 %v105_v36, %v91_v35 }
  0xee   :  { %111 = vst.msk [vmem:[#allocation4] sm:$0xff] %vm25_vm1, %v109_v37 }
  0xf3   :  { %v108_v39 = vpop.xlane.xlu1 %107 }
  0xf4   :  { %v110_v40 = vadd.f32 %v108_v39, %v92_v38 }
  0xf5   :  { %v126_v41 = vld [vmem:[#allocation4] sm:$0xff] }
  0xf6   :  { %112 = vst.msk [vmem:[#allocation4 + $0x8] sm:$0xff] %vm25_vm1, %v110_v40  ;;  %vm130_vm4 = vcmp.ge.f32.partialorder %v126_v41, %v116_v42 }
  0xf7   :  { %v177_v43 = vsel %vm130_vm4, 1.0, %v200_v8 }
  0xf8   :  { %v151_v48 = vmul.f32 %v177_v43, %v136_v44 }
  0xfa   :  { %v155_v51 = vsel %vm25_vm1, %v151_v48, 0.0 }
  0xfd   :  { %v127_v46 = vld [vmem:[#allocation4 + $0x8] sm:$0xff] }
  0xfe   :  { %vm131_vm5 = vcmp.ge.f32.partialorder %v127_v46, %v117_v45 }
  0xff   :  { %v178_v49 = vsel %vm131_vm5, 1.0, %v200_v8 }
 0x100   :  { %v152_v50 = vmul.f32 %v178_v49, %v137_v47 }
 0x102   :  { %v156_v52 = vsel %vm25_vm1, %v152_v50, 0.0 }
 0x103   :  { %v157_v53 = vadd.f32 %v156_v52, %v155_v51 }
 0x105   :  { %v158_v54 = vrot.slane %v157_v53, 4 }
 0x107   :  { %v159_v55 = vadd.f32 %v158_v54, %v157_v53 }
 0x109   :  { %v160_v56 = vrot.slane %v159_v55, 2 }
 0x10b   :  { %v161_v57 = vadd.f32 %v160_v56, %v159_v55 }
 0x10d   :  { %v162_v58 = vrot.slane %v161_v57, 1 }
 0x10f   :  { %v163_v59 = vadd.f32 %v162_v58, %v161_v57 }
 0x111   :  { %166 = vrot.lane.b32.xlu0 %v163_v59, %s201_s22 }
 0x154   :  { %v80_v1 = vpop.xlane.xlu2 %79 }
 0x155   :  { %v84_v2 = vadd.f32 %v80_v1, %v60_v0 }
 0x157   :  { %87 = vst.msk [vmem:[#allocation3] sm:$0xff] %vm25_vm1, %v84_v2 }
 0x15c   :  { %v83_v6 = vpop.xlane.xlu0 %82 }
 0x15d   :  { %v85_v7 = vadd.f32 %v83_v6, %v61_v5 }
 0x15e   :  { %v118_v8 = vld [vmem:[#allocation3] sm:$0xff] }
 0x15f   :  { %88 = vst.msk [vmem:[#allocation3 + $0x8] sm:$0xff] %vm25_vm1, %v85_v7  ;;  %194 = vlog2.f32 %v118_v8 }
 0x165   :  { %v195_v9 = vpop.eup %194 }
 0x166   :  { %v119_v10 = vld [vmem:[#allocation3 + $0x8] sm:$0xff]  ;;  %v121_v11 = vmul.f32 0.6931472, %v195_v9 }
 0x167   :  { %196 = vlog2.f32 %v119_v10 }
 0x168   :  { %v124_v12 = vadd.f32 %v121_v11, %v116_v42 }
 0x16a   :  { %v128_v15 = vsub.f32 %v124_v12, %v126_v41 }
 0x16c   :  { %v138_v18 = vmul.f32 %v136_v44, %v128_v15 }
 0x16d   :  { %v197_v13 = vpop.eup %196 }
 0x16e   :  { %v123_v14 = vmul.f32 0.6931472, %v197_v13  ;;  %v142_v20 = vsel %vm25_vm1, %v138_v18, 0.0 }
 0x170   :  { %v125_v16 = vadd.f32 %v123_v14, %v117_v45 }
 0x172   :  { %v129_v17 = vsub.f32 %v125_v16, %v127_v46 }
 0x174   :  { %v139_v19 = vmul.f32 %v137_v47, %v129_v17 }
 0x176   :  { %v143_v21 = vsel %vm25_vm1, %v139_v19, 0.0 }
 0x177   :  { %v144_v22 = vadd.f32 %v143_v21, %v142_v20 }
 0x179   :  { %v145_v23 = vrot.slane %v144_v22, 4 }
 0x17b   :  { %v146_v24 = vadd.f32 %v145_v23, %v144_v22 }
 0x17d   :  { %v147_v25 = vrot.slane %v146_v24, 2 }
 0x17f   :  { %v148_v26 = vadd.f32 %v147_v25, %v146_v24 }
 0x181   :  { %v149_v27 = vrot.slane %v148_v26, 1 }
 0x183   :  { %v150_v28 = vadd.f32 %v149_v27, %v148_v26  ;;  %v167_v30 = vpop.permute.xlu0 %166 }
 0x185   :  { %v169_v31 = vsel %vm25_vm1, %v150_v28, %v167_v30 }
 0x186   :  { %v170_v32 = vadd.f32 %v169_v31, %v164_v29 }
 0x188   :  { %172 = vst.msk [vmem:[%s296_s3] sm:$0x1] %vm20_vm6, %v170_v32 }

</bundles_post_ra>
